<compile_context>
chip_gen: v6e
topology: v6e:2x2x1
jax: 0.10.0
libtpu: 0.0.40
codegen_flags: <defaults>
</compile_context>

<pallas_src>
import numpy as np

import jax
import jax.numpy as jnp
from jax.experimental import pallas as pl
from jax.experimental.pallas import tpu as pltpu

# ---------------------------------------------------------------------------
# Hyper-parameters (the `params` namespace of the PyTorch module).
# Constraint from ConvQE.concat reshape:  k_w * k_h == embed_dim.
# Constraint from QuaternionConv:         num_filt % 4 == 0.
# ---------------------------------------------------------------------------
NUM_ENTS  = 40
NUM_RELS  = 5
EMBED_DIM = 32                       # == init_dim (x_ops == '' -> no projection)
K_W       = 4
K_H       = 8                        # k_w * k_h == embed_dim
KER_SZ    = 3
NUM_FILT  = 8                        # divisible by 4
H_IN      = 2 * K_W                  # conv input height (NCHW)  = 8
W_IN      = K_H                      # conv input width          = 8
FLAT_H    = H_IN - KER_SZ + 1        # 6
FLAT_W    = W_IN - KER_SZ + 1        # 6
FLAT_SZ   = FLAT_H * FLAT_W * NUM_FILT   # 288
BATCH     = 2
BN_EPS    = 1e-5
QNORM_EPS = 1e-4                     # eps inside q_normalize sqrt

# -------- fused / padded layout constants ----------------------------------
LANE      = 128
TILE_B    = 128                      # queries per grid step (fills MXU rows)
COMP_HID  = H_IN * W_IN              # 64 valid lanes / quaternion comp of hid
COMP_CONV = FLAT_SZ // 4             # 72 valid lanes / quaternion comp of conv
PAD_COMP  = LANE                     # each quaternion component -> 128 lanes
HID_W     = 4 * PAD_COMP             # 512 (padded linear output width)
CONVO_W   = 4 * PAD_COMP             # 512 (padded conv output width)
PAD_E     = LANE                     # fc output padded 32 -> 128 lanes
PAD_ENTS  = ((NUM_ENTS + LANE - 1) // LANE) * LANE   # 128 lane-dense score
PAD_ROWS  = LANE                     # combined [ent_lin ; rel_lin] table rows


# ---------------------------------------------------------------------------
# Fused Pallas kernel
# ---------------------------------------------------------------------------
def _q_normalize_lanes(y, relu):
    """Quaternion normalize y:(B, 4*128); component q lives in lanes
    [q*128, (q+1)*128).  Padded lanes are zero and stay zero.  Pure VPU FMAs
    + EUP rsqrt, no cross-lane reductions, all slices 128-lane aligned."""
    r = y[:, 0 * PAD_COMP:1 * PAD_COMP]
    i = y[:, 1 * PAD_COMP:2 * PAD_COMP]
    j = y[:, 2 * PAD_COMP:3 * PAD_COMP]
    k = y[:, 3 * PAD_COMP:4 * PAD_COMP]
    inv = jax.lax.rsqrt(r * r + i * i + j * j + k * k + QNORM_EPS)
    out = jnp.concatenate([r * inv, i * inv, j * inv, k * inv], axis=1)
    return jnp.maximum(out, 0.0) if relu else out


def _convqe_fused_kernel(sub_ref, rel_ref,                 # (TILE_B, 1) int32
                         tab_ref,                          # (128, 512) bf16
                         conv_w_ref, conv_b_ref,           # (512, 512) bf16, (1, 512) f32
                         fc_w_ref, fc_b_ref,               # (512, 128) f32, (1, 128) f32
                         ent_t_ref, ent_bias_ref,          # (128, 128) f32, (1, 128) f32
                         out_ref):                         # (TILE_B, 128) f32
    f32 = jnp.float32

    # 1) gather + concat + nn.Linear + bias as ONE matmul: a "two-hot"
    #    selector picks row sub[b] (ent_lin) and row NUM_ENTS+rel[b]
    #    (rel_lin with lin_b folded in) from the combined lookup table.
    iota = jax.lax.broadcasted_iota(jnp.int32, (TILE_B, PAD_ROWS), 1)
    hot = (iota == sub_ref[...]) | (iota == (rel_ref[...] + NUM_ENTS))
    sel = jnp.where(hot, 1.0, 0.0).astype(jnp.bfloat16)
    hid = jnp.dot(sel, tab_ref[...], preferred_element_type=f32)      # (B, 512)

    # 2) q_normalize over the 4 lane-aligned quaternion components.
    xn = _q_normalize_lanes(hid, relu=False)

    # 3) QuaternionConv: Hamilton weight + im2col folded into one dense matmul
    #    whose columns are already the (padded) NCHW flatten order.
    conv = jnp.dot(xn.astype(jnp.bfloat16), conv_w_ref[...],
                   preferred_element_type=f32) + conv_b_ref[...]

    # 4) q_normalize + ReLU (conve_feature_drop = identity in eval mode).
    z = _q_normalize_lanes(conv, relu=True)

    # 5) fc + eval BatchNorm (folded) + ReLU (hidden dropout = identity).
    h = jnp.maximum(jnp.dot(z, fc_w_ref[...], preferred_element_type=f32)
                    + fc_b_ref[...], 0.0)

    # 6) score against all entities: lane-dense padded stationary RHS.
    out_ref[...] = (jnp.dot(h, ent_t_ref[...], preferred_element_type=f32)
                    + ent_bias_ref[...])


@jax.jit
def convqe_forward(prep, sub, rel):
    b = sub.shape[0]
    b_pad = ((b + TILE_B - 1) // TILE_B) * TILE_B
    sub_p = jnp.zeros((b_pad, 1), jnp.int32).at[:b, 0].set(sub.astype(jnp.int32))
    rel_p = jnp.zeros((b_pad, 1), jnp.int32).at[:b, 0].set(rel.astype(jnp.int32))

    const = lambda i: (0, 0)          # weights: VMEM-resident across grid steps
    out_pad = pl.pallas_call(
        _convqe_fused_kernel,
        out_shape=jax.ShapeDtypeStruct((b_pad, PAD_ENTS), jnp.float32),
        grid=(b_pad // TILE_B,),
        in_specs=[
            pl.BlockSpec((TILE_B, 1), lambda i: (i, 0)),       # sub indices
            pl.BlockSpec((TILE_B, 1), lambda i: (i, 0)),       # rel indices
            pl.BlockSpec((PAD_ROWS, HID_W), const),            # combined table
            pl.BlockSpec((HID_W, CONVO_W), const),             # conv weight
            pl.BlockSpec((1, CONVO_W), const),                 # conv bias
            pl.BlockSpec((CONVO_W, PAD_E), const),             # fc weight (BN folded)
            pl.BlockSpec((1, PAD_E), const),                   # fc bias
            pl.BlockSpec((PAD_E, PAD_ENTS), const),            # entity table^T
            pl.BlockSpec((1, PAD_ENTS), const),                # entity bias
        ],
        out_specs=pl.BlockSpec((TILE_B, PAD_ENTS), lambda i: (i, 0)),
        compiler_params=pltpu.CompilerParams(
            dimension_semantics=("parallel",)),
    )(sub_p, rel_p,
      prep['table'], prep['conv_w'], prep['conv_b'],
      prep['fc_w'], prep['fc_b'],
      prep['ent_t_pad'], prep['ent_bias_pad'])
    return out_pad[:b, :NUM_ENTS]


# ---------------------------------------------------------------------------
# Hamilton-product quaternion conv weight (shared by prep + reference)
# ---------------------------------------------------------------------------
def build_quaternion_conv_weight(rw, iw, jw, kw):
    # component weights: (out_ch//4, in_ch//4, K, K) -> full (Cout, Cin, K, K)
    row_r = jnp.concatenate([rw, -iw, -jw, -kw], axis=1)
    row_i = jnp.concatenate([iw,  rw, -kw,  jw], axis=1)
    row_j = jnp.concatenate([jw,  kw,  rw, -iw], axis=1)
    row_k = jnp.concatenate([kw, -jw,  iw,  rw], axis=1)
    return jnp.concatenate([row_r, row_i, row_j, row_k], axis=0)


# ---------------------------------------------------------------------------
# Parameters (deterministic, shapes per the module __init__)
# ---------------------------------------------------------------------------
def init_params(key):
    ks = jax.random.split(key, 11)

    def xavier(k, shape):
        std = (2.0 / (shape[0] + shape[1])) ** 0.5
        return std * jax.random.normal(k, shape, dtype=jnp.float32)

    p = {}
    p['init_embed'] = xavier(ks[0], (NUM_ENTS, EMBED_DIM))
    p['init_rel']   = xavier(ks[1], (NUM_RELS * 2, EMBED_DIM))
    p['ent_bias']   = jnp.zeros((NUM_ENTS,), jnp.float32)

    # nn.Linear(embed_dim*2, 4*embed_dim*2, bias=True), stored as (in, out)
    p['lin_w'] = 0.05 * jax.random.normal(ks[2], (2 * EMBED_DIM, 8 * EMBED_DIM), jnp.float32)
    p['lin_b'] = 0.01 * jax.random.normal(ks[3], (8 * EMBED_DIM,), jnp.float32)

    # QuaternionConv(4, num_filt, (ker_sz, ker_sz)) component weights
    wq = (NUM_FILT // 4, 1, KER_SZ, KER_SZ)
    p['conv_r'] = 0.1 * jax.random.normal(ks[4], wq, jnp.float32)
    p['conv_i'] = 0.1 * jax.random.normal(ks[5], wq, jnp.float32)
    p['conv_j'] = 0.1 * jax.random.normal(ks[6], wq, jnp.float32)
    p['conv_k'] = 0.1 * jax.random.normal(ks[7], wq, jnp.float32)
    p['conv_b'] = 0.01 * jax.random.normal(ks[8], (NUM_FILT,), jnp.float32)

    # fc: flat_sz -> embed_dim
    p['fc_w'] = 0.05 * jax.random.normal(ks[9], (FLAT_SZ, EMBED_DIM), jnp.float32)
    p['fc_b'] = 0.01 * jax.random.normal(ks[10], (EMBED_DIM,), jnp.float32)

    # BatchNorm1d(embed_dim), eval mode with default init -> folded affine
    gamma = jnp.ones((EMBED_DIM,), jnp.float32)
    beta = jnp.zeros((EMBED_DIM,), jnp.float32)
    running_mean = jnp.zeros((EMBED_DIM,), jnp.float32)
    running_var = jnp.ones((EMBED_DIM,), jnp.float32)
    scale = gamma / jnp.sqrt(running_var + BN_EPS)
    p['bn_scale'] = scale
    p['bn_shift'] = beta - running_mean * scale
    return p


def prepare_inference_params(raw):
    """One-time host-side weight folding so the fused kernel is 4 lane-aligned
    matmuls + elementwise math.  All quaternion-component blocks are padded to
    128 lanes inside the weights themselves (padded lanes are exact zeros)."""
    E = EMBED_DIM
    cw = E // 4
    HoWo = FLAT_H * FLAT_W
    fpc = NUM_FILT // 4               # filters per quaternion component

    # (a) fold the torch.chunk/cat interleave of concat() into the linear weight:
    #     stack = cat([sub, rel])[:, perm]   =>   stack @ W == cat @ W[argsort(perm)]
    perm = np.concatenate([np.concatenate([np.arange(q * cw, (q + 1) * cw),
                                           E + np.arange(q * cw, (q + 1) * cw)])
                           for q in range(4)])
    inv_perm = np.argsort(perm)
    lin_w = np.asarray(raw['lin_w'])[inv_perm, :]                 # (2E, 8E)
    lin_b = np.asarray(raw['lin_b'])                              # (8E,)

    # (b) fold gather + concat + linear + bias into one two-hot lookup table:
    #     hid[b] = ent_lin[sub[b]] + (rel_lin + lin_b)[rel[b]]
    ent_lin = np.asarray(raw['init_embed']) @ lin_w[:E, :]        # (NUM_ENTS, 8E)
    rel_lin = np.asarray(raw['init_rel']) @ lin_w[E:, :] + lin_b[None, :]

    def pad_hid_cols(a):              # (..., 256) -> (..., 512), 128-lane comps
        out = np.zeros(a.shape[:-1] + (HID_W,), np.float32)
        for q in range(4):
            out[..., q * PAD_COMP:q * PAD_COMP + COMP_HID] = \
                a[..., q * COMP_HID:(q + 1) * COMP_HID]
        return out

    table = np.zeros((PAD_ROWS, HID_W), np.float32)
    table[:NUM_ENTS] = pad_hid_cols(ent_lin)
    table[NUM_ENTS:NUM_ENTS + 2 * NUM_RELS] = pad_hid_cols(rel_lin)

    # (c) Hamilton conv weight + im2col -> dense (512, 512) matmul, columns in
    #     the padded per-component NCHW flatten order (comp*128 + f_loc*36 + pos).
    w_full = np.asarray(build_quaternion_conv_weight(
        raw['conv_r'], raw['conv_i'], raw['conv_j'], raw['conv_k']))  # (F, 4, K, K)
    conv_mat = np.zeros((HID_W, CONVO_W), np.float32)
    conv_b = np.zeros((1, CONVO_W), np.float32)
    oh = np.arange(FLAT_H)[:, None]
    ow = np.arange(FLAT_W)[None, :]
    out_pos = oh * FLAT_W + ow                                    # (Ho, Wo)
    raw_conv_b = np.asarray(raw['conv_b'])
    for f in range(NUM_FILT):
        q_out, f_loc = divmod(f, fpc)
        col = q_out * PAD_COMP + f_loc * HoWo + out_pos
        conv_b[0, col] = raw_conv_b[f]
        for c in range(4):
            for kh in range(KER_SZ):
                for kw in range(KER_SZ):
                    in_pos = (oh + kh) * W_IN + (ow + kw)
                    conv_mat[c * PAD_COMP + in_pos, col] += w_full[f, c, kh, kw]

    # (d) fold eval-mode BatchNorm into the fc layer; re-index fc rows to the
    #     padded conv layout; lane-pad fc output 32 -> 128.
    scale = np.asarray(raw['bn_scale'])
    shift = np.asarray(raw['bn_shift'])
    fc_w_bn = np.asarray(raw['fc_w']) * scale[None, :]            # (288, 32)
    fc_b_bn = np.asarray(raw['fc_b']) * scale + shift             # (32,)
    fc_w = np.zeros((CONVO_W, PAD_E), np.float32)
    for f in range(NUM_FILT):
        q_out, f_loc = divmod(f, fpc)
        src = f * HoWo + np.arange(HoWo)
        dst = q_out * PAD_COMP + f_loc * HoWo + np.arange(HoWo)
        fc_w[dst, :E] = fc_w_bn[src, :]
    fc_b = np.zeros((1, PAD_E), np.float32)
    fc_b[0, :E] = fc_b_bn

    # (e) lane-dense scoring: pre-transposed entity table padded 32x40 -> 128x128.
    ent_t_pad = np.zeros((PAD_E, PAD_ENTS), np.float32)
    ent_t_pad[:E, :NUM_ENTS] = np.asarray(raw['init_embed']).T
    ent_bias_pad = np.zeros((1, PAD_ENTS), np.float32)
    ent_bias_pad[0, :NUM_ENTS] = np.asarray(raw['ent_bias'])

    return {
        'table':        jnp.asarray(table, dtype=jnp.bfloat16),
        'conv_w':       jnp.asarray(conv_mat, dtype=jnp.bfloat16),
        'conv_b':       jnp.asarray(conv_b),
        'fc_w':         jnp.asarray(fc_w),
        'fc_b':         jnp.asarray(fc_b),
        'ent_t_pad':    jnp.asarray(ent_t_pad),
        'ent_bias_pad': jnp.asarray(ent_bias_pad),
    }


# ---------------------------------------------------------------------------
# Pure-JAX reference (mirrors the PyTorch module op-by-op) for self-checking
# ---------------------------------------------------------------------------
@jax.jit
def reference_forward(raw, sub, rel):
    hp = jax.lax.Precision.HIGHEST
    x_h = x_t = raw['init_embed']
    r_tab = raw['init_rel']
    sub_emb = x_h[sub]
    rel_emb = r_tab[rel]

    s_a, x_a, y_a, z_a = jnp.split(sub_emb, 4, axis=1)
    s_b, x_b, y_b, z_b = jnp.split(rel_emb, 4, axis=1)
    stack = jnp.concatenate([s_a, s_b, x_a, x_b, y_a, y_b, z_a, z_b], axis=1)
    stack = jnp.dot(stack, raw['lin_w'], precision=hp) + raw['lin_b']
    stack = stack.reshape(-1, 4, H_IN, W_IN)

    def qnorm(t):
        b, c, h, w = t.shape
        t4 = t.reshape(b, 4, (c // 4) * h * w)
        inv = jax.lax.rsqrt(jnp.sum(t4 * t4, axis=1, keepdims=True) + QNORM_EPS)
        return (t4 * inv).reshape(b, c, h, w)

    x = qnorm(stack)
    w_full = build_quaternion_conv_weight(raw['conv_r'], raw['conv_i'],
                                          raw['conv_j'], raw['conv_k'])
    x = jax.lax.conv_general_dilated(x, w_full, (1, 1), 'VALID',
                                     dimension_numbers=('NCHW', 'OIHW', 'NCHW'),
                                     precision=hp)
    x = x + raw['conv_b'][None, :, None, None]
    x = jnp.maximum(qnorm(x), 0.0)
    x = x.reshape(-1, FLAT_SZ)
    x = jnp.dot(x, raw['fc_w'], precision=hp) + raw['fc_b']
    x = x * raw['bn_scale'] + raw['bn_shift']
    x = jnp.maximum(x, 0.0)
    return jnp.dot(x, x_t.T, precision=hp) + raw['ent_bias'][None, :]


# ---------------------------------------------------------------------------
if __name__ == "__main__":
    key = jax.random.PRNGKey(0)
    pkey, skey, rkey = jax.random.split(key, 3)
    raw_params = init_params(pkey)
    prep = prepare_inference_params(raw_params)

    sub = jax.random.randint(skey, (BATCH,), 0, NUM_ENTS, dtype=jnp.int32)
    rel = jax.random.randint(rkey, (BATCH,), 0, NUM_RELS * 2, dtype=jnp.int32)

    out = convqe_forward(prep, sub, rel)
    out = jax.block_until_ready(out)
    assert out.shape == (BATCH, NUM_ENTS) and out.dtype == jnp.float32

    ref = jax.block_until_ready(reference_forward(raw_params, sub, rel))
    assert np.allclose(np.asarray(out), np.asarray(ref), rtol=2e-2, atol=2e-2)

    print("KERNEL_OK")
</pallas_src>

<mosaic_0001>
module attributes {stable_mosaic.version = 11 : i64} {
  func.func @_convqe_fused_kernel(%arg0: i32, %arg1: memref<128x1xi32, #tpu.memory_space<vmem>>, %arg2: memref<128x1xi32, #tpu.memory_space<vmem>>, %arg3: memref<128x512xbf16, #tpu.memory_space<vmem>>, %arg4: memref<512x512xbf16, #tpu.memory_space<vmem>>, %arg5: memref<1x512xf32, #tpu.memory_space<vmem>>, %arg6: memref<512x128xf32, #tpu.memory_space<vmem>>, %arg7: memref<1x128xf32, #tpu.memory_space<vmem>>, %arg8: memref<128x128xf32, #tpu.memory_space<vmem>>, %arg9: memref<1x128xf32, #tpu.memory_space<vmem>>, %arg10: memref<128x128xf32, #tpu.memory_space<vmem>>) attributes {dimension_semantics = [#tpu.dimension_semantics<parallel>], iteration_bounds = array<i64: 1>, scalar_prefetch = 0 : i64, scratch_operands = 0 : i64, tpu.core_type = #tpu.core_type<tc>, window_params = [{transform_indices = @transform_0, window_bounds = array<i64: 128, 1>}, {transform_indices = @transform_1, window_bounds = array<i64: 128, 1>}, {pipeline_mode = #tpu.pipeline_mode<synchronous>, transform_indices = @transform_2, window_bounds = array<i64: 128, 512>}, {pipeline_mode = #tpu.pipeline_mode<synchronous>, transform_indices = @transform_3, window_bounds = array<i64: 512, 512>}, {pipeline_mode = #tpu.pipeline_mode<synchronous>, transform_indices = @transform_4, window_bounds = array<i64: 1, 512>}, {pipeline_mode = #tpu.pipeline_mode<synchronous>, transform_indices = @transform_5, window_bounds = array<i64: 512, 128>}, {pipeline_mode = #tpu.pipeline_mode<synchronous>, transform_indices = @transform_6, window_bounds = array<i64: 1, 128>}, {pipeline_mode = #tpu.pipeline_mode<synchronous>, transform_indices = @transform_7, window_bounds = array<i64: 128, 128>}, {pipeline_mode = #tpu.pipeline_mode<synchronous>, transform_indices = @transform_8, window_bounds = array<i64: 1, 128>}, {transform_indices = @transform_9, window_bounds = array<i64: 128, 128>}]} {
    %0 = tpu.iota {dimensions = array<i32: 1>} : vector<128x128xi32>
    %c0 = arith.constant 0 : index
    %c0_0 = arith.constant 0 : index
    %1 = vector.load %arg1[%c0, %c0_0] : memref<128x1xi32, #tpu.memory_space<vmem>>, vector<128x1xi32>
    %2 = vector.broadcast %1 : vector<128x1xi32> to vector<128x128xi32>
    %3 = arith.cmpi eq, %0, %2 : vector<128x128xi32>
    %c0_1 = arith.constant 0 : index
    %c0_2 = arith.constant 0 : index
    %4 = vector.load %arg2[%c0_1, %c0_2] : memref<128x1xi32, #tpu.memory_space<vmem>>, vector<128x1xi32>
    %c40_i32 = arith.constant 40 : i32
    %5 = vector.broadcast %c40_i32 : i32 to vector<128x1xi32>
    %6 = arith.addi %4, %5 : vector<128x1xi32>
    %7 = vector.broadcast %6 : vector<128x1xi32> to vector<128x128xi32>
    %8 = arith.cmpi eq, %0, %7 : vector<128x128xi32>
    %9 = arith.ori %3, %8 : vector<128x128xi1>
    %cst = arith.constant 1.000000e+00 : f32
    %cst_3 = arith.constant 0.000000e+00 : f32
    %10 = vector.broadcast %cst : f32 to vector<128x128xf32>
    %11 = vector.broadcast %cst_3 : f32 to vector<128x128xf32>
    %12 = arith.select %9, %10, %11 : vector<128x128xi1>, vector<128x128xf32>
    %13 = arith.truncf %12 : vector<128x128xf32> to vector<128x128xbf16>
    %c0_4 = arith.constant 0 : index
    %c0_5 = arith.constant 0 : index
    %14 = vector.load %arg3[%c0_4, %c0_5] : memref<128x512xbf16, #tpu.memory_space<vmem>>, vector<128x512xbf16>
    %cst_6 = arith.constant dense<0.000000e+00> : vector<128x512xf32>
    %15 = tpu.matmul %13, %14, %cst_6 {dimension_numbers = #tpu.dot_dimension_numbers<[1], [0], [0], [1], [0, 0, 1, 1], [], []>} : vector<128x128xbf16>, vector<128x512xbf16>, vector<128x512xf32> -> vector<128x512xf32>
    %16 = vector.extract_strided_slice %15 {offsets = [0, 0], sizes = [128, 128], strides = [1, 1]} : vector<128x512xf32> to vector<128x128xf32>
    %17 = vector.extract_strided_slice %15 {offsets = [0, 128], sizes = [128, 128], strides = [1, 1]} : vector<128x512xf32> to vector<128x128xf32>
    %18 = vector.extract_strided_slice %15 {offsets = [0, 256], sizes = [128, 128], strides = [1, 1]} : vector<128x512xf32> to vector<128x128xf32>
    %19 = vector.extract_strided_slice %15 {offsets = [0, 384], sizes = [128, 128], strides = [1, 1]} : vector<128x512xf32> to vector<128x128xf32>
    %20 = arith.mulf %16, %16 : vector<128x128xf32>
    %21 = arith.mulf %17, %17 : vector<128x128xf32>
    %22 = arith.addf %20, %21 : vector<128x128xf32>
    %23 = arith.mulf %18, %18 : vector<128x128xf32>
    %24 = arith.addf %22, %23 : vector<128x128xf32>
    %25 = arith.mulf %19, %19 : vector<128x128xf32>
    %26 = arith.addf %24, %25 : vector<128x128xf32>
    %cst_7 = arith.constant 9.99999974E-5 : f32
    %27 = vector.broadcast %cst_7 : f32 to vector<128x128xf32>
    %28 = arith.addf %26, %27 : vector<128x128xf32>
    %29 = math.rsqrt %28 : vector<128x128xf32>
    %30 = arith.mulf %16, %29 : vector<128x128xf32>
    %31 = arith.mulf %17, %29 : vector<128x128xf32>
    %32 = arith.mulf %18, %29 : vector<128x128xf32>
    %33 = arith.mulf %19, %29 : vector<128x128xf32>
    %34 = tpu.concatenate %30, %31, %32, %33 in 1 : vector<128x128xf32>, vector<128x128xf32>, vector<128x128xf32>, vector<128x128xf32> -> vector<128x512xf32>
    %35 = arith.truncf %34 : vector<128x512xf32> to vector<128x512xbf16>
    %c0_8 = arith.constant 0 : index
    %c0_9 = arith.constant 0 : index
    %36 = vector.load %arg4[%c0_8, %c0_9] : memref<512x512xbf16, #tpu.memory_space<vmem>>, vector<512x512xbf16>
    %cst_10 = arith.constant dense<0.000000e+00> : vector<128x512xf32>
    %37 = tpu.matmul %35, %36, %cst_10 {dimension_numbers = #tpu.dot_dimension_numbers<[1], [0], [0], [1], [0, 0, 1, 1], [], []>} : vector<128x512xbf16>, vector<512x512xbf16>, vector<128x512xf32> -> vector<128x512xf32>
    %c0_11 = arith.constant 0 : index
    %c0_12 = arith.constant 0 : index
    %38 = vector.load %arg5[%c0_11, %c0_12] : memref<1x512xf32, #tpu.memory_space<vmem>>, vector<1x512xf32>
    %39 = vector.broadcast %38 : vector<1x512xf32> to vector<128x512xf32>
    %40 = arith.addf %37, %39 : vector<128x512xf32>
    %41 = vector.extract_strided_slice %40 {offsets = [0, 0], sizes = [128, 128], strides = [1, 1]} : vector<128x512xf32> to vector<128x128xf32>
    %42 = vector.extract_strided_slice %40 {offsets = [0, 128], sizes = [128, 128], strides = [1, 1]} : vector<128x512xf32> to vector<128x128xf32>
    %43 = vector.extract_strided_slice %40 {offsets = [0, 256], sizes = [128, 128], strides = [1, 1]} : vector<128x512xf32> to vector<128x128xf32>
    %44 = vector.extract_strided_slice %40 {offsets = [0, 384], sizes = [128, 128], strides = [1, 1]} : vector<128x512xf32> to vector<128x128xf32>
    %45 = arith.mulf %41, %41 : vector<128x128xf32>
    %46 = arith.mulf %42, %42 : vector<128x128xf32>
    %47 = arith.addf %45, %46 : vector<128x128xf32>
    %48 = arith.mulf %43, %43 : vector<128x128xf32>
    %49 = arith.addf %47, %48 : vector<128x128xf32>
    %50 = arith.mulf %44, %44 : vector<128x128xf32>
    %51 = arith.addf %49, %50 : vector<128x128xf32>
    %cst_13 = arith.constant 9.99999974E-5 : f32
    %52 = vector.broadcast %cst_13 : f32 to vector<128x128xf32>
    %53 = arith.addf %51, %52 : vector<128x128xf32>
    %54 = math.rsqrt %53 : vector<128x128xf32>
    %55 = arith.mulf %41, %54 : vector<128x128xf32>
    %56 = arith.mulf %42, %54 : vector<128x128xf32>
    %57 = arith.mulf %43, %54 : vector<128x128xf32>
    %58 = arith.mulf %44, %54 : vector<128x128xf32>
    %59 = tpu.concatenate %55, %56, %57, %58 in 1 : vector<128x128xf32>, vector<128x128xf32>, vector<128x128xf32>, vector<128x128xf32> -> vector<128x512xf32>
    %cst_14 = arith.constant 0.000000e+00 : f32
    %60 = vector.broadcast %cst_14 : f32 to vector<128x512xf32>
    %61 = arith.maximumf %59, %60 : vector<128x512xf32>
    %c0_15 = arith.constant 0 : index
    %c0_16 = arith.constant 0 : index
    %62 = vector.load %arg6[%c0_15, %c0_16] : memref<512x128xf32, #tpu.memory_space<vmem>>, vector<512x128xf32>
    %cst_17 = arith.constant dense<0.000000e+00> : vector<128x128xf32>
    %63 = tpu.matmul %61, %62, %cst_17 {dimension_numbers = #tpu.dot_dimension_numbers<[1], [0], [0], [1], [0, 0, 1, 1], [], []>} : vector<128x512xf32>, vector<512x128xf32>, vector<128x128xf32> -> vector<128x128xf32>
    %c0_18 = arith.constant 0 : index
    %c0_19 = arith.constant 0 : index
    %64 = vector.load %arg7[%c0_18, %c0_19] : memref<1x128xf32, #tpu.memory_space<vmem>>, vector<1x128xf32>
    %65 = vector.broadcast %64 : vector<1x128xf32> to vector<128x128xf32>
    %66 = arith.addf %63, %65 : vector<128x128xf32>
    %cst_20 = arith.constant 0.000000e+00 : f32
    %67 = vector.broadcast %cst_20 : f32 to vector<128x128xf32>
    %68 = arith.maximumf %66, %67 : vector<128x128xf32>
    %c0_21 = arith.constant 0 : index
    %c0_22 = arith.constant 0 : index
    %69 = vector.load %arg8[%c0_21, %c0_22] : memref<128x128xf32, #tpu.memory_space<vmem>>, vector<128x128xf32>
    %cst_23 = arith.constant dense<0.000000e+00> : vector<128x128xf32>
    %70 = tpu.matmul %68, %69, %cst_23 {dimension_numbers = #tpu.dot_dimension_numbers<[1], [0], [0], [1], [0, 0, 1, 1], [], []>} : vector<128x128xf32>, vector<128x128xf32>, vector<128x128xf32> -> vector<128x128xf32>
    %c0_24 = arith.constant 0 : index
    %c0_25 = arith.constant 0 : index
    %71 = vector.load %arg9[%c0_24, %c0_25] : memref<1x128xf32, #tpu.memory_space<vmem>>, vector<1x128xf32>
    %72 = vector.broadcast %71 : vector<1x128xf32> to vector<128x128xf32>
    %73 = arith.addf %70, %72 : vector<128x128xf32>
    %c0_26 = arith.constant 0 : index
    %c0_27 = arith.constant 0 : index
    %74 = vector.load %arg10[%c0_26, %c0_27] : memref<128x128xf32, #tpu.memory_space<vmem>>, vector<128x128xf32>
    tpu.vector_store %arg10[%c0_26, %c0_27], %73 {strides = array<i32>} : memref<128x128xf32, #tpu.memory_space<vmem>>, vector<128x128xf32>,
    return
  }
  func.func @transform_0(%arg0: i32) -> (i32, i32) {
    %c0_i32 = arith.constant 0 : i32
    %c0_i32_0 = arith.constant 0 : i32
    return %arg0, %c0_i32 : i32, i32
  }
  func.func @transform_1(%arg0: i32) -> (i32, i32) {
    %c0_i32 = arith.constant 0 : i32
    %c0_i32_0 = arith.constant 0 : i32
    return %arg0, %c0_i32 : i32, i32
  }
  func.func @transform_2(%arg0: i32) -> (i32, i32) {
    %c0_i32 = arith.constant 0 : i32
    %c0_i32_0 = arith.constant 0 : i32
    %c0_i32_1 = arith.constant 0 : i32
    return %c0_i32, %c0_i32_0 : i32, i32
  }
  func.func @transform_3(%arg0: i32) -> (i32, i32) {
    %c0_i32 = arith.constant 0 : i32
    %c0_i32_0 = arith.constant 0 : i32
    %c0_i32_1 = arith.constant 0 : i32
    return %c0_i32, %c0_i32_0 : i32, i32
  }
  func.func @transform_4(%arg0: i32) -> (i32, i32) {
    %c0_i32 = arith.constant 0 : i32
    %c0_i32_0 = arith.constant 0 : i32
    %c0_i32_1 = arith.constant 0 : i32
    return %c0_i32, %c0_i32_0 : i32, i32
  }
  func.func @transform_5(%arg0: i32) -> (i32, i32) {
    %c0_i32 = arith.constant 0 : i32
    %c0_i32_0 = arith.constant 0 : i32
    %c0_i32_1 = arith.constant 0 : i32
    return %c0_i32, %c0_i32_0 : i32, i32
  }
  func.func @transform_6(%arg0: i32) -> (i32, i32) {
    %c0_i32 = arith.constant 0 : i32
    %c0_i32_0 = arith.constant 0 : i32
    %c0_i32_1 = arith.constant 0 : i32
    return %c0_i32, %c0_i32_0 : i32, i32
  }
  func.func @transform_7(%arg0: i32) -> (i32, i32) {
    %c0_i32 = arith.constant 0 : i32
    %c0_i32_0 = arith.constant 0 : i32
    %c0_i32_1 = arith.constant 0 : i32
    return %c0_i32, %c0_i32_0 : i32, i32
  }
  func.func @transform_8(%arg0: i32) -> (i32, i32) {
    %c0_i32 = arith.constant 0 : i32
    %c0_i32_0 = arith.constant 0 : i32
    %c0_i32_1 = arith.constant 0 : i32
    return %c0_i32, %c0_i32_0 : i32, i32
  }
  func.func @transform_9(%arg0: i32) -> (i32, i32) {
    %c0_i32 = arith.constant 0 : i32
    %c0_i32_0 = arith.constant 0 : i32
    return %arg0, %c0_i32 : i32, i32
  }
}

</mosaic_0001>

<bundles_post_ra>
// kernel: convqe_forward.1
= control target key start
LH: loop header
LB: loop body
LE: loop exit
PB: predicated region body
PF: predicated region fallthrough
CT: control target
= control target key end

     0   :  { %14 = vsyncpa [#allocation3], 0  ;;  %s5324_s0 = inlined_call_operand.vmem [shape: s32[128,1], index: 0, kind: input, shape index: {}]   ;;  %s5325_s1 = inlined_call_operand.vmem [shape: s32[128,1], index: 1, kind: input, shape index: {}]   ;;  %s5326_s2 = inlined_call_operand.vmem [shape: bf16[128,512], index: 2, kind: input, shape index: {}]   ;;  %s5327_s3 = inlined_call_operand.hbm [shape: bf16[512,512], index: 3, kind: input, shape index: {}]   ;;  %s5328_s4 = inlined_call_operand.vmem [shape: f32[1,512], index: 4, kind: input, shape index: {}]   ;;  %s5329_s5 = inlined_call_operand.hbm [shape: f32[512,128], index: 5, kind: input, shape index: {}]   ;;  %s5330_s6 = inlined_call_operand.vmem [shape: f32[1,128], index: 6, kind: input, shape index: {}]   ;;  %s5331_s7 = inlined_call_operand.hbm [shape: f32[128,128], index: 7, kind: input, shape index: {}]   ;;  %s5332_s8 = inlined_call_operand.vmem [shape: f32[1,128], index: 8, kind: input, shape index: {}]   ;;  %s5333_s9 = inlined_call_operand.vmem [shape: f32[128,128], index: 9, kind: output, shape index: {}]  }
   0x1   :  { %15 = vsyncpa [#allocation5], 0  ;;  %s3884_s30 = smov [#allocation4]  }
   0x2   :  { %s41_s10 = sshll.u32 %s3884_s30, 4  ;;  %s42_s10 = int_to_ptr.vmem [resolvable:$true] %s41_s10 }
   0x3   :  { %s3828_s11 = scalar_lea.vmem %s42_s10, 8192  ;;  %p3833_p1 = scmp.lt.s32.totalorder %s42_s10, %s42_s10 }
   0x4   :  { %p3829_p0 = scmp.ne.s32.totalorder %s42_s10, %s3828_s11  ;;  %p3834_p2 = scmp.lt.s32.totalorder %s3828_s11, %s3828_s11 }
   0x6   :  { %p3835_p3 = por %p3834_p2, %p3833_p1 }
   0x8   :  { %p3836_p4 = pnand %p3835_p3, %p3829_p0 }
   0xa   :  { %3839 = shalt.err (!%p3836_p4)
}
   0xb   :  { %s3885_s12 = smov 128   ;;  %s3886_s13 = smov 8  }
   0xc   :  { %47 = dma.hbm_to_vmem [thread:$0]  %s5329_s5, 8192, %s42_s10, [#allocation5], %s3885_s12, %s3885_s12, %s3886_s13  }
   0xd   :  { %s3887_s16 = smov [#allocation2]  }
   0xe   :  { %s27_s17 = sshll.u32 %s3887_s16, 4  ;;  %s28_s17 = int_to_ptr.vmem [resolvable:$true] %s27_s17 }
   0xf   :  { %s3848_s18 = scalar_lea.vmem %s28_s17, 16384  ;;  %p3853_p6 = scmp.lt.s32.totalorder %s28_s17, %s28_s17 }
  0x10   :  { %p3849_p5 = scmp.ne.s32.totalorder %s28_s17, %s3848_s18  ;;  %p3854_p7 = scmp.lt.s32.totalorder %s3848_s18, %s3848_s18 }
  0x12   :  { %p3855_p8 = por %p3854_p7, %p3853_p6 }
  0x14   :  { %p3856_p9 = pnand %p3855_p8, %p3849_p5 }
  0x16   :  { %3859 = shalt.err (!%p3856_p9)
}
  0x17   :  { %s3888_s19 = smov 256   ;;  %s3889_s20 = smov 16  }
  0x18   :  { %33 = dma.hbm_to_vmem [thread:$0]  %s5327_s3, 16384, %s28_s17, [#allocation3], %s3888_s19, %s3888_s19, %s3889_s20  }
  0x19   :  { %s3890_s23 = smov [#allocation6]  }
  0x1a   :  { %s55_s24 = sshll.u32 %s3890_s23, 4  ;;  %s56_s24 = int_to_ptr.vmem [resolvable:$true] %s55_s24 }
  0x1b   :  { %s3868_s5 = scalar_lea.vmem %s56_s24, 2048  ;;  %p3873_p11 = scmp.lt.s32.totalorder %s56_s24, %s56_s24 }
  0x1c   :  { %p3869_p10 = scmp.ne.s32.totalorder %s56_s24, %s3868_s5  ;;  %p3874_p12 = scmp.lt.s32.totalorder %s3868_s5, %s3868_s5 }
  0x1e   :  { %p3875_p13 = por %p3874_p12, %p3873_p11 }
  0x20   :  { %p3876_p0 = pnand %p3875_p13, %p3869_p10 }
  0x22   :  { %3879 = shalt.err (!%p3876_p0)
}
  0x23   :  { %61 = dma.hbm_to_vmem [thread:$0]  %s5331_s7, 2048, %s56_s24, [#allocation5], %s3885_s12, %s3885_s12, %s3886_s13  }
  0x24   :  { %3880 = dma.done.wait [#allocation3], 16384  }
  0x25   :  { %3881 = vsyncadd [#allocation3], 4294950912 }
  0x26   :  { %3882 = dma.done.wait [#allocation5], 10240  }
  0x27   :  { %3883 = vsyncadd [#allocation5], 4294957056  ;;  %v3891_v0 = vmov 0   ;;  %v76_v1 = vld [vmem:[%s5324_s0] sm:$0xff]  ;;  %v157_v4 = vld [vmem:[%s5325_s1 + $0x8] sm:$0xff] }
  0x28   :  { %3514 = vset.pattern.permute.xlu0 %v3891_v0  ;;  %3515 = vset.pattern.permute.xlu1 %v3891_v0  ;;  %v156_v2 = vld [vmem:[%s5325_s1] sm:$0xff]  ;;  %v77_v5 = vld [vmem:[%s5324_s0 + $0x8] sm:$0xff]  ;;  %v173_v6 = vadd.s32 40, %v157_v4  ;;  %v78_v7 = vld [vmem:[%s5324_s0 + $0x10] sm:$0xff] }
  0x29   :  { %516 = vmatprep.mubr.bf16.mxu0 %v3891_v0  ;;  %629 = vmatprep.mubr.bf16.mxu1 %v3891_v0  ;;  %v172_v3 = vadd.s32 40, %v156_v2  ;;  %v158_v8 = vld [vmem:[%s5325_s1 + $0x10] sm:$0xff]  ;;  %v79_v9 = vld [vmem:[%s5324_s0 + $0x18] sm:$0xff]  ;;  %v80_v14 = vld [vmem:[%s5324_s0 + $0x20] sm:$0xff] }
  0x2a   :  { %93 = vperm.xlu0 %3514, %v76_v1   ;;  %v159_v10 = vld [vmem:[%s5325_s1 + $0x18] sm:$0xff]  ;;  %v174_v11 = vadd.s32 40, %v158_v8  ;;  %v3516_v13 = vld [vmem:[%s5326_s2 + $0xe4] ss:$16 sps:$4 sm:$0xff]   ;;  %v3520_v17 = vld [vmem:[%s5326_s2 + $0xe0] ss:$16 sps:$4 sm:$0xff]  }
  0x2b   :  { %189 = vperm.xlu1 %3515, %v172_v3   ;;  %v175_v12 = vadd.s32 40, %v159_v10  ;;  %v160_v15 = vld [vmem:[%s5325_s1 + $0x20] sm:$0xff]  ;;  %v3518_v16 = vld [vmem:[%s5326_s2 + $0xec] ss:$16 sps:$4 sm:$0xff]   ;;  %484 = vmatprep.subr.bf16.mxu0 %v3516_v13  ;;  %v3521_v18 = vld [vmem:[%s5326_s2 + $0xe8] ss:$16 sps:$4 sm:$0xff]  }
  0x2c   :  { %v81_v19 = vld [vmem:[%s5324_s0 + $0x28] sm:$0xff]  ;;  %597 = vmatprep.subr.bf16.mxu1 %v3518_v16  ;;  %485 = vmatpush1.bf16.msra.mxu0 %v3520_v17  ;;  %v3522_v21 = vld [vmem:[%s5326_s2 + $0xc4] ss:$16 sps:$4 sm:$0xff]   ;;  %v3526_v23 = vld [vmem:[%s5326_s2 + $0xc0] ss:$16 sps:$4 sm:$0xff]   ;;  %v176_v26 = vadd.s32 40, %v160_v15 }
  0x2d   :  { %v161_v20 = vld [vmem:[%s5325_s1 + $0x28] sm:$0xff]  ;;  %598 = vmatpush1.bf16.msra.mxu1 %v3521_v18  ;;  %486 = vmatprep.subr.bf16.mxu0 %v3522_v21  ;;  %v3528_v25 = vld [vmem:[%s5326_s2 + $0xa4] ss:$16 sps:$4 sm:$0xff]   ;;  %v3532_v28 = vld [vmem:[%s5326_s2 + $0xa0] ss:$16 sps:$4 sm:$0xff]  }
  0x2e   :  { %96 = vperm.xlu0 %3514, %v77_v5   ;;  %v3524_v22 = vld [vmem:[%s5326_s2 + $0xcc] ss:$16 sps:$4 sm:$0xff]   ;;  %v3527_v24 = vld [vmem:[%s5326_s2 + $0xc8] ss:$16 sps:$4 sm:$0xff]   ;;  %v177_v29 = vadd.s32 40, %v161_v20  ;;  %v82_v31 = vld [vmem:[%s5324_s0 + $0x30] sm:$0xff]  ;;  %v5334_v20 = vlaneseq }
  0x2f   :  { %192 = vperm.xlu1 %3515, %v173_v6   ;;  %599 = vmatprep.subr.bf16.mxu1 %v3524_v22  ;;  %v3530_v27 = vld [vmem:[%s5326_s2 + $0xac] ss:$16 sps:$4 sm:$0xff]   ;;  %v3533_v30 = vld [vmem:[%s5326_s2 + $0xa8] ss:$16 sps:$4 sm:$0xff]   ;;  %v3534_v32 = vld [vmem:[%s5326_s2 + $0x84] ss:$16 sps:$4 sm:$0xff]  }
  0x30   :  { %487 = vmatpush1.bf16.msra.mxu0 %v3526_v23  ;;  %v3536_v33 = vld [vmem:[%s5326_s2 + $0x8c] ss:$16 sps:$4 sm:$0xff]   ;;  %v162_v34 = vld [vmem:[%s5325_s1 + $0x30] sm:$0xff]  ;;  %v3539_v38 = vld [vmem:[%s5326_s2 + $0x88] ss:$16 sps:$4 sm:$0xff]   ;;  %v4149_v21 = vand.u32 127, %v5334_v20 }
  0x31   :  { %600 = vmatpush1.bf16.msra.mxu1 %v3527_v24  ;;  %488 = vmatprep.subr.bf16.mxu0 %v3528_v25  ;;  %v83_v35 = vld [vmem:[%s5324_s0 + $0x38] sm:$0xff]  ;;  %v3538_v36 = vld [vmem:[%s5326_s2 + $0x80] ss:$16 sps:$4 sm:$0xff]   ;;  %v3540_v39 = vld [vmem:[%s5326_s2 + $0x64] ss:$16 sps:$4 sm:$0xff]   ;;  %v178_v41 = vadd.s32 40, %v162_v34 }
  0x32   :  { %99 = vperm.xlu0 %3514, %v78_v7   ;;  %601 = vmatprep.subr.bf16.mxu1 %v3530_v27  ;;  %v163_v37 = vld [vmem:[%s5325_s1 + $0x38] sm:$0xff]  ;;  %v3544_v42 = vld [vmem:[%s5326_s2 + $0x60] ss:$16 sps:$4 sm:$0xff]   ;;  %v3546_v46 = vld [vmem:[%s5326_s2 + $0x44] ss:$16 sps:$4 sm:$0xff]  }
  0x33   :  { %102 = vperm.xlu1 %3515, %v79_v9   ;;  %v3542_v40 = vld [vmem:[%s5326_s2 + $0x6c] ss:$16 sps:$4 sm:$0xff]   ;;  %v179_v43 = vadd.s32 40, %v163_v37  ;;  %v3545_v44 = vld [vmem:[%s5326_s2 + $0x68] ss:$16 sps:$4 sm:$0xff]   ;;  %v84_v45 = vld [vmem:[%s5324_s0 + $0x40] sm:$0xff] }
  0x34   :  { %489 = vmatpush1.bf16.msra.mxu0 %v3532_v28  ;;  %v3548_v47 = vld [vmem:[%s5326_s2 + $0x4c] ss:$16 sps:$4 sm:$0xff]   ;;  %v164_v48 = vld [vmem:[%s5325_s1 + $0x40] sm:$0xff]  ;;  %v3551_v52 = vld [vmem:[%s5326_s2 + $0x48] ss:$16 sps:$4 sm:$0xff]  }
  0x35   :  { %602 = vmatpush1.bf16.msra.mxu1 %v3533_v30  ;;  %490 = vmatprep.subr.bf16.mxu0 %v3534_v32  ;;  %v85_v49 = vld [vmem:[%s5324_s0 + $0x48] sm:$0xff]  ;;  %v3550_v51 = vld [vmem:[%s5326_s2 + $0x40] ss:$16 sps:$4 sm:$0xff]   ;;  %v3552_v53 = vld [vmem:[%s5326_s2 + $0x24] ss:$16 sps:$4 sm:$0xff]   ;;  %v180_v56 = vadd.s32 40, %v164_v48 }
  0x36   :  { %195 = vperm.xlu0 %3514, %v174_v11   ;;  %603 = vmatprep.subr.bf16.mxu1 %v3536_v33  ;;  %v165_v50 = vld [vmem:[%s5325_s1 + $0x48] sm:$0xff]  ;;  %v3556_v55 = vld [vmem:[%s5326_s2 + $0x20] ss:$16 sps:$4 sm:$0xff]   ;;  %v3558_v58 = vld [vmem:[%s5326_s2 + $0x4] ss:$16 sps:$4 sm:$0xff]  }
  0x37   :  { %198 = vperm.xlu1 %3515, %v175_v12   ;;  %v3554_v54 = vld [vmem:[%s5326_s2 + $0x2c] ss:$16 sps:$4 sm:$0xff]   ;;  %v3557_v57 = vld [vmem:[%s5326_s2 + $0x28] ss:$16 sps:$4 sm:$0xff]   ;;  %v181_v60 = vadd.s32 40, %v165_v50  ;;  %v86_v61 = vld [vmem:[%s5324_s0 + $0x50] sm:$0xff] }
  0x38   :  { %491 = vmatpush1.bf16.msra.mxu0 %v3538_v36  ;;  %v3560_v59 = vld [vmem:[%s5326_s2 + $0xc] ss:$16 sps:$4 sm:$0xff]   ;;  %v166_v62 = vld [vmem:[%s5325_s1 + $0x50] sm:$0xff]  ;;  %v3563_v1 = vld [vmem:[%s5326_s2 + $0x8] ss:$16 sps:$4 sm:$0xff]  }
  0x39   :  { %604 = vmatpush1.bf16.msra.mxu1 %v3539_v38  ;;  %492 = vmatprep.subr.bf16.mxu0 %v3540_v39  ;;  %v3562_v63 = vld [vmem:[%s5326_s2] ss:$16 sps:$4 sm:$0xff]   ;;  %v87_v2 = vld [vmem:[%s5324_s0 + $0x58] sm:$0xff]  ;;  %v182_v4 = vadd.s32 40, %v166_v62  ;;  %v89_v8 = vld [vmem:[%s5324_s0 + $0x68] sm:$0xff] }
  0x3a   :  { %105 = vperm.xlu0 %3514, %v80_v14   ;;  %605 = vmatprep.subr.bf16.mxu1 %v3542_v40  ;;  %v167_v3 = vld [vmem:[%s5325_s1 + $0x58] sm:$0xff]  ;;  %v88_v6 = vld [vmem:[%s5324_s0 + $0x60] sm:$0xff]  ;;  %v169_v9 = vld [vmem:[%s5325_s1 + $0x68] sm:$0xff]  ;;  %v3892_v32 = vmov 1.0|1.0  }
  0x3b   :  { %108 = vperm.xlu1 %3515, %v81_v19   ;;  %v183_v5 = vadd.s32 40, %v167_v3  ;;  %v168_v7 = vld [vmem:[%s5325_s1 + $0x60] sm:$0xff]  ;;  %v185_v11 = vadd.s32 40, %v169_v9  ;;  %v90_v12 = vld [vmem:[%s5324_s0 + $0x70] sm:$0xff]  ;;  %v91_v14 = vld [vmem:[%s5324_s0 + $0x78] sm:$0xff] }
  0x3c   :  { %493 = vmatpush1.bf16.msra.mxu0 %v3544_v42  ;;  %v184_v10 = vadd.s32 40, %v168_v7  ;;  %v170_v13 = vld [vmem:[%s5325_s1 + $0x70] sm:$0xff]  ;;  %v171_v15 = vld [vmem:[%s5325_s1 + $0x78] sm:$0xff] }
  0x3d   :  { %606 = vmatpush1.bf16.msra.mxu1 %v3545_v44  ;;  %494 = vmatprep.subr.bf16.mxu0 %v3546_v46  ;;  %v186_v16 = vadd.s32 40, %v170_v13  ;;  %v187_v17 = vadd.s32 40, %v171_v15  ;;  %v3566_v18 = vld [vmem:[#allocation2 + $0xe4] ss:$16 sps:$4 sm:$0xff]   ;;  %v3564_v27 = vld [vmem:[#allocation2 + $0xe0] ss:$16 sps:$4 sm:$0xff]  }
  0x3e   :  { %201 = vperm.xlu0 %3514, %v176_v26   ;;  %607 = vmatprep.subr.bf16.mxu1 %v3548_v47  ;;  %v3569_v19 = vld [vmem:[#allocation2 + $0x2e4] ss:$16 sps:$4 sm:$0xff]   ;;  %v3567_v28 = vld [vmem:[#allocation2 + $0x2e0] ss:$16 sps:$4 sm:$0xff]  }
  0x3f   :  { %204 = vperm.xlu1 %3515, %v177_v29   ;;  %v3572_v29 = vld [vmem:[#allocation2 + $0xc4] ss:$16 sps:$4 sm:$0xff]   ;;  %v3570_v34 = vld [vmem:[#allocation2 + $0xc0] ss:$16 sps:$4 sm:$0xff]  }
  0x40   :  { %495 = vmatpush1.bf16.msra.mxu0 %v3550_v51  ;;  %v3575_v30 = vld [vmem:[#allocation2 + $0x2c4] ss:$16 sps:$4 sm:$0xff]   ;;  %v3579_v42 = vld [vmem:[#allocation2 + $0x2a0] ss:$16 sps:$4 sm:$0xff]  }
  0x41   :  { %608 = vmatpush1.bf16.msra.mxu1 %v3551_v52  ;;  %496 = vmatprep.subr.bf16.mxu0 %v3552_v53  ;;  %v3578_v36 = vld [vmem:[#allocation2 + $0xa4] ss:$16 sps:$4 sm:$0xff]   ;;  %v3582_v47 = vld [vmem:[#allocation2 + $0x80] ss:$16 sps:$4 sm:$0xff]  }
  0x42   :  { %111 = vperm.xlu0 %3514, %v82_v31   ;;  %609 = vmatprep.subr.bf16.mxu1 %v3554_v54  ;;  %v3581_v37 = vld [vmem:[#allocation2 + $0x2a4] ss:$16 sps:$4 sm:$0xff]   ;;  %v3585_v48 = vld [vmem:[#allocation2 + $0x280] ss:$16 sps:$4 sm:$0xff]  }
  0x43   :  { %114 = vperm.xlu1 %3515, %v83_v35   ;;  %v3573_v35 = vld [vmem:[#allocation2 + $0x2c0] ss:$16 sps:$4 sm:$0xff]   ;;  %v3587_v44 = vld [vmem:[#allocation2 + $0x284] ss:$16 sps:$4 sm:$0xff]  }
  0x44   :  { %497 = vmatpush1.bf16.msra.mxu0 %v3556_v55  ;;  %v3593_v50 = vld [vmem:[#allocation2 + $0x264] ss:$16 sps:$4 sm:$0xff]   ;;  %v3588_v54 = vld [vmem:[#allocation2 + $0x60] ss:$16 sps:$4 sm:$0xff]  }
  0x45   :  { %610 = vmatpush1.bf16.msra.mxu1 %v3557_v57  ;;  %498 = vmatprep.subr.bf16.mxu0 %v3558_v58  ;;  %v3591_v55 = vld [vmem:[#allocation2 + $0x260] ss:$16 sps:$4 sm:$0xff]   ;;  %v3599_v57 = vld [vmem:[#allocation2 + $0x244] ss:$16 sps:$4 sm:$0xff]  }
  0x46   :  { %207 = vperm.xlu0 %3514, %v178_v41   ;;  %611 = vmatprep.subr.bf16.mxu1 %v3560_v59  ;;  %v3576_v41 = vld [vmem:[#allocation2 + $0xa0] ss:$16 sps:$4 sm:$0xff]   ;;  %v3602_v62 = vld [vmem:[#allocation2 + $0x24] ss:$16 sps:$4 sm:$0xff]  }
  0x47   :  { %210 = vperm.xlu1 %3515, %v179_v43   ;;  %v3584_v43 = vld [vmem:[#allocation2 + $0x84] ss:$16 sps:$4 sm:$0xff]   ;;  %v3600_v3 = vld [vmem:[#allocation2 + $0x20] ss:$16 sps:$4 sm:$0xff]  }
  0x48   :  { %499 = vmatpush1.bf16.msra.mxu0 %v3562_v63  ;;  %v3605_v63 = vld [vmem:[#allocation2 + $0x224] ss:$16 sps:$4 sm:$0xff]   ;;  %v3633_v39 = vld [vmem:[#allocation2 + $0x380] ss:$16 sps:$4 sm:$0xff]  }
  0x49   :  { %612 = vmatpush1.bf16.msra.mxu1 %v3563_v1  ;;  %1740 = vmatprep.subr.bf16.mxu0 %v3566_v18  ;;  %v3656_v52 = vld [vmem:[#allocation2 + $0x104] ss:$16 sps:$4 sm:$0xff]  }
  0x4a   :  { %117 = vperm.xlu0 %3514, %v84_v45   ;;  %1853 = vmatprep.subr.bf16.mxu1 %v3569_v19 }
  0x4b   :  { %120 = vperm.xlu1 %3515, %v85_v49   ;;  %v3590_v49 = vld [vmem:[#allocation2 + $0x64] ss:$16 sps:$4 sm:$0xff]  }
  0x4e   :  { %213 = vperm.xlu0 %3514, %v180_v56   ;;  %v3596_v56 = vld [vmem:[#allocation2 + $0x44] ss:$16 sps:$4 sm:$0xff]  }
  0x4f   :  { %216 = vperm.xlu1 %3515, %v181_v60   ;;  %v3594_v60 = vld [vmem:[#allocation2 + $0x40] ss:$16 sps:$4 sm:$0xff]  }
  0x52   :  { %123 = vperm.xlu0 %3514, %v86_v61   ;;  %v3597_v61 = vld [vmem:[#allocation2 + $0x240] ss:$16 sps:$4 sm:$0xff]  }
  0x53   :  { %126 = vperm.xlu1 %3515, %v87_v2  }
  0x56   :  { %219 = vperm.xlu0 %3514, %v182_v4   ;;  %v3603_v4 = vld [vmem:[#allocation2 + $0x220] ss:$16 sps:$4 sm:$0xff]  }
  0x57   :  { %222 = vperm.xlu1 %3515, %v183_v5   ;;  %v3608_v5 = vld [vmem:[#allocation2 + $0x4] ss:$16 sps:$4 sm:$0xff]  }
  0x5a   :  { %129 = vperm.xlu0 %3514, %v88_v6  }
  0x5b   :  { %132 = vperm.xlu1 %3515, %v89_v8   ;;  %v3606_v8 = vld [vmem:[#allocation2] ss:$16 sps:$4 sm:$0xff]  }
  0x5e   :  { %225 = vperm.xlu0 %3514, %v184_v10  }
  0x5f   :  { %228 = vperm.xlu1 %3515, %v185_v11  }
  0x62   :  { %135 = vperm.xlu0 %3514, %v90_v12  }
  0x63   :  { %138 = vperm.xlu1 %3515, %v91_v14  }
  0x66   :  { %231 = vperm.xlu0 %3514, %v186_v16  }
  0x67   :  { %234 = vperm.xlu1 %3515, %v187_v17  }
  0xa5   :  { %v94_v22 = vpop.permute.xlu0 %93 }
  0xa6   :  { %v190_v23 = vpop.permute.xlu1 %189  ;;  %vm140_vm0 = vcmp.eq.s32.totalorder %v4149_v21, %v94_v22 }
  0xa7   :  { %vm236_vm1 = vcmp.eq.s32.totalorder %v4149_v21, %v190_v23 }
  0xa8   :  { %vm252_vm2 = vmor %vm140_vm0, %vm236_vm1 }
  0xa9   :  { %v97_v24 = vpop.permute.xlu0 %96 }
  0xaa   :  { %v193_v25 = vpop.permute.xlu1 %192  ;;  %vm141_vm3 = vcmp.eq.s32.totalorder %v4149_v21, %v97_v24  ;;  %v3611_v24 = vld [vmem:[#allocation2 + $0x204] ss:$16 sps:$4 sm:$0xff]  }
  0xab   :  { %vm237_vm4 = vcmp.eq.s32.totalorder %v4149_v21, %v193_v25  ;;  %v3609_v25 = vld [vmem:[#allocation2 + $0x200] ss:$16 sps:$4 sm:$0xff]  }
  0xac   :  { %vm253_vm5 = vmor %vm141_vm3, %vm237_vm4 }
  0xad   :  { %v100_v26 = vpop.permute.xlu0 %99  ;;  %vm3063_vm6 = vmpackc.low %vm253_vm5, %vm252_vm2 }
  0xae   :  { %v103_v31 = vpop.permute.xlu1 %102  ;;  %3064 = vmatmul.mubr.msk.bf16.vlgmr.msra.gmra.mxu0 %vm3063_vm6, %v3892_v32  ;;  %3080 = vmatmul.mubr.msk.bf16.vlgmr.msra.gmra.mxu1 %vm3063_vm6, %v3892_v32  ;;  %vm142_vm8 = vcmp.eq.s32.totalorder %v4149_v21, %v100_v26  ;;  %v3617_v26 = vld [vmem:[#allocation2 + $0x3e4] ss:$16 sps:$4 sm:$0xff]  }
  0xaf   :  { %526 = vmatprep.mubr.bf16.mxu0 %v3891_v0  ;;  %639 = vmatprep.mubr.bf16.mxu1 %v3891_v0  ;;  %vm143_vm9 = vcmp.eq.s32.totalorder %v4149_v21, %v103_v31  ;;  %v3621_v31 = vld [vmem:[#allocation2 + $0x3c0] ss:$16 sps:$4 sm:$0xff]  }
  0xb0   :  { %1741 = vmatpush1.bf16.msra.mxu0 %v3564_v27  ;;  %1854 = vmatpush1.bf16.msra.mxu1 %v3567_v28  ;;  %v3612_v27 = vld [vmem:[#allocation2 + $0x1e0] ss:$16 sps:$4 sm:$0xff]  }
  0xb1   :  { %v196_v33 = vpop.permute.xlu0 %195  ;;  %1742 = vmatprep.subr.bf16.mxu0 %v3572_v29  ;;  %1855 = vmatprep.subr.bf16.mxu1 %v3575_v30  ;;  %v3615_v28 = vld [vmem:[#allocation2 + $0x3e0] ss:$16 sps:$4 sm:$0xff]   ;;  %v3620_v29 = vld [vmem:[#allocation2 + $0x1c4] ss:$16 sps:$4 sm:$0xff]  }
  0xb2   :  { %vm238_vm7 = vcmp.eq.s32.totalorder %v4149_v21, %v196_v33  ;;  %v199_v38 = vpop.permute.xlu1 %198  ;;  %v3618_v30 = vld [vmem:[#allocation2 + $0x1c0] ss:$16 sps:$4 sm:$0xff]  }
  0xb3   :  { %vm4162_vm10 = vmor %vm142_vm8, %vm238_vm7  ;;  %vm239_vm11 = vcmp.eq.s32.totalorder %v4149_v21, %v199_v38  ;;  %v3624_v33 = vld [vmem:[#allocation2 + $0x1a0] ss:$16 sps:$4 sm:$0xff]  }
  0xb4   :  { %vm255_vm12 = vmor %vm143_vm9, %vm239_vm11  ;;  %1743 = vmatpush1.bf16.msra.mxu0 %v3570_v34  ;;  %1856 = vmatpush1.bf16.msra.mxu1 %v3573_v35  ;;  %v3629_v34 = vld [vmem:[#allocation2 + $0x3a4] ss:$16 sps:$4 sm:$0xff]   ;;  %v3627_v35 = vld [vmem:[#allocation2 + $0x3a0] ss:$16 sps:$4 sm:$0xff]  }
  0xb5   :  { %v106_v40 = vpop.permute.xlu0 %105  ;;  %vm3065_vm13 = vmpackc.low %vm255_vm12, %vm4162_vm10  ;;  %1744 = vmatprep.subr.bf16.mxu0 %v3578_v36  ;;  %1857 = vmatprep.subr.bf16.mxu1 %v3581_v37  ;;  %v3632_v36 = vld [vmem:[#allocation2 + $0x184] ss:$16 sps:$4 sm:$0xff]   ;;  %v3630_v38 = vld [vmem:[#allocation2 + $0x180] ss:$16 sps:$4 sm:$0xff]  }
  0xb6   :  { %v109_v45 = vpop.permute.xlu1 %108  ;;  %3066 = vmatmul.mubr.msk.bf16.gmra.mxu0 %vm3065_vm13, %v3892_v32  ;;  %3082 = vmatmul.mubr.msk.bf16.gmra.mxu1 %vm3065_vm13, %v3892_v32  ;;  %vm144_vm15 = vcmp.eq.s32.totalorder %v4149_v21, %v106_v40  ;;  %v3635_v37 = vld [vmem:[#allocation2 + $0x384] ss:$16 sps:$4 sm:$0xff]  }
  0xb7   :  { %536 = vmatprep.mubr.bf16.mxu0 %v3891_v0  ;;  %649 = vmatprep.mubr.bf16.mxu1 %v3891_v0  ;;  %vm145_vm0 = vcmp.eq.s32.totalorder %v4149_v21, %v109_v45  ;;  %v3638_v40 = vld [vmem:[#allocation2 + $0x164] ss:$16 sps:$4 sm:$0xff]  }
  0xb8   :  { %1745 = vmatpush1.bf16.msra.mxu0 %v3576_v41  ;;  %1858 = vmatpush1.bf16.msra.mxu1 %v3579_v42  ;;  %v3641_v41 = vld [vmem:[#allocation2 + $0x364] ss:$16 sps:$4 sm:$0xff]   ;;  %v3636_v42 = vld [vmem:[#allocation2 + $0x160] ss:$16 sps:$4 sm:$0xff]  }
  0xb9   :  { %v202_v46 = vpop.permute.xlu0 %201  ;;  %1746 = vmatprep.subr.bf16.mxu0 %v3584_v43  ;;  %1859 = vmatprep.subr.bf16.mxu1 %v3587_v44  ;;  %v3639_v43 = vld [vmem:[#allocation2 + $0x360] ss:$16 sps:$4 sm:$0xff]   ;;  %v3644_v44 = vld [vmem:[#allocation2 + $0x144] ss:$16 sps:$4 sm:$0xff]  }
  0xba   :  { %vm240_vm14 = vcmp.eq.s32.totalorder %v4149_v21, %v202_v46  ;;  %v205_v51 = vpop.permute.xlu1 %204  ;;  %v3647_v45 = vld [vmem:[#allocation2 + $0x344] ss:$16 sps:$4 sm:$0xff]   ;;  %v3642_v46 = vld [vmem:[#allocation2 + $0x140] ss:$16 sps:$4 sm:$0xff]  }
  0xbb   :  { %vm4176_vm1 = vmor %vm144_vm15, %vm240_vm14  ;;  %vm241_vm2 = vcmp.eq.s32.totalorder %v4149_v21, %v205_v51  ;;  %v3651_v51 = vld [vmem:[#allocation2 + $0x320] ss:$16 sps:$4 sm:$0xff]  }
  0xbc   :  { %vm257_vm3 = vmor %vm145_vm0, %vm241_vm2  ;;  %1747 = vmatpush1.bf16.msra.mxu0 %v3582_v47  ;;  %1860 = vmatpush1.bf16.msra.mxu1 %v3585_v48  ;;  %v3645_v47 = vld [vmem:[#allocation2 + $0x340] ss:$16 sps:$4 sm:$0xff]   ;;  %v3650_v48 = vld [vmem:[#allocation2 + $0x124] ss:$16 sps:$4 sm:$0xff]  }
  0xbd   :  { %v112_v53 = vpop.permute.xlu0 %111  ;;  %vm3067_vm4 = vmpackc.low %vm257_vm3, %vm4176_vm1  ;;  %1748 = vmatprep.subr.bf16.mxu0 %v3590_v49  ;;  %1861 = vmatprep.subr.bf16.mxu1 %v3593_v50  ;;  %v3653_v49 = vld [vmem:[#allocation2 + $0x324] ss:$16 sps:$4 sm:$0xff]   ;;  %v3648_v50 = vld [vmem:[#allocation2 + $0x120] ss:$16 sps:$4 sm:$0xff]  }
  0xbe   :  { %v115_v58 = vpop.permute.xlu1 %114  ;;  %3068 = vmatmul.mubr.msk.bf16.gmra.mxu0 %vm3067_vm4, %v3892_v32  ;;  %3084 = vmatmul.mubr.msk.bf16.gmra.mxu1 %vm3067_vm4, %v3892_v32  ;;  %vm146_vm6 = vcmp.eq.s32.totalorder %v4149_v21, %v112_v53  ;;  %v3659_v53 = vld [vmem:[#allocation2 + $0x304] ss:$16 sps:$4 sm:$0xff]  }
  0xbf   :  { %546 = vmatprep.mubr.bf16.mxu0 %v3891_v0  ;;  %659 = vmatprep.mubr.bf16.mxu1 %v3891_v0  ;;  %vm147_vm7 = vcmp.eq.s32.totalorder %v4149_v21, %v115_v58 }
  0xc0   :  { %1749 = vmatpush1.bf16.msra.mxu0 %v3588_v54  ;;  %1862 = vmatpush1.bf16.msra.mxu1 %v3591_v55  ;;  %v3654_v54 = vld [vmem:[#allocation2 + $0x100] ss:$16 sps:$4 sm:$0xff]  }
  0xc1   :  { %v208_v59 = vpop.permute.xlu0 %207  ;;  %1750 = vmatprep.subr.bf16.mxu0 %v3596_v56  ;;  %1863 = vmatprep.subr.bf16.mxu1 %v3599_v57  ;;  %v3657_v55 = vld [vmem:[#allocation2 + $0x300] ss:$16 sps:$4 sm:$0xff]   ;;  %v3662_v56 = vld [vmem:[#allocation2 + $0xec] ss:$16 sps:$4 sm:$0xff]  }
  0xc2   :  { %vm242_vm5 = vcmp.eq.s32.totalorder %v4149_v21, %v208_v59  ;;  %v211_v1 = vpop.permute.xlu1 %210  ;;  %v3665_v57 = vld [vmem:[#allocation2 + $0x2ec] ss:$16 sps:$4 sm:$0xff]  }
  0xc3   :  { %vm258_vm8 = vmor %vm146_vm6, %vm242_vm5  ;;  %vm243_vm9 = vcmp.eq.s32.totalorder %v4149_v21, %v211_v1 }
  0xc4   :  { %vm259_vm10 = vmor %vm147_vm7, %vm243_vm9  ;;  %1751 = vmatpush1.bf16.msra.mxu0 %v3594_v60  ;;  %1864 = vmatpush1.bf16.msra.mxu1 %v3597_v61 }
  0xc5   :  { %v118_v2 = vpop.permute.xlu0 %117  ;;  %vm3069_vm11 = vmpackc.low %vm259_vm10, %vm258_vm8  ;;  %1752 = vmatprep.subr.bf16.mxu0 %v3602_v62  ;;  %1865 = vmatprep.subr.bf16.mxu1 %v3605_v63 }
  0xc6   :  { %v121_v6 = vpop.permute.xlu1 %120  ;;  %3070 = vmatmul.mubr.msk.bf16.gmra.mxu0 %vm3069_vm11, %v3892_v32  ;;  %3086 = vmatmul.mubr.msk.bf16.gmra.mxu1 %vm3069_vm11, %v3892_v32  ;;  %vm148_vm13 = vcmp.eq.s32.totalorder %v4149_v21, %v118_v2 }
  0xc7   :  { %556 = vmatprep.mubr.bf16.mxu0 %v3891_v0  ;;  %669 = vmatprep.mubr.bf16.mxu1 %v3891_v0  ;;  %vm149_vm14 = vcmp.eq.s32.totalorder %v4149_v21, %v121_v6 }
  0xc8   :  { %1753 = vmatpush1.bf16.msra.mxu0 %v3600_v3  ;;  %1866 = vmatpush1.bf16.msra.mxu1 %v3603_v4 }
  0xc9   :  { %v214_v7 = vpop.permute.xlu0 %213  ;;  %1754 = vmatprep.subr.bf16.mxu0 %v3608_v5  ;;  %1867 = vmatprep.subr.bf16.mxu1 %v3611_v24 }
  0xca   :  { %vm244_vm12 = vcmp.eq.s32.totalorder %v4149_v21, %v214_v7  ;;  %v217_v9 = vpop.permute.xlu1 %216 }
  0xcb   :  { %vm260_vm15 = vmor %vm148_vm13, %vm244_vm12  ;;  %vm245_vm0 = vcmp.eq.s32.totalorder %v4149_v21, %v217_v9 }
  0xcc   :  { %vm261_vm1 = vmor %vm149_vm14, %vm245_vm0  ;;  %1755 = vmatpush1.bf16.msra.mxu0 %v3606_v8  ;;  %1868 = vmatpush1.bf16.msra.mxu1 %v3609_v25 }
  0xcd   :  { %v124_v10 = vpop.permute.xlu0 %123  ;;  %vm3071_vm2 = vmpackc.low %vm261_vm1, %vm260_vm15  ;;  %1869 = vmatprep.subr.bf16.mxu1 %v3617_v26 }
  0xce   :  { %v127_v11 = vpop.permute.xlu1 %126  ;;  %3072 = vmatmul.mubr.msk.bf16.gmra.mxu0 %vm3071_vm2, %v3892_v32  ;;  %3088 = vmatmul.mubr.msk.bf16.gmra.mxu1 %vm3071_vm2, %v3892_v32  ;;  %vm150_vm4 = vcmp.eq.s32.totalorder %v4149_v21, %v124_v10 }
  0xcf   :  { %566 = vmatprep.mubr.bf16.mxu0 %v3891_v0  ;;  %679 = vmatprep.mubr.bf16.mxu1 %v3891_v0  ;;  %vm151_vm5 = vcmp.eq.s32.totalorder %v4149_v21, %v127_v11 }
  0xd0   :  { %1870 = vmatpush2.bf16.msra.mxu1 %v3615_v28 }
  0xd1   :  { %v220_v12 = vpop.permute.xlu0 %219 }
  0xd2   :  { %vm246_vm3 = vcmp.eq.s32.totalorder %v4149_v21, %v220_v12  ;;  %v223_v13 = vpop.permute.xlu1 %222 }
  0xd3   :  { %vm262_vm6 = vmor %vm150_vm4, %vm246_vm3  ;;  %vm247_vm7 = vcmp.eq.s32.totalorder %v4149_v21, %v223_v13 }
  0xd4   :  { %vm263_vm8 = vmor %vm151_vm5, %vm247_vm7 }
  0xd5   :  { %v130_v14 = vpop.permute.xlu0 %129  ;;  %vm3073_vm9 = vmpackc.low %vm263_vm8, %vm262_vm6 }
  0xd6   :  { %v133_v15 = vpop.permute.xlu1 %132  ;;  %3074 = vmatmul.mubr.msk.bf16.gmra.mxu0 %vm3073_vm9, %v3892_v32  ;;  %3090 = vmatmul.mubr.msk.bf16.gmra.mxu1 %vm3073_vm9, %v3892_v32  ;;  %vm152_vm11 = vcmp.eq.s32.totalorder %v4149_v21, %v130_v14 }
  0xd7   :  { %576 = vmatprep.mubr.bf16.mxu0 %v3891_v0  ;;  %689 = vmatprep.mubr.bf16.mxu1 %v3891_v0  ;;  %vm153_vm12 = vcmp.eq.s32.totalorder %v4149_v21, %v133_v15 }
  0xd9   :  { %v226_v16 = vpop.permute.xlu0 %225 }
  0xda   :  { %vm248_vm10 = vcmp.eq.s32.totalorder %v4149_v21, %v226_v16  ;;  %v229_v17 = vpop.permute.xlu1 %228 }
  0xdb   :  { %vm264_vm13 = vmor %vm152_vm11, %vm248_vm10  ;;  %vm249_vm14 = vcmp.eq.s32.totalorder %v4149_v21, %v229_v17 }
  0xdc   :  { %vm265_vm15 = vmor %vm153_vm12, %vm249_vm14 }
  0xdd   :  { %v136_v18 = vpop.permute.xlu0 %135  ;;  %vm3075_vm0 = vmpackc.low %vm265_vm15, %vm264_vm13 }
  0xde   :  { %v139_v19 = vpop.permute.xlu1 %138  ;;  %3076 = vmatmul.mubr.msk.bf16.gmra.mxu0 %vm3075_vm0, %v3892_v32  ;;  %3092 = vmatmul.mubr.msk.bf16.gmra.mxu1 %vm3075_vm0, %v3892_v32  ;;  %vm154_vm2 = vcmp.eq.s32.totalorder %v4149_v21, %v136_v18 }
  0xdf   :  { %586 = vmatprep.mubr.bf16.mxu0 %v3891_v0  ;;  %699 = vmatprep.mubr.bf16.mxu1 %v3891_v0  ;;  %vm155_vm3 = vcmp.eq.s32.totalorder %v4149_v21, %v139_v19  ;;  %v3614_v0 = vld [vmem:[#allocation2 + $0x1e4] ss:$16 sps:$4 sm:$0xff]  }
  0xe0   :  { %1756 = vmatprep.subr.bf16.mxu0 %v3614_v0 }
  0xe1   :  { %v232_v22 = vpop.permute.xlu0 %231  ;;  %1757 = vmatpush2.bf16.msra.mxu0 %v3612_v27 }
  0xe2   :  { %vm250_vm1 = vcmp.eq.s32.totalorder %v4149_v21, %v232_v22  ;;  %v235_v23 = vpop.permute.xlu1 %234  ;;  %1758 = vmatprep.subr.bf16.mxu0 %v3620_v29 }
  0xe3   :  { %vm266_vm4 = vmor %vm154_vm2, %vm250_vm1  ;;  %vm251_vm5 = vcmp.eq.s32.totalorder %v4149_v21, %v235_v23  ;;  %v3623_v21 = vld [vmem:[#allocation2 + $0x3c4] ss:$16 sps:$4 sm:$0xff]  }
  0xe4   :  { %vm267_vm6 = vmor %vm155_vm3, %vm251_vm5  ;;  %1871 = vmatprep.subr.bf16.mxu1 %v3623_v21 }
  0xe5   :  { %vm3077_vm7 = vmpackc.low %vm267_vm6, %vm266_vm4  ;;  %1759 = vmatpush2.bf16.msra.mxu0 %v3618_v30  ;;  %1872 = vmatpush2.bf16.msra.mxu1 %v3621_v31 }
  0xe6   :  { %3078 = vmatmul.mubr.msk.bf16.gmra.mxu0 %vm3077_vm7, %v3892_v32  ;;  %3094 = vmatmul.mubr.msk.bf16.gmra.mxu1 %vm3077_vm7, %v3892_v32  ;;  %v3626_v32 = vld [vmem:[#allocation2 + $0x1a4] ss:$16 sps:$4 sm:$0xff]  }
  0xe7   :  { %1760 = vmatprep.subr.bf16.mxu0 %v3626_v32  ;;  %1873 = vmatprep.subr.bf16.mxu1 %v3629_v34 }
  0xe9   :  { %1761 = vmatpush2.bf16.msra.mxu0 %v3624_v33  ;;  %1874 = vmatpush2.bf16.msra.mxu1 %v3627_v35 }
  0xea   :  { %1762 = vmatprep.subr.bf16.mxu0 %v3632_v36  ;;  %1875 = vmatprep.subr.bf16.mxu1 %v3635_v37 }
  0xed   :  { %1763 = vmatpush2.bf16.msra.mxu0 %v3630_v38  ;;  %1876 = vmatpush2.bf16.msra.mxu1 %v3633_v39 }
  0xee   :  { %1764 = vmatprep.subr.bf16.mxu0 %v3638_v40  ;;  %1877 = vmatprep.subr.bf16.mxu1 %v3641_v41 }
  0xf1   :  { %1765 = vmatpush2.bf16.msra.mxu0 %v3636_v42  ;;  %1878 = vmatpush2.bf16.msra.mxu1 %v3639_v43 }
  0xf2   :  { %1766 = vmatprep.subr.bf16.mxu0 %v3644_v44  ;;  %1879 = vmatprep.subr.bf16.mxu1 %v3647_v45 }
  0xf5   :  { %1767 = vmatpush2.bf16.msra.mxu0 %v3642_v46  ;;  %1880 = vmatpush2.bf16.msra.mxu1 %v3645_v47 }
  0xf6   :  { %1768 = vmatprep.subr.bf16.mxu0 %v3650_v48  ;;  %1881 = vmatprep.subr.bf16.mxu1 %v3653_v49 }
  0xf9   :  { %1769 = vmatpush2.bf16.msra.mxu0 %v3648_v50  ;;  %1882 = vmatpush2.bf16.msra.mxu1 %v3651_v51 }
  0xfa   :  { %1770 = vmatprep.subr.bf16.mxu0 %v3656_v52  ;;  %1883 = vmatprep.subr.bf16.mxu1 %v3659_v53 }
  0xfd   :  { %1771 = vmatpush2.bf16.msra.mxu0 %v3654_v54  ;;  %1884 = vmatpush2.bf16.msra.mxu1 %v3657_v55 }
  0xfe   :  { %1966 = vmatprep.subr.bf16.mxu0 %v3662_v56  ;;  %2079 = vmatprep.subr.bf16.mxu1 %v3665_v57 }
 0x16e   :  { %v4225_v58 = vpop.f32.mrf.mxu0  ;;  %v4227_v59 = vpop.f32.mrf.mxu1 }
 0x16f   :  { %v710_v62 = vmul.f32 %v4225_v58, %v4225_v58  ;;  %v758_v3 = vmul.f32 %v4227_v59, %v4227_v59 }
 0x170   :  { %v4229_v60 = vpop.f32.mrf.mxu0  ;;  %v4231_v61 = vpop.f32.mrf.mxu1 }
 0x171   :  { %v726_v63 = vmul.f32 %v4229_v60, %v4229_v60  ;;  %v790_v8 = vmul.f32 %v4231_v61, %v4231_v61 }
 0x172   :  { %v4237_v1 = vpop.f32.mrf.mxu0  ;;  %v4239_v2 = vpop.f32.mrf.mxu1 }
 0x173   :  { %v742_v4 = vadd.f32 %v726_v63, %v710_v62  ;;  %v711_v9 = vmul.f32 %v4237_v1, %v4237_v1  ;;  %v759_v14 = vmul.f32 %v4239_v2, %v4239_v2 }
 0x174   :  { %v4243_v5 = vpop.f32.mrf.mxu0  ;;  %v4245_v6 = vpop.f32.mrf.mxu1 }
 0x175   :  { %v774_v7 = vadd.f32 %v758_v3, %v742_v4  ;;  %v727_v10 = vmul.f32 %v4243_v5, %v4243_v5  ;;  %v791_v16 = vmul.f32 %v4245_v6, %v4245_v6 }
 0x176   :  { %v4253_v11 = vpop.f32.mrf.mxu0  ;;  %v4255_v12 = vpop.f32.mrf.mxu1 }
 0x177   :  { %v806_v13 = vadd.f32 %v790_v8, %v774_v7  ;;  %v743_v15 = vadd.f32 %v727_v10, %v711_v9  ;;  %v712_v23 = vmul.f32 %v4253_v11, %v4253_v11  ;;  %v760_v27 = vmul.f32 %v4255_v12, %v4255_v12 }
 0x178   :  { %v4261_v17 = vpop.f32.mrf.mxu0  ;;  %v4263_v18 = vpop.f32.mrf.mxu1 }
 0x179   :  { %v822_v19 = vadd.f32 0.0001, %v806_v13  ;;  %v775_v22 = vadd.f32 %v759_v14, %v743_v15  ;;  %v728_v24 = vmul.f32 %v4261_v17, %v4261_v17  ;;  %v792_v29 = vmul.f32 %v4263_v18, %v4263_v18 }
 0x17a   :  { %v4269_v25 = vpop.f32.mrf.mxu0  ;;  %v4271_v0 = vpop.f32.mrf.mxu1 }
 0x17b   :  { %3756 = vrsqrt.f32 %v822_v19  ;;  %v807_v26 = vadd.f32 %v791_v16, %v775_v22  ;;  %v744_v28 = vadd.f32 %v728_v24, %v712_v23  ;;  %v713_v33 = vmul.f32 %v4269_v25, %v4269_v25 }
 0x17c   :  { %v4277_v21 = vpop.f32.mrf.mxu0  ;;  %v4279_v30 = vpop.f32.mrf.mxu1  ;;  %v761_v38 = vmul.f32 %v4271_v0, %v4271_v0 }
 0x17d   :  { %v823_v31 = vadd.f32 0.0001, %v807_v26  ;;  %v776_v32 = vadd.f32 %v760_v27, %v744_v28  ;;  %v729_v34 = vmul.f32 %v4277_v21, %v4277_v21  ;;  %v793_v40 = vmul.f32 %v4279_v30, %v4279_v30 }
 0x17e   :  { %v4285_v35 = vpop.f32.mrf.mxu0  ;;  %v4287_v36 = vpop.f32.mrf.mxu1 }
 0x17f   :  { %3758 = vrsqrt.f32 %v823_v31  ;;  %v808_v37 = vadd.f32 %v792_v29, %v776_v32  ;;  %v745_v39 = vadd.f32 %v729_v34, %v713_v33  ;;  %v714_v45 = vmul.f32 %v4285_v35, %v4285_v35 }
 0x180   :  { %v4293_v41 = vpop.f32.mrf.mxu0  ;;  %v4295_v42 = vpop.f32.mrf.mxu1  ;;  %v762_v50 = vmul.f32 %v4287_v36, %v4287_v36 }
 0x181   :  { %v824_v43 = vadd.f32 0.0001, %v808_v37  ;;  %v777_v44 = vadd.f32 %v761_v38, %v745_v39  ;;  %v730_v46 = vmul.f32 %v4293_v41, %v4293_v41  ;;  %v794_v52 = vmul.f32 %v4295_v42, %v4295_v42 }
 0x182   :  { %v4301_v47 = vpop.f32.mrf.mxu0  ;;  %v4303_v48 = vpop.f32.mrf.mxu1 }
 0x183   :  { %3760 = vrsqrt.f32 %v824_v43  ;;  %v809_v49 = vadd.f32 %v793_v40, %v777_v44  ;;  %v746_v51 = vadd.f32 %v730_v46, %v714_v45  ;;  %v715_v57 = vmul.f32 %v4301_v47, %v4301_v47 }
 0x184   :  { %v4309_v53 = vpop.f32.mrf.mxu0  ;;  %v4311_v54 = vpop.f32.mrf.mxu1  ;;  %v763_v7 = vmul.f32 %v4303_v48, %v4303_v48 }
 0x185   :  { %v825_v55 = vadd.f32 0.0001, %v809_v49  ;;  %v778_v56 = vadd.f32 %v762_v50, %v746_v51  ;;  %v731_v62 = vmul.f32 %v4309_v53, %v4309_v53  ;;  %v795_v10 = vmul.f32 %v4311_v54, %v4311_v54 }
 0x186   :  { %v4317_v63 = vpop.f32.mrf.mxu0  ;;  %v4319_v3 = vpop.f32.mrf.mxu1 }
 0x187   :  { %3762 = vrsqrt.f32 %v825_v55  ;;  %v810_v4 = vadd.f32 %v794_v52, %v778_v56  ;;  %v747_v8 = vadd.f32 %v731_v62, %v715_v57  ;;  %v716_v19 = vmul.f32 %v4317_v63, %v4317_v63 }
 0x188   :  { %v3757_v9 = vpop.eup %3756  ;;  %v4325_v13 = vpop.f32.mrf.mxu0  ;;  %v764_v24 = vmul.f32 %v4319_v3, %v4319_v3 }
 0x189   :  { %v4327_v14 = vpop.f32.mrf.mxu1  ;;  %v826_v15 = vadd.f32 0.0001, %v810_v4  ;;  %v779_v16 = vadd.f32 %v763_v7, %v747_v8  ;;  %v732_v22 = vmul.f32 %v4325_v13, %v4325_v13  ;;  %v902_v23 = vmul.f32 %v3757_v9, %v4231_v61 }
 0x18a   :  { %v4336_v26 = vpop.f32.mrf.mxu0  ;;  %v796_v31 = vmul.f32 %v4327_v14, %v4327_v14  ;;  %v870_v37 = vmul.f32 %v3757_v9, %v4229_v60  ;;  %v854_v38 = vmul.f32 %v3757_v9, %v4225_v58  ;;  %v886_v39 = vmul.f32 %v3757_v9, %v4227_v59 }
 0x18b   :  { %v4338_v27 = vpop.f32.mrf.mxu1  ;;  %3764 = vrsqrt.f32 %v826_v15  ;;  %v811_v28 = vadd.f32 %v795_v10, %v779_v16  ;;  %v748_v29 = vadd.f32 %v732_v22, %v716_v19  ;;  %v717_v33 = vmul.f32 %v4336_v26, %v4336_v26  ;;  %v3663_v15 = vld [vmem:[#allocation2 + $0x2e8] ss:$16 sps:$4 sm:$0xff]   ;;  %v3668_v16 = vld [vmem:[#allocation2 + $0xcc] ss:$16 sps:$4 sm:$0xff]  }
 0x18c   :  { %v3759_v32 = vpop.eup %3758  ;;  %v4344_v34 = vpop.f32.mrf.mxu0  ;;  %v765_v46 = vmul.f32 %v4338_v27, %v4338_v27 }
 0x18d   :  { %v4346_v61 = vpop.f32.mrf.mxu1  ;;  %v903_v40 = vmul.f32 %v3759_v32, %v4245_v6  ;;  %v827_v43 = vadd.f32 0.0001, %v811_v28  ;;  %v780_v44 = vadd.f32 %v764_v24, %v748_v29  ;;  %v733_v45 = vmul.f32 %v4344_v34, %v4344_v34  ;;  %v3671_v29 = vld [vmem:[#allocation2 + $0x2cc] ss:$16 sps:$4 sm:$0xff]  }
 0x18e   :  { %v4356_v49 = vpop.f32.mrf.mxu0  ;;  %v871_v60 = vmul.f32 %v3759_v32, %v4243_v5  ;;  %v855_v58 = vmul.f32 %v3759_v32, %v4237_v1  ;;  %v887_v59 = vmul.f32 %v3759_v32, %v4239_v2  ;;  %v797_v52 = vmul.f32 %v4346_v61, %v4346_v61  ;;  %v3660_v1 = vld [vmem:[#allocation2 + $0xe8] ss:$16 sps:$4 sm:$0xff]  }
 0x18f   :  { %v4358_v50 = vpop.f32.mrf.mxu1  ;;  %3766 = vrsqrt.f32 %v827_v43  ;;  %v812_v6 = vadd.f32 %v796_v31, %v780_v44  ;;  %v749_v51 = vadd.f32 %v733_v45, %v717_v33  ;;  %v718_v56 = vmul.f32 %v4356_v49, %v4356_v49  ;;  %v3666_v43 = vld [vmem:[#allocation2 + $0xc8] ss:$16 sps:$4 sm:$0xff]  }
 0x190   :  { %v3761_v55 = vpop.eup %3760  ;;  %v4367_v57 = vpop.f32.mrf.mxu0  ;;  %v4371_v4 = vpack.c.bf16 %v871_v60, %v870_v37  ;;  %v4373_v5 = vpack.c.bf16 %v903_v40, %v902_v23  ;;  %v4375_v2 = vpack.c.bf16 %v855_v58, %v854_v38  ;;  %v766_v9 = vmul.f32 %v4358_v50, %v4358_v50  ;;  %v3669_v58 = vld [vmem:[#allocation2 + $0x2c8] ss:$16 sps:$4 sm:$0xff]  }
 0x191   :  { %v4369_v62 = vpop.f32.mrf.mxu1  ;;  %v828_v7 = vadd.f32 0.0001, %v812_v6  ;;  %v781_v8 = vadd.f32 %v765_v46, %v749_v51  ;;  %v734_v10 = vmul.f32 %v4367_v57, %v4367_v57  ;;  %v904_v19 = vmul.f32 %v3761_v55, %v4263_v18 }
 0x192   :  { %v798_v22 = vmul.f32 %v4369_v62, %v4369_v62  ;;  %1772 = vmatprep.mubr.bf16.mxu0 %v4371_v4  ;;  %1885 = vmatprep.mubr.bf16.mxu1 %v4373_v5  ;;  %v4386_v23 = vpop.f32.mrf.mxu0  ;;  %v4390_v28 = vpack.c.bf16 %v887_v59, %v886_v39  ;;  %v872_v18 = vmul.f32 %v3761_v55, %v4261_v17  ;;  %v3674_v59 = vld [vmem:[#allocation2 + $0xac] ss:$16 sps:$4 sm:$0xff]  }
 0x193   :  { %v4388_v24 = vpop.f32.mrf.mxu1  ;;  %3768 = vrsqrt.f32 %v828_v7  ;;  %v813_v31 = vadd.f32 %v797_v52, %v781_v8  ;;  %v750_v32 = vadd.f32 %v734_v10, %v718_v56  ;;  %1773 = vmatmul.mubr.bf16.vlgmr.msra.gmra.mxu0 %v4375_v2  ;;  %v719_v37 = vmul.f32 %v4386_v23, %v4386_v23 }
 0x194   :  { %v3763_v33 = vpop.eup %3762  ;;  %v767_v38 = vmul.f32 %v4388_v24, %v4388_v24  ;;  %1886 = vmatmul.mubr.bf16.vlgmr.msra.gmra.mxu1 %v4390_v28  ;;  %1967 = vmatpush1.bf16.msra.mxu0 %v3660_v1  ;;  %v4399_v39 = vpop.f32.mrf.mxu0  ;;  %v856_v44 = vmul.f32 %v3761_v55, %v4253_v11 }
 0x195   :  { %v4401_v40 = vpop.f32.mrf.mxu1  ;;  %v905_v45 = vmul.f32 %v3763_v33, %v4279_v30  ;;  %v829_v17 = vadd.f32 0.0001, %v813_v31  ;;  %v782_v46 = vadd.f32 %v766_v9, %v750_v32  ;;  %2080 = vmatpush1.bf16.msra.mxu1 %v3663_v15  ;;  %v735_v60 = vmul.f32 %v4399_v39, %v4399_v39  ;;  %1968 = vmatprep.subr.bf16.mxu0 %v3668_v16  ;;  %v3677_v9 = vld [vmem:[#allocation2 + $0x2ac] ss:$16 sps:$4 sm:$0xff]  }
 0x196   :  { %v4407_v6 = vpop.f32.mrf.mxu0  ;;  %2081 = vmatprep.subr.bf16.mxu1 %v3671_v29  ;;  %v873_v52 = vmul.f32 %v3763_v33, %v4277_v21  ;;  %v857_v11 = vmul.f32 %v3763_v33, %v4269_v25  ;;  %v888_v30 = vmul.f32 %v3761_v55, %v4255_v12  ;;  %v889_v56 = vmul.f32 %v3763_v33, %v4271_v0  ;;  %v3672_v0 = vld [vmem:[#allocation2 + $0xa8] ss:$16 sps:$4 sm:$0xff]  }
 0x197   :  { %v4409_v51 = vpop.f32.mrf.mxu1  ;;  %3770 = vrsqrt.f32 %v829_v17  ;;  %v814_v1 = vadd.f32 %v798_v22, %v782_v46  ;;  %v751_v7 = vadd.f32 %v735_v60, %v719_v37  ;;  %v799_v8 = vmul.f32 %v4401_v40, %v4401_v40  ;;  %v3675_v33 = vld [vmem:[#allocation2 + $0x2a8] ss:$16 sps:$4 sm:$0xff]   ;;  %v3680_v37 = vld [vmem:[#allocation2 + $0x8c] ss:$16 sps:$4 sm:$0xff]  }
 0x198   :  { %v3765_v10 = vpop.eup %3764  ;;  %v720_v15 = vmul.f32 %v4407_v6, %v4407_v6  ;;  %1969 = vmatpush1.bf16.msra.mxu0 %v3666_v43  ;;  %v4419_v16 = vpop.f32.mrf.mxu0  ;;  %v4423_v25 = vpack.c.bf16 %v873_v52, %v872_v18  ;;  %v4425_v12 = vpack.c.bf16 %v905_v45, %v904_v19  ;;  %v4427_v55 = vpack.c.bf16 %v857_v11, %v856_v44  ;;  %v3683_v45 = vld [vmem:[#allocation2 + $0x28c] ss:$16 sps:$4 sm:$0xff]  }
 0x199   :  { %v4421_v21 = vpop.f32.mrf.mxu1  ;;  %v830_v22 = vadd.f32 0.0001, %v814_v1  ;;  %v783_v29 = vadd.f32 %v767_v38, %v751_v7  ;;  %v768_v31 = vmul.f32 %v4409_v51, %v4409_v51  ;;  %2082 = vmatpush1.bf16.msra.mxu1 %v3669_v58  ;;  %v736_v32 = vmul.f32 %v4419_v16, %v4419_v16  ;;  %1970 = vmatprep.subr.bf16.mxu0 %v3674_v59 }
 0x19a   :  { %v906_v18 = vmul.f32 %v3765_v10, %v4295_v42  ;;  %v800_v19 = vmul.f32 %v4421_v21, %v4421_v21  ;;  %1782 = vmatprep.mubr.bf16.mxu0 %v4423_v25  ;;  %1895 = vmatprep.mubr.bf16.mxu1 %v4425_v12  ;;  %v4438_v38 = vpop.f32.mrf.mxu0  ;;  %v4442_v44 = vpack.c.bf16 %v889_v56, %v888_v30  ;;  %v3678_v30 = vld [vmem:[#allocation2 + $0x88] ss:$16 sps:$4 sm:$0xff]  }
 0x19b   :  { %v4440_v43 = vpop.f32.mrf.mxu1  ;;  %3772 = vrsqrt.f32 %v830_v22  ;;  %v815_v17 = vadd.f32 %v799_v8, %v783_v29  ;;  %v752_v46 = vadd.f32 %v736_v32, %v720_v15  ;;  %1783 = vmatmul.mubr.bf16.gmra.mxu0 %v4427_v55  ;;  %2083 = vmatprep.subr.bf16.mxu1 %v3677_v9  ;;  %v874_v42 = vmul.f32 %v3765_v10, %v4293_v41  ;;  %v3681_v9 = vld [vmem:[#allocation2 + $0x288] ss:$16 sps:$4 sm:$0xff]   ;;  %v3686_v15 = vld [vmem:[#allocation2 + $0x6c] ss:$16 sps:$4 sm:$0xff]  }
 0x19c   :  { %v3767_v60 = vpop.eup %3766  ;;  %v721_v58 = vmul.f32 %v4438_v38, %v4438_v38  ;;  %v769_v59 = vmul.f32 %v4440_v43, %v4440_v43  ;;  %1896 = vmatmul.mubr.bf16.gmra.mxu1 %v4442_v44  ;;  %1971 = vmatpush1.bf16.msra.mxu0 %v3672_v0  ;;  %v4451_v52 = vpop.f32.mrf.mxu0  ;;  %v858_v56 = vmul.f32 %v3765_v10, %v4285_v35 }
 0x19d   :  { %v4453_v11 = vpop.f32.mrf.mxu1  ;;  %v907_v1 = vmul.f32 %v3767_v60, %v4311_v54  ;;  %v831_v41 = vadd.f32 0.0001, %v815_v17  ;;  %v784_v7 = vadd.f32 %v768_v31, %v752_v46  ;;  %2084 = vmatpush1.bf16.msra.mxu1 %v3675_v33  ;;  %v737_v8 = vmul.f32 %v4451_v52, %v4451_v52  ;;  %1972 = vmatprep.subr.bf16.mxu0 %v3680_v37  ;;  %v3689_v17 = vld [vmem:[#allocation2 + $0x26c] ss:$16 sps:$4 sm:$0xff]  }
 0x19e   :  { %v4459_v22 = vpop.f32.mrf.mxu0  ;;  %2085 = vmatprep.subr.bf16.mxu1 %v3683_v45  ;;  %v875_v29 = vmul.f32 %v3767_v60, %v4309_v53  ;;  %v859_v35 = vmul.f32 %v3767_v60, %v4301_v47  ;;  %v890_v54 = vmul.f32 %v3765_v10, %v4287_v36  ;;  %v891_v31 = vmul.f32 %v3767_v60, %v4303_v48  ;;  %v3684_v48 = vld [vmem:[#allocation2 + $0x68] ss:$16 sps:$4 sm:$0xff]  }
 0x19f   :  { %v4461_v0 = vpop.f32.mrf.mxu1  ;;  %3774 = vrsqrt.f32 %v831_v41  ;;  %v816_v32 = vadd.f32 %v800_v19, %v784_v7  ;;  %v753_v33 = vadd.f32 %v737_v8, %v721_v58  ;;  %v801_v37 = vmul.f32 %v4453_v11, %v4453_v11  ;;  %v3687_v41 = vld [vmem:[#allocation2 + $0x268] ss:$16 sps:$4 sm:$0xff]   ;;  %v3692_v7 = vld [vmem:[#allocation2 + $0x4c] ss:$16 sps:$4 sm:$0xff]  }
 0x1a0   :  { %v3769_v46 = vpop.eup %3768  ;;  %v722_v20 = vmul.f32 %v4459_v22, %v4459_v22  ;;  %1973 = vmatpush1.bf16.msra.mxu0 %v3678_v30  ;;  %v4471_v45 = vpop.f32.mrf.mxu0  ;;  %v4475_v47 = vpack.c.bf16 %v875_v29, %v874_v42  ;;  %v4477_v36 = vpack.c.bf16 %v907_v1, %v906_v18  ;;  %v4479_v10 = vpack.c.bf16 %v859_v35, %v858_v56  ;;  %v3695_v8 = vld [vmem:[#allocation2 + $0x24c] ss:$16 sps:$4 sm:$0xff]  }
 0x1a1   :  { %v4473_v53 = vpop.f32.mrf.mxu1  ;;  %v832_v19 = vadd.f32 0.0001, %v816_v32  ;;  %v785_v60 = vadd.f32 %v769_v59, %v753_v33  ;;  %v770_v58 = vmul.f32 %v4461_v0, %v4461_v0  ;;  %2086 = vmatpush1.bf16.msra.mxu1 %v3681_v9  ;;  %v738_v30 = vmul.f32 %v4471_v45, %v4471_v45  ;;  %1974 = vmatprep.subr.bf16.mxu0 %v3686_v15 }
 0x1a2   :  { %5361 = vst [vmem:[#allocation9_spill] sm:$0xff] %v4475_v47  ;;  %5362 = vst [vmem:[#allocation10_spill] sm:$0xff] %v4477_v36  ;;  %v908_v42 = vmul.f32 %v3769_v46, %v4327_v14  ;;  %v802_v18 = vmul.f32 %v4473_v53, %v4473_v53  ;;  %1792 = vmatprep.mubr.bf16.mxu0 %v4475_v47  ;;  %1905 = vmatprep.mubr.bf16.mxu1 %v4477_v36  ;;  %v4490_v59 = vpop.f32.mrf.mxu0 }
 0x1a3   :  { %5363 = vst [vmem:[#allocation11_spill] sm:$0xff] %v4479_v10  ;;  %v4492_v56 = vpop.f32.mrf.mxu1  ;;  %v4494_v1 = vpack.c.bf16 %v891_v31, %v890_v54  ;;  %v817_v9 = vadd.f32 %v801_v37, %v785_v60  ;;  %v754_v15 = vadd.f32 %v738_v30, %v722_v20  ;;  %1793 = vmatmul.mubr.bf16.gmra.mxu0 %v4479_v10  ;;  %3776 = vrsqrt.f32 %v832_v19  ;;  %v3690_v20 = vld [vmem:[#allocation2 + $0x48] ss:$16 sps:$4 sm:$0xff]   ;;  %v3698_v30 = vld [vmem:[#allocation2 + $0x2c] ss:$16 sps:$4 sm:$0xff]  }
 0x1a4   :  { %2087 = vmatprep.subr.bf16.mxu1 %v3689_v17  ;;  %v876_v14 = vmul.f32 %v3769_v46, %v4325_v13  ;;  %v3771_v29 = vpop.eup %3770  ;;  %v723_v35 = vmul.f32 %v4490_v59, %v4490_v59  ;;  %v771_v32 = vmul.f32 %v4492_v56, %v4492_v56  ;;  %1975 = vmatpush1.bf16.msra.mxu0 %v3684_v48  ;;  %v4503_v54 = vpop.f32.mrf.mxu0  ;;  %v3693_v60 = vld [vmem:[#allocation2 + $0x248] ss:$16 sps:$4 sm:$0xff]  }
 0x1a5   :  { %5364 = vst [vmem:[#allocation12_spill] sm:$0xff] %v4494_v1  ;;  %1906 = vmatmul.mubr.bf16.gmra.mxu1 %v4494_v1  ;;  %v4505_v31 = vpop.f32.mrf.mxu1  ;;  %v860_v33 = vmul.f32 %v3769_v46, %v4317_v63  ;;  %v909_v13 = vmul.f32 %v3771_v29, %v4346_v61  ;;  %v833_v37 = vadd.f32 0.0001, %v817_v9  ;;  %v786_v17 = vadd.f32 %v770_v58, %v754_v15  ;;  %v3701_v15 = vld [vmem:[#allocation2 + $0x22c] ss:$16 sps:$4 sm:$0xff]  }
 0x1a6   :  { %2088 = vmatpush1.bf16.msra.mxu1 %v3687_v41  ;;  %v739_v19 = vmul.f32 %v4503_v54, %v4503_v54  ;;  %1976 = vmatprep.subr.bf16.mxu0 %v3692_v7  ;;  %v4511_v1 = vpop.f32.mrf.mxu0  ;;  %v877_v10 = vmul.f32 %v3771_v29, %v4344_v34  ;;  %v861_v63 = vmul.f32 %v3771_v29, %v4336_v26 }
 0x1a7   :  { %v4513_v48 = vpop.f32.mrf.mxu1  ;;  %2089 = vmatprep.subr.bf16.mxu1 %v3695_v8  ;;  %v892_v61 = vmul.f32 %v3769_v46, %v4319_v3  ;;  %v893_v58 = vmul.f32 %v3771_v29, %v4338_v27  ;;  %3778 = vrsqrt.f32 %v833_v37  ;;  %v818_v41 = vadd.f32 %v802_v18, %v786_v17  ;;  %v3696_v27 = vld [vmem:[#allocation2 + $0x28] ss:$16 sps:$4 sm:$0xff]   ;;  %v3704_v17 = vld [vmem:[#allocation2 + $0xc] ss:$16 sps:$4 sm:$0xff]  }
 0x1a8   :  { %v755_v9 = vadd.f32 %v739_v19, %v723_v35  ;;  %v803_v7 = vmul.f32 %v4505_v31, %v4505_v31  ;;  %v3773_v36 = vpop.eup %3772  ;;  %v724_v47 = vmul.f32 %v4511_v1, %v4511_v1  ;;  %1977 = vmatpush1.bf16.msra.mxu0 %v3690_v20  ;;  %v4523_v8 = vpop.f32.mrf.mxu0  ;;  %v4527_v26 = vpack.c.bf16 %v877_v10, %v876_v14  ;;  %v3699_v37 = vld [vmem:[#allocation2 + $0x228] ss:$16 sps:$4 sm:$0xff]  }
 0x1a9   :  { %v4525_v34 = vpop.f32.mrf.mxu1  ;;  %v4529_v3 = vpack.c.bf16 %v909_v13, %v908_v42  ;;  %v4531_v46 = vpack.c.bf16 %v861_v63, %v860_v33  ;;  %v834_v18 = vadd.f32 0.0001, %v818_v41  ;;  %v772_v35 = vmul.f32 %v4513_v48, %v4513_v48  ;;  %1978 = vmatprep.subr.bf16.mxu0 %v3698_v30  ;;  %v3707_v13 = vld [vmem:[#allocation2 + $0x20c] ss:$16 sps:$4 sm:$0xff]  }
 0x1aa   :  { %5365 = vst [vmem:[#allocation13_spill] sm:$0xff] %v4527_v26  ;;  %v787_v29 = vadd.f32 %v771_v32, %v755_v9  ;;  %2090 = vmatpush1.bf16.msra.mxu1 %v3693_v60  ;;  %v740_v20 = vmul.f32 %v4523_v8, %v4523_v8  ;;  %v910_v10 = vmul.f32 %v3773_v36, %v4369_v62  ;;  %v4542_v14 = vpop.f32.mrf.mxu0 }
 0x1ab   :  { %5366 = vst [vmem:[#allocation14_spill] sm:$0xff] %v4529_v3  ;;  %5367 = vst [vmem:[#allocation15_spill] sm:$0xff] %v4531_v46  ;;  %v804_v42 = vmul.f32 %v4525_v34, %v4525_v34  ;;  %1802 = vmatprep.mubr.bf16.mxu0 %v4527_v26  ;;  %1915 = vmatprep.mubr.bf16.mxu1 %v4529_v3  ;;  %v4544_v32 = vpop.f32.mrf.mxu1  ;;  %v4546_v33 = vpack.c.bf16 %v893_v58, %v892_v61  ;;  %3780 = vrsqrt.f32 %v834_v18  ;;  %v3702_v58 = vld [vmem:[#allocation2 + $0x8] ss:$16 sps:$4 sm:$0xff]  }
 0x1ac   :  { %v819_v19 = vadd.f32 %v803_v7, %v787_v29  ;;  %v756_v60 = vadd.f32 %v740_v20, %v724_v47  ;;  %1803 = vmatmul.mubr.bf16.gmra.mxu0 %v4531_v46  ;;  %2091 = vmatprep.subr.bf16.mxu1 %v3701_v15  ;;  %v878_v62 = vmul.f32 %v3773_v36, %v4367_v57  ;;  %v3775_v30 = vpop.eup %3774  ;;  %v4555_v61 = vpop.f32.mrf.mxu0  ;;  %v3705_v18 = vld [vmem:[#allocation2 + $0x208] ss:$16 sps:$4 sm:$0xff]   ;;  %v3710_v20 = vld [vmem:[#allocation2 + $0x1ec] ss:$16 sps:$4 sm:$0xff]  }
 0x1ad   :  { %5368 = vst [vmem:[#allocation16_spill] sm:$0xff] %v4546_v33  ;;  %v725_v63 = vmul.f32 %v4542_v14, %v4542_v14  ;;  %v773_v41 = vmul.f32 %v4544_v32, %v4544_v32  ;;  %1916 = vmatmul.mubr.bf16.gmra.mxu1 %v4546_v33  ;;  %1979 = vmatpush1.bf16.msra.mxu0 %v3696_v27  ;;  %v4561_v29 = vpop.f32.mrf.mxu1  ;;  %v3708_v46 = vld [vmem:[#allocation2 + $0x1e8] ss:$16 sps:$4 sm:$0xff]  }
 0x1ae   :  { %v862_v47 = vmul.f32 %v3773_v36, %v4356_v49  ;;  %v911_v9 = vmul.f32 %v3775_v30, %v4401_v40  ;;  %v835_v7 = vadd.f32 0.0001, %v819_v19  ;;  %v788_v57 = vadd.f32 %v772_v35, %v756_v60  ;;  %2092 = vmatpush1.bf16.msra.mxu1 %v3699_v37  ;;  %1980 = vmatprep.subr.bf16.mxu0 %v3704_v17  ;;  %v3713_v60 = vld [vmem:[#allocation2 + $0x3ec] ss:$16 sps:$4 sm:$0xff]  }
 0x1af   :  { %v741_v15 = vmul.f32 %v4555_v61, %v4555_v61  ;;  %2093 = vmatprep.subr.bf16.mxu1 %v3707_v13  ;;  %v879_v27 = vmul.f32 %v3775_v30, %v4399_v39  ;;  %v863_v33 = vmul.f32 %v3775_v30, %v4386_v23  ;;  %v894_v49 = vmul.f32 %v3773_v36, %v4358_v50  ;;  %v3716_v36 = vld [vmem:[#allocation2 + $0x1cc] ss:$16 sps:$4 sm:$0xff]  }
 0x1b0   :  { %v895_v40 = vmul.f32 %v3775_v30, %v4388_v24  ;;  %3782 = vrsqrt.f32 %v835_v7  ;;  %v820_v35 = vadd.f32 %v804_v42, %v788_v57  ;;  %v4567_v19 = vpack.c.bf16 %v911_v9, %v910_v10  ;;  %v3777_v3 = vpop.eup %3776  ;;  %v3711_v24 = vld [vmem:[#allocation2 + $0x3e8] ss:$16 sps:$4 sm:$0xff]   ;;  %v3719_v10 = vld [vmem:[#allocation2 + $0x3cc] ss:$16 sps:$4 sm:$0xff]  }
 0x1b1   :  { %v757_v37 = vadd.f32 %v741_v15, %v725_v63  ;;  %1981 = vmatpush1.bf16.msra.mxu0 %v3702_v58  ;;  %v4569_v17 = vpack.c.bf16 %v879_v27, %v878_v62  ;;  %v4571_v13 = vpack.c.bf16 %v863_v33, %v862_v47  ;;  %v805_v50 = vmul.f32 %v4561_v29, %v4561_v29  ;;  %v3714_v30 = vld [vmem:[#allocation2 + $0x1c8] ss:$16 sps:$4 sm:$0xff]   ;;  %v3725_v15 = vld [vmem:[#allocation2 + $0x3ac] ss:$16 sps:$4 sm:$0xff]  }
 0x1b2   :  { %v4573_v39 = vpack.c.bf16 %v895_v40, %v894_v49  ;;  %v836_v23 = vadd.f32 0.0001, %v820_v35  ;;  %2094 = vmatpush1.bf16.msra.mxu1 %v3705_v18  ;;  %1925 = vmatprep.mubr.bf16.mxu1 %v4567_v19  ;;  %v912_v62 = vmul.f32 %v3777_v3, %v4421_v21  ;;  %v880_v63 = vmul.f32 %v3777_v3, %v4419_v16  ;;  %v3722_v21 = vld [vmem:[#allocation2 + $0x1ac] ss:$16 sps:$4 sm:$0xff]   ;;  %v3720_v18 = vld [vmem:[#allocation2 + $0x1a8] ss:$16 sps:$4 sm:$0xff]  }
 0x1b3   :  { %v789_v26 = vadd.f32 %v773_v41, %v757_v37  ;;  %1812 = vmatprep.mubr.bf16.mxu0 %v4569_v17  ;;  %1982 = vmatprep.subr.bf16.mxu0 %v3710_v20  ;;  %v864_v41 = vmul.f32 %v3777_v3, %v4407_v6  ;;  %v896_v57 = vmul.f32 %v3777_v3, %v4409_v51  ;;  %v3728_v51 = vld [vmem:[#allocation2 + $0x18c] ss:$16 sps:$4 sm:$0xff]   ;;  %v3726_v49 = vld [vmem:[#allocation2 + $0x188] ss:$16 sps:$4 sm:$0xff]  }
 0x1b4   :  { %1813 = vmatmul.mubr.bf16.gmra.mxu0 %v4571_v13  ;;  %2095 = vmatprep.subr.bf16.mxu1 %v3713_v60  ;;  %v3779_v33 = vpop.eup %3778  ;;  %3784 = vrsqrt.f32 %v836_v23  ;;  %v3729_v60 = vld [vmem:[#allocation2 + $0x388] ss:$16 sps:$4 sm:$0xff]  }
 0x1b5   :  { %v821_v42 = vadd.f32 %v805_v50, %v789_v26  ;;  %1926 = vmatmul.mubr.bf16.gmra.mxu1 %v4573_v39  ;;  %1983 = vmatpush2.bf16.msra.mxu0 %v3708_v46  ;;  %v913_v58 = vmul.f32 %v3779_v33, %v4453_v11  ;;  %v3717_v26 = vld [vmem:[#allocation2 + $0x3c8] ss:$16 sps:$4 sm:$0xff]   ;;  %v881_v9 = vmul.f32 %v3779_v33, %v4451_v52 }
 0x1b6   :  { %2096 = vmatpush2.bf16.msra.mxu1 %v3711_v24  ;;  %1984 = vmatprep.subr.bf16.mxu0 %v3716_v36  ;;  %v865_v7 = vmul.f32 %v3779_v33, %v4438_v38  ;;  %v897_v46 = vmul.f32 %v3779_v33, %v4440_v43  ;;  %v3723_v38 = vld [vmem:[#allocation2 + $0x3a8] ss:$16 sps:$4 sm:$0xff]   ;;  %v3731_v43 = vld [vmem:[#allocation2 + $0x38c] ss:$16 sps:$4 sm:$0xff]  }
 0x1b7   :  { %v837_v47 = vadd.f32 0.0001, %v821_v42  ;;  %2097 = vmatprep.subr.bf16.mxu1 %v3719_v10  ;;  %v4589_v16 = vpack.c.bf16 %v881_v9, %v880_v63  ;;  %v4591_v6 = vpack.c.bf16 %v913_v58, %v912_v62  ;;  %v3734_v24 = vld [vmem:[#allocation2 + $0x16c] ss:$16 sps:$4 sm:$0xff]   ;;  %v3732_v42 = vld [vmem:[#allocation2 + $0x168] ss:$16 sps:$4 sm:$0xff]  }
 0x1b8   :  { %v4593_v11 = vpack.c.bf16 %v865_v7, %v864_v41  ;;  %v4595_v27 = vpack.c.bf16 %v897_v46, %v896_v57  ;;  %v3781_v52 = vpop.eup %3780  ;;  %v3740_v62 = vld [vmem:[#allocation2 + $0x14c] ss:$16 sps:$4 sm:$0xff]   ;;  %v3738_v63 = vld [vmem:[#allocation2 + $0x148] ss:$16 sps:$4 sm:$0xff]  }
 0x1b9   :  { %3786 = vrsqrt.f32 %v837_v47  ;;  %1985 = vmatpush2.bf16.msra.mxu0 %v3714_v30  ;;  %1822 = vmatprep.mubr.bf16.mxu0 %v4589_v16  ;;  %v914_v20 = vmul.f32 %v3781_v52, %v4473_v53  ;;  %v882_v40 = vmul.f32 %v3781_v52, %v4471_v45  ;;  %v866_v35 = vmul.f32 %v3781_v52, %v4459_v22 }
 0x1ba   :  { %2098 = vmatpush2.bf16.msra.mxu1 %v3717_v26  ;;  %1935 = vmatprep.mubr.bf16.mxu1 %v4591_v6  ;;  %v898_v53 = vmul.f32 %v3781_v52, %v4461_v0  ;;  %v3743_v0 = vld [vmem:[#allocation2 + $0x34c] ss:$16 sps:$4 sm:$0xff]   ;;  %v3741_v26 = vld [vmem:[#allocation2 + $0x348] ss:$16 sps:$4 sm:$0xff]  }
 0x1bb   :  { %1986 = vmatprep.subr.bf16.mxu0 %v3722_v21  ;;  %2099 = vmatprep.subr.bf16.mxu1 %v3725_v15  ;;  %v3746_v21 = vld [vmem:[#allocation2 + $0x12c] ss:$16 sps:$4 sm:$0xff]   ;;  %v3744_v15 = vld [vmem:[#allocation2 + $0x128] ss:$16 sps:$4 sm:$0xff]  }
 0x1bc   :  { %1823 = vmatmul.mubr.bf16.gmra.mxu0 %v4593_v11  ;;  %v3753_v52 = vld [vmem:[#allocation2 + $0x308] ss:$16 sps:$4 sm:$0xff]  }
 0x1bd   :  { %v3783_v3 = vpop.eup %3782  ;;  %1936 = vmatmul.mubr.bf16.gmra.mxu1 %v4595_v27  ;;  %1987 = vmatpush2.bf16.msra.mxu0 %v3720_v18 }
 0x1be   :  { %v915_v37 = vmul.f32 %v3783_v3, %v4505_v31  ;;  %2100 = vmatpush2.bf16.msra.mxu1 %v3723_v38  ;;  %1988 = vmatprep.subr.bf16.mxu0 %v3728_v51  ;;  %v883_v23 = vmul.f32 %v3783_v3, %v4503_v54  ;;  %v867_v50 = vmul.f32 %v3783_v3, %v4490_v59  ;;  %v3737_v31 = vld [vmem:[#allocation2 + $0x36c] ss:$16 sps:$4 sm:$0xff]   ;;  %v3735_v59 = vld [vmem:[#allocation2 + $0x368] ss:$16 sps:$4 sm:$0xff]  }
 0x1bf   :  { %2101 = vmatprep.subr.bf16.mxu1 %v3731_v43  ;;  %v899_v36 = vmul.f32 %v3783_v3, %v4492_v56  ;;  %v5370_v38 = vld [vmem:[#allocation10_spill] sm:$0xff]  ;;  %v5372_v51 = vld [vmem:[#allocation12_spill] sm:$0xff]  ;;  %v5373_v43 = vld [vmem:[#allocation13_spill] sm:$0xff] }
 0x1c0   :  { %v4609_v10 = vpack.c.bf16 %v915_v37, %v914_v20  ;;  %v4611_v45 = vpack.c.bf16 %v883_v23, %v882_v40  ;;  %v4613_v22 = vpack.c.bf16 %v867_v50, %v866_v35  ;;  %v2477_v3 = vld [vmem:[#allocation4 + $0x68] sm:$0xff]  ;;  %v2492_v20 = vld [vmem:[#allocation4 + $0xe0] sm:$0xff]  ;;  %v2491_v37 = vld [vmem:[#allocation4 + $0xd8] sm:$0xff] }
 0x1c1   :  { %1989 = vmatpush2.bf16.msra.mxu0 %v3726_v49  ;;  %v4615_v33 = vpack.c.bf16 %v899_v36, %v898_v53  ;;  %v3785_v54 = vpop.eup %3784  ;;  %v2476_v49 = vld [vmem:[#allocation4 + $0x60] sm:$0xff]  ;;  %v2523_v23 = vld [vmem:[#allocation4 + $0x1d8] sm:$0xff]  ;;  %v2474_v53 = vld [vmem:[#allocation4 + $0x50] sm:$0xff] }
 0x1c2   :  { %2102 = vmatpush2.bf16.msra.mxu1 %v3729_v60  ;;  %1832 = vmatprep.mubr.bf16.mxu0 %v4611_v45  ;;  %v916_v30 = vmul.f32 %v3785_v54, %v4525_v34  ;;  %v884_v41 = vmul.f32 %v3785_v54, %v4523_v8  ;;  %v868_v58 = vmul.f32 %v3785_v54, %v4511_v1  ;;  %v2524_v40 = vld [vmem:[#allocation4 + $0x1e0] sm:$0xff]  ;;  %v2475_v60 = vld [vmem:[#allocation4 + $0x58] sm:$0xff]  ;;  %v2522_v36 = vld [vmem:[#allocation4 + $0x1d0] sm:$0xff] }
 0x1c3   :  { %1945 = vmatprep.mubr.bf16.mxu1 %v4609_v10  ;;  %1990 = vmatprep.subr.bf16.mxu0 %v3734_v24  ;;  %v900_v34 = vmul.f32 %v3785_v54, %v4513_v48  ;;  %v3752_v48 = vld [vmem:[#allocation2 + $0x10c] ss:$16 sps:$4 sm:$0xff]   ;;  %v2508_v35 = vld [vmem:[#allocation4 + $0x160] sm:$0xff]  ;;  %v2490_v24 = vld [vmem:[#allocation4 + $0xd0] sm:$0xff] }
 0x1c4   :  { %1833 = vmatmul.mubr.bf16.gmra.mxu0 %v4613_v22  ;;  %2103 = vmatprep.subr.bf16.mxu1 %v3737_v31  ;;  %v2507_v50 = vld [vmem:[#allocation4 + $0x158] sm:$0xff]  ;;  %v2521_v31 = vld [vmem:[#allocation4 + $0x1c8] sm:$0xff]  ;;  %v2472_v54 = vld [vmem:[#allocation4 + $0x40] sm:$0xff] }
 0x1c5   :  { %1946 = vmatmul.mubr.bf16.gmra.mxu1 %v4615_v33  ;;  %1991 = vmatpush2.bf16.msra.mxu0 %v3732_v42  ;;  %v2505_v42 = vld [vmem:[#allocation4 + $0x148] sm:$0xff] }
 0x1c6   :  { %v3787_v56 = vpop.eup %3786  ;;  %2104 = vmatpush2.bf16.msra.mxu1 %v3735_v59  ;;  %1992 = vmatprep.subr.bf16.mxu0 %v3740_v62  ;;  %v2520_v59 = vld [vmem:[#allocation4 + $0x1c0] sm:$0xff] }
 0x1c7   :  { %v917_v47 = vmul.f32 %v3787_v56, %v4561_v29  ;;  %v885_v9 = vmul.f32 %v3787_v56, %v4555_v61  ;;  %v869_v7 = vmul.f32 %v3787_v56, %v4542_v14  ;;  %2105 = vmatprep.subr.bf16.mxu1 %v3743_v0  ;;  %v901_v57 = vmul.f32 %v3787_v56, %v4544_v32  ;;  %v3749_v29 = vld [vmem:[#allocation2 + $0x32c] ss:$16 sps:$4 sm:$0xff]   ;;  %v3747_v14 = vld [vmem:[#allocation2 + $0x328] ss:$16 sps:$4 sm:$0xff]   ;;  %v2504_v62 = vld [vmem:[#allocation4 + $0x140] sm:$0xff] }
 0x1c8   :  { %v3755_v32 = vld [vmem:[#allocation2 + $0x30c] ss:$16 sps:$4 sm:$0xff]   ;;  %v3750_v61 = vld [vmem:[#allocation2 + $0x108] ss:$16 sps:$4 sm:$0xff]  }
 0x1c9   :  { %v4629_v46 = vpack.c.bf16 %v917_v47, %v916_v30  ;;  %v4631_v8 = vpack.c.bf16 %v885_v9, %v884_v41  ;;  %v4633_v1 = vpack.c.bf16 %v869_v7, %v868_v58  ;;  %1993 = vmatpush2.bf16.msra.mxu0 %v3738_v63  ;;  %v4635_v18 = vpack.c.bf16 %v901_v57, %v900_v34  ;;  %v2487_v0 = vld [vmem:[#allocation4 + $0xb8] sm:$0xff]  ;;  %v2486_v41 = vld [vmem:[#allocation4 + $0xb0] sm:$0xff]  ;;  %v2485_v9 = vld [vmem:[#allocation4 + $0xa8] sm:$0xff] }
 0x1ca   :  { %2106 = vmatpush2.bf16.msra.mxu1 %v3741_v26  ;;  %1994 = vmatprep.subr.bf16.mxu0 %v3746_v21  ;;  %v2471_v56 = vld [vmem:[#allocation4 + $0x38] sm:$0xff]  ;;  %v2518_v58 = vld [vmem:[#allocation4 + $0x1b0] sm:$0xff]  ;;  %v2517_v7 = vld [vmem:[#allocation4 + $0x1a8] sm:$0xff] }
 0x1cb   :  { %1842 = vmatprep.mubr.bf16.mxu0 %v4631_v8  ;;  %1955 = vmatprep.mubr.bf16.mxu1 %v4629_v46  ;;  %v2519_v30 = vld [vmem:[#allocation4 + $0x1b8] sm:$0xff]  ;;  %v2470_v47 = vld [vmem:[#allocation4 + $0x30] sm:$0xff]  ;;  %v2469_v21 = vld [vmem:[#allocation4 + $0x28] sm:$0xff] }
 0x1cc   :  { %1843 = vmatmul.mubr.bf16.gmra.mxu0 %v4633_v1  ;;  %2107 = vmatprep.subr.bf16.mxu1 %v3749_v29  ;;  %v2503_v63 = vld [vmem:[#allocation4 + $0x138] sm:$0xff]  ;;  %v2502_v26 = vld [vmem:[#allocation4 + $0x130] sm:$0xff]  ;;  %v2501_v34 = vld [vmem:[#allocation4 + $0x128] sm:$0xff] }
 0x1cd   :  { %1956 = vmatmul.mubr.bf16.gmra.mxu1 %v4635_v18  ;;  %1995 = vmatpush2.bf16.msra.mxu0 %v3744_v15  ;;  %v2484_v57 = vld [vmem:[#allocation4 + $0xa0] sm:$0xff]  ;;  %v2483_v29 = vld [vmem:[#allocation4 + $0x98] sm:$0xff] }
 0x1ce   :  { %1998 = vmatprep.mubr.bf16.mxu0 %v4371_v4  ;;  %2108 = vmatpush2.bf16.msra.mxu1 %v3747_v14  ;;  %v5369_v4 = vld [vmem:[#allocation9_spill] sm:$0xff]  ;;  %v2515_v15 = vld [vmem:[#allocation4 + $0x198] sm:$0xff] }
 0x1cf   :  { %2111 = vmatprep.mubr.bf16.mxu1 %v4373_v5  ;;  %1996 = vmatprep.subr.bf16.mxu0 %v3752_v48  ;;  %v5371_v5 = vld [vmem:[#allocation11_spill] sm:$0xff]  ;;  %v2499_v14 = vld [vmem:[#allocation4 + $0x118] sm:$0xff] }
 0x1d0   :  { %2109 = vmatprep.subr.bf16.mxu1 %v3755_v32  ;;  %v2482_v48 = vld [vmem:[#allocation4 + $0x90] sm:$0xff] }
 0x1d1   :  { %1997 = vmatpush2.bf16.msra.mxu0 %v3750_v61  ;;  %v2514_v32 = vld [vmem:[#allocation4 + $0x190] sm:$0xff] }
 0x1d2   :  { %2110 = vmatpush2.bf16.msra.mxu1 %v3753_v52  ;;  %v2466_v61 = vld [vmem:[#allocation4 + $0x10] sm:$0xff] }
 0x1d3   :  { %v2498_v52 = vld [vmem:[#allocation4 + $0x110] sm:$0xff] }
 0x1d4   :  { %1999 = vmatmul.mubr.bf16.vlgmr.msra.gmra.mxu0 %v4375_v2  ;;  %v5374_v2 = vld [vmem:[#allocation14_spill] sm:$0xff] }
 0x1d5   :  { %2112 = vmatmul.mubr.bf16.vlgmr.msra.gmra.mxu1 %v4390_v28  ;;  %2008 = vmatprep.mubr.bf16.mxu0 %v4423_v25  ;;  %v5375_v28 = vld [vmem:[#allocation15_spill] sm:$0xff]  ;;  %v5376_v25 = vld [vmem:[#allocation16_spill] sm:$0xff] }
 0x1d6   :  { %2121 = vmatprep.mubr.bf16.mxu1 %v4425_v12  ;;  %v2495_v12 = vld [vmem:[#allocation4 + $0xf8] sm:$0xff] }
 0x1d7   :  { %3225 = vmatprep.subr.mxu0 %v2495_v12  ;;  %v5377_v12 = vlaneseq }
 0x1dc   :  { %2009 = vmatmul.mubr.bf16.gmra.mxu0 %v4427_v55  ;;  %v2479_v55 = vld [vmem:[#allocation4 + $0x78] sm:$0xff] }
 0x1dd   :  { %2122 = vmatmul.mubr.bf16.gmra.mxu1 %v4442_v44  ;;  %2018 = vmatprep.mubr.bf16.mxu0 %v5369_v4  ;;  %v2527_v44 = vld [vmem:[#allocation4 + $0x1f8] sm:$0xff]  ;;  %v2481_v4 = vld [vmem:[#allocation4 + $0x88] sm:$0xff] }
 0x1de   :  { %2131 = vmatprep.mubr.bf16.mxu1 %v5370_v38  ;;  %3305 = vmatprep.subr.mxu1 %v2527_v44  ;;  %v2513_v38 = vld [vmem:[#allocation4 + $0x188] sm:$0xff] }
 0x1df   :  { %3226 = vmatpush3.msra.mxu0 %v2479_v55  ;;  %v4674_v55 = vshrl.u32 %v5377_v12, 7 }
 0x1e4   :  { %2019 = vmatmul.mubr.bf16.gmra.mxu0 %v5371_v5  ;;  %v2465_v5 = vld [vmem:[#allocation4 + $0x8] sm:$0xff] }
 0x1e5   :  { %2132 = vmatmul.mubr.bf16.gmra.mxu1 %v5372_v51  ;;  %2028 = vmatprep.mubr.bf16.mxu0 %v5373_v43  ;;  %v2497_v51 = vld [vmem:[#allocation4 + $0x108] sm:$0xff]  ;;  %v2480_v43 = vld [vmem:[#allocation4 + $0x80] sm:$0xff] }
 0x1e6   :  { %2141 = vmatprep.mubr.bf16.mxu1 %v5374_v2  ;;  %v2512_v2 = vld [vmem:[#allocation4 + $0x180] sm:$0xff] }
 0x1ec   :  { %2029 = vmatmul.mubr.bf16.gmra.mxu0 %v5375_v28  ;;  %v2464_v28 = vld [vmem:[#allocation4] sm:$0xff] }
 0x1ed   :  { %2142 = vmatmul.mubr.bf16.gmra.mxu1 %v5376_v25  ;;  %2038 = vmatprep.mubr.bf16.mxu0 %v4569_v17  ;;  %v2494_v17 = vld [vmem:[#allocation4 + $0xf0] sm:$0xff]  ;;  %v2496_v25 = vld [vmem:[#allocation4 + $0x100] sm:$0xff] }
 0x1ee   :  { %2151 = vmatprep.mubr.bf16.mxu1 %v4567_v19  ;;  %v2511_v19 = vld [vmem:[#allocation4 + $0x178] sm:$0xff]  ;;  %3227 = vmatprep.subr.mxu0 %v2494_v17 }
 0x1ef   :  { %3306 = vmatpush3.msra.mxu1 %v2511_v19 }
 0x1f4   :  { %2039 = vmatmul.mubr.bf16.gmra.mxu0 %v4571_v13  ;;  %v2478_v13 = vld [vmem:[#allocation4 + $0x70] sm:$0xff] }
 0x1f5   :  { %2152 = vmatmul.mubr.bf16.gmra.mxu1 %v4573_v39  ;;  %2048 = vmatprep.mubr.bf16.mxu0 %v4589_v16  ;;  %v2526_v39 = vld [vmem:[#allocation4 + $0x1f0] sm:$0xff] }
 0x1f6   :  { %2161 = vmatprep.mubr.bf16.mxu1 %v4591_v6  ;;  %3307 = vmatprep.subr.mxu1 %v2526_v39  ;;  %v2510_v16 = vld [vmem:[#allocation4 + $0x170] sm:$0xff]  ;;  %v2493_v6 = vld [vmem:[#allocation4 + $0xe8] sm:$0xff] }
 0x1f7   :  { %3228 = vmatpush3.msra.mxu0 %v2478_v13  ;;  %3308 = vmatpush3.msra.mxu1 %v2510_v16  ;;  %v1082_v13 = vsub.s32 0, %v4674_v55  ;;  %v4688_v16 = vld [vmem:[%s5328_s4] sm:$0xf] }
 0x1f8   :  { %3229 = vmatprep.subr.mxu0 %v2493_v6 }
 0x1f9   :  { %3230 = vmatpush3.msra.mxu0 %v2477_v3 }
 0x1fa   :  { %3231 = vmatprep.subr.mxu0 %v2492_v20 }
 0x1fb   :  { %3232 = vmatpush3.msra.mxu0 %v2476_v49 }
 0x1fc   :  { %2049 = vmatmul.mubr.bf16.gmra.mxu0 %v4593_v11  ;;  %v2525_v11 = vld [vmem:[#allocation4 + $0x1e8] sm:$0xff]  ;;  %3233 = vmatprep.subr.mxu0 %v2491_v37 }
 0x1fd   :  { %2162 = vmatmul.mubr.bf16.gmra.mxu1 %v4595_v27  ;;  %2058 = vmatprep.mubr.bf16.mxu0 %v4611_v45  ;;  %v2509_v27 = vld [vmem:[#allocation4 + $0x168] sm:$0xff] }
 0x1fe   :  { %2171 = vmatprep.mubr.bf16.mxu1 %v4609_v10  ;;  %3309 = vmatprep.subr.mxu1 %v2525_v11  ;;  %v2506_v10 = vld [vmem:[#allocation4 + $0x150] sm:$0xff]  ;;  %v2489_v45 = vld [vmem:[#allocation4 + $0xc8] sm:$0xff] }
 0x1ff   :  { %3310 = vmatpush3.msra.mxu1 %v2509_v27  ;;  %3234 = vmatpush3.msra.mxu0 %v2475_v60  ;;  %v4697_v27 = vrot.slane %v4688_v16, %v1082_v13 }
 0x200   :  { %3311 = vmatprep.subr.mxu1 %v2524_v40  ;;  %3235 = vmatprep.subr.mxu0 %v2490_v24  ;;  %v1086_v40 = vsub.s32 1, %v4674_v55 }
 0x201   :  { %3312 = vmatpush3.msra.mxu1 %v2508_v35  ;;  %3236 = vmatpush3.msra.mxu0 %v2474_v53 }
 0x202   :  { %3313 = vmatprep.subr.mxu1 %v2523_v23  ;;  %3237 = vmatprep.subr.mxu0 %v2489_v45  ;;  %v4710_v53 = vrot.slane %v4688_v16, %v1086_v40 }
 0x203   :  { %3314 = vmatpush3.msra.mxu1 %v2507_v50 }
 0x204   :  { %2059 = vmatmul.mubr.bf16.gmra.mxu0 %v4613_v22  ;;  %3315 = vmatprep.subr.mxu1 %v2522_v36  ;;  %v2473_v22 = vld [vmem:[#allocation4 + $0x48] sm:$0xff] }
 0x205   :  { %2172 = vmatmul.mubr.bf16.gmra.mxu1 %v4615_v33  ;;  %2068 = vmatprep.mubr.bf16.mxu0 %v4631_v8  ;;  %v2488_v33 = vld [vmem:[#allocation4 + $0xc0] sm:$0xff] }
 0x206   :  { %2181 = vmatprep.mubr.bf16.mxu1 %v4629_v46  ;;  %3316 = vmatpush3.msra.mxu1 %v2506_v10  ;;  %v2516_v46 = vld [vmem:[#allocation4 + $0x1a0] sm:$0xff] }
 0x207   :  { %3238 = vmatpush3.msra.mxu0 %v2473_v22  ;;  %3317 = vmatprep.subr.mxu1 %v2521_v31  ;;  %v2468_v8 = vld [vmem:[#allocation4 + $0x20] sm:$0xff] }
 0x208   :  { %3318 = vmatpush3.msra.mxu1 %v2505_v42  ;;  %3239 = vmatprep.subr.mxu0 %v2488_v33 }
 0x209   :  { %3240 = vmatpush3.msra.mxu0 %v2472_v54  ;;  %3319 = vmatprep.subr.mxu1 %v2520_v59 }
 0x20a   :  { %3320 = vmatpush3.msra.mxu1 %v2504_v62  ;;  %3241 = vmatprep.subr.mxu0 %v2487_v0 }
 0x20b   :  { %3242 = vmatpush3.msra.mxu0 %v2471_v56  ;;  %3321 = vmatprep.subr.mxu1 %v2519_v30 }
 0x20c   :  { %2069 = vmatmul.mubr.bf16.gmra.mxu0 %v4633_v1  ;;  %3322 = vmatpush3.msra.mxu1 %v2503_v63  ;;  %v2500_v1 = vld [vmem:[#allocation4 + $0x120] sm:$0xff] }
 0x20d   :  { %2182 = vmatmul.mubr.bf16.gmra.mxu1 %v4635_v18  ;;  %3243 = vmatprep.subr.mxu0 %v2486_v41  ;;  %v2467_v18 = vld [vmem:[#allocation4 + $0x18] sm:$0xff] }
 0x20e   :  { %3323 = vmatprep.subr.mxu1 %v2518_v58  ;;  %3244 = vmatpush3.msra.mxu0 %v2470_v47 }
 0x20f   :  { %3324 = vmatpush3.msra.mxu1 %v2502_v26  ;;  %3245 = vmatprep.subr.mxu0 %v2485_v9 }
 0x210   :  { %3325 = vmatprep.subr.mxu1 %v2517_v7  ;;  %3246 = vmatpush3.msra.mxu0 %v2469_v21 }
 0x211   :  { %3326 = vmatpush3.msra.mxu1 %v2501_v34  ;;  %3247 = vmatprep.subr.mxu0 %v2484_v57 }
 0x212   :  { %3327 = vmatprep.subr.mxu1 %v2516_v46  ;;  %3248 = vmatpush3.msra.mxu0 %v2468_v8 }
 0x213   :  { %3328 = vmatpush3.msra.mxu1 %v2500_v1  ;;  %3249 = vmatprep.subr.mxu0 %v2483_v29 }
 0x214   :  { %3329 = vmatprep.subr.mxu1 %v2515_v15  ;;  %3250 = vmatpush3.msra.mxu0 %v2467_v18 }
 0x215   :  { %3330 = vmatpush3.msra.mxu1 %v2499_v14  ;;  %3251 = vmatprep.subr.mxu0 %v2482_v48 }
 0x216   :  { %3331 = vmatprep.subr.mxu1 %v2514_v32  ;;  %3252 = vmatpush3.msra.mxu0 %v2466_v61 }
 0x217   :  { %3332 = vmatpush3.msra.mxu1 %v2498_v52  ;;  %3253 = vmatprep.subr.mxu0 %v2481_v4 }
 0x218   :  { %3333 = vmatprep.subr.mxu1 %v2513_v38  ;;  %3254 = vmatpush3.msra.mxu0 %v2465_v5 }
 0x219   :  { %3334 = vmatpush3.msra.mxu1 %v2497_v51  ;;  %3255 = vmatprep.subr.mxu0 %v2480_v43 }
 0x21a   :  { %3335 = vmatprep.subr.mxu1 %v2512_v2  ;;  %3256 = vmatpush3.msra.mxu0 %v2464_v28 }
 0x21b   :  { %3336 = vmatpush3.msra.mxu1 %v2496_v25 }
 0x253   :  { %v4676_v44 = vpop.f32.mrf.mxu0 }
 0x254   :  { %v4678_v19 = vpop.f32.mrf.mxu1 }
 0x255   :  { %v4680_v17 = vpop.f32.mrf.mxu0 }
 0x256   :  { %v4683_v39 = vpop.f32.mrf.mxu1 }
 0x257   :  { %v4690_v6 = vpop.f32.mrf.mxu0 }
 0x258   :  { %v4692_v3 = vpop.f32.mrf.mxu1 }
 0x259   :  { %v4694_v11 = vpop.f32.mrf.mxu0 }
 0x25a   :  { %v4699_v20 = vpop.f32.mrf.mxu1 }
 0x25b   :  { %v1784_v49 = vpop.f32.mrf.mxu0 }
 0x25c   :  { %v1785_v35 = vadd.f32 %v1784_v49, %v4697_v27  ;;  %v1897_v37 = vpop.f32.mrf.mxu1 }
 0x25d   :  { %v4703_v60 = vpop.f32.mrf.mxu0 }
 0x25e   :  { %v4705_v23 = vadd.f32 %v1897_v37, %v1785_v35  ;;  %v4707_v50 = vpop.f32.mrf.mxu1 }
 0x25f   :  { %v1788_v24 = vpop.f32.mrf.mxu0 }
 0x260   :  { %v1789_v36 = vadd.f32 %v1788_v24, %v4697_v27  ;;  %v1901_v10 = vpop.f32.mrf.mxu1 }
 0x261   :  { %v1790_v45 = vpop.f32.mrf.mxu0 }
 0x262   :  { %v4713_v22 = vadd.f32 %v1901_v10, %v1789_v36  ;;  %v1791_v31 = vadd.f32 %v1790_v45, %v4710_v53  ;;  %v1903_v42 = vpop.f32.mrf.mxu1 }
 0x263   :  { %v1794_v33 = vpop.f32.mrf.mxu0 }
 0x264   :  { %v4716_v54 = vadd.f32 %v1903_v42, %v1791_v31  ;;  %v1795_v59 = vadd.f32 %v1794_v33, %v4697_v27  ;;  %v2195_v56 = vmul.f32 %v4713_v22, %v4713_v22 }
 0x265   :  { %v1907_v62 = vpop.f32.mrf.mxu1  ;;  %v1796_v0 = vpop.f32.mrf.mxu0 }
 0x266   :  { %v2211_v30 = vmul.f32 %v4716_v54, %v4716_v54  ;;  %v4723_v63 = vadd.f32 %v1907_v62, %v1795_v59  ;;  %v1797_v41 = vadd.f32 %v1796_v0, %v4710_v53 }
 0x267   :  { %v1909_v58 = vpop.f32.mrf.mxu1  ;;  %v1798_v47 = vpop.f32.mrf.mxu0 }
 0x268   :  { %v4726_v26 = vadd.f32 %v2211_v30, %v2195_v56  ;;  %v4728_v9 = vadd.f32 %v1909_v58, %v1797_v41  ;;  %v1799_v7 = vadd.f32 %v1798_v47, %v4697_v27  ;;  %v2196_v57 = vmul.f32 %v4723_v63, %v4723_v63 }
 0x269   :  { %v1911_v21 = vpop.f32.mrf.mxu1  ;;  %v1800_v34 = vpop.f32.mrf.mxu0 }
 0x26a   :  { %v2212_v46 = vmul.f32 %v4728_v9, %v4728_v9  ;;  %v4735_v8 = vadd.f32 %v1911_v21, %v1799_v7  ;;  %v1801_v1 = vadd.f32 %v1800_v34, %v4710_v53 }
 0x26b   :  { %v1913_v29 = vpop.f32.mrf.mxu1 }
 0x26c   :  { %v1804_v15 = vpop.f32.mrf.mxu0  ;;  %v4738_v18 = vadd.f32 %v2212_v46, %v2196_v57  ;;  %v4740_v14 = vadd.f32 %v1913_v29, %v1801_v1  ;;  %v2197_v52 = vmul.f32 %v4735_v8, %v4735_v8  ;;  %v4781_v46 = vld [vmem:[#allocation6 + $0x78] sm:$0xff] }
 0x26d   :  { %v1805_v48 = vadd.f32 %v1804_v15, %v4697_v27  ;;  %v1917_v32 = vpop.f32.mrf.mxu1  ;;  %3417 = vmatprep.subr.mxu0 %v4781_v46  ;;  %3473 = vmatprep.subr.mxu1 %v4781_v46 }
 0x26e   :  { %v1806_v61 = vpop.f32.mrf.mxu0  ;;  %v2213_v4 = vmul.f32 %v4740_v14, %v4740_v14 }
 0x26f   :  { %v4747_v38 = vadd.f32 %v1917_v32, %v1805_v48  ;;  %v1807_v5 = vadd.f32 %v1806_v61, %v4710_v53  ;;  %v1919_v51 = vpop.f32.mrf.mxu1 }
 0x270   :  { %v1808_v43 = vpop.f32.mrf.mxu0  ;;  %v4750_v2 = vadd.f32 %v2213_v4, %v2197_v52 }
 0x271   :  { %v4752_v28 = vadd.f32 %v1919_v51, %v1807_v5  ;;  %v1809_v25 = vadd.f32 %v1808_v43, %v4697_v27  ;;  %v1921_v12 = vpop.f32.mrf.mxu1  ;;  %v2198_v49 = vmul.f32 %v4747_v38, %v4747_v38 }
 0x272   :  { %v1810_v13 = vpop.f32.mrf.mxu0 }
 0x273   :  { %v2214_v40 = vmul.f32 %v4752_v28, %v4752_v28  ;;  %v4759_v35 = vadd.f32 %v1921_v12, %v1809_v25  ;;  %v1811_v37 = vadd.f32 %v1810_v13, %v4710_v53  ;;  %v1923_v24 = vpop.f32.mrf.mxu1 }
 0x274   :  { %v1814_v36 = vpop.f32.mrf.mxu0 }
 0x275   :  { %v4762_v10 = vadd.f32 %v2214_v40, %v2198_v49  ;;  %v4764_v45 = vadd.f32 %v1923_v24, %v1811_v37  ;;  %v1815_v31 = vadd.f32 %v1814_v36, %v4697_v27  ;;  %v1927_v42 = vpop.f32.mrf.mxu1  ;;  %v2199_v59 = vmul.f32 %v4759_v35, %v4759_v35 }
 0x276   :  { %v1816_v33 = vpop.f32.mrf.mxu0 }
 0x277   :  { %v2215_v62 = vmul.f32 %v4764_v45, %v4764_v45  ;;  %v4771_v0 = vadd.f32 %v1927_v42, %v1815_v31  ;;  %v1817_v56 = vadd.f32 %v1816_v33, %v4710_v53  ;;  %v1929_v30 = vpop.f32.mrf.mxu1 }
 0x278   :  { %v1818_v41 = vpop.f32.mrf.mxu0 }
 0x279   :  { %v4774_v58 = vadd.f32 %v2215_v62, %v2199_v59  ;;  %v4776_v47 = vadd.f32 %v1929_v30, %v1817_v56  ;;  %v1819_v7 = vadd.f32 %v1818_v41, %v4697_v27  ;;  %v1931_v21 = vpop.f32.mrf.mxu1  ;;  %v2200_v34 = vmul.f32 %v4771_v0, %v4771_v0 }
 0x27a   :  { %v1820_v57 = vpop.f32.mrf.mxu0 }
 0x27b   :  { %v2216_v1 = vmul.f32 %v4776_v47, %v4776_v47  ;;  %v4785_v29 = vadd.f32 %v1931_v21, %v1819_v7  ;;  %v1821_v15 = vadd.f32 %v1820_v57, %v4710_v53  ;;  %v1933_v48 = vpop.f32.mrf.mxu1 }
 0x27c   :  { %v1824_v32 = vpop.f32.mrf.mxu0 }
 0x27d   :  { %5378 = vst [vmem:[#allocation9_spill] sm:$0xff] %v4785_v29  ;;  %v4790_v61 = vadd.f32 %v2216_v1, %v2200_v34  ;;  %v4792_v52 = vadd.f32 %v1933_v48, %v1821_v15  ;;  %v1825_v4 = vadd.f32 %v1824_v32, %v4697_v27  ;;  %v1937_v5 = vpop.f32.mrf.mxu1  ;;  %v2201_v43 = vmul.f32 %v4785_v29, %v4785_v29 }
 0x27e   :  { %v1826_v51 = vpop.f32.mrf.mxu0 }
 0x27f   :  { %5379 = vst [vmem:[#allocation10_spill] sm:$0xff] %v4792_v52  ;;  %v2217_v25 = vmul.f32 %v4792_v52, %v4792_v52  ;;  %v4799_v12 = vadd.f32 %v1937_v5, %v1825_v4  ;;  %v1827_v13 = vadd.f32 %v1826_v51, %v4710_v53  ;;  %v1939_v49 = vpop.f32.mrf.mxu1 }
 0x280   :  { %v1828_v40 = vpop.f32.mrf.mxu0 }
 0x281   :  { %5380 = vst [vmem:[#allocation11_spill] sm:$0xff] %v4799_v12  ;;  %v4802_v37 = vadd.f32 %v2217_v25, %v2201_v43  ;;  %v4804_v24 = vadd.f32 %v1939_v49, %v1827_v13  ;;  %v1829_v36 = vadd.f32 %v1828_v40, %v4697_v27  ;;  %v1941_v31 = vpop.f32.mrf.mxu1  ;;  %v2202_v33 = vmul.f32 %v4799_v12, %v4799_v12 }
 0x282   :  { %v1830_v42 = vpop.f32.mrf.mxu0 }
 0x283   :  { %5381 = vst [vmem:[#allocation12_spill] sm:$0xff] %v4804_v24  ;;  %v2218_v59 = vmul.f32 %v4804_v24, %v4804_v24  ;;  %v4811_v62 = vadd.f32 %v1941_v31, %v1829_v36  ;;  %v1831_v56 = vadd.f32 %v1830_v42, %v4710_v53  ;;  %v1943_v30 = vpop.f32.mrf.mxu1 }
 0x284   :  { %v1834_v41 = vpop.f32.mrf.mxu0 }
 0x285   :  { %5382 = vst [vmem:[#allocation13_spill] sm:$0xff] %v4811_v62  ;;  %v4814_v7 = vadd.f32 %v2218_v59, %v2202_v33  ;;  %v4816_v21 = vadd.f32 %v1943_v30, %v1831_v56  ;;  %v1835_v34 = vadd.f32 %v1834_v41, %v4697_v27  ;;  %v1947_v57 = vpop.f32.mrf.mxu1  ;;  %v2203_v15 = vmul.f32 %v4811_v62, %v4811_v62 }
 0x286   :  { %v1836_v1 = vpop.f32.mrf.mxu0  ;;  %v1777_v56 = vadd.f32 %v4680_v17, %v4710_v53 }
 0x287   :  { %5383 = vst [vmem:[#allocation14_spill] sm:$0xff] %v4816_v21  ;;  %v2219_v48 = vmul.f32 %v4816_v21, %v4816_v21  ;;  %v4823_v32 = vadd.f32 %v1947_v57, %v1835_v34  ;;  %v1837_v4 = vadd.f32 %v1836_v1, %v4710_v53  ;;  %v1949_v5 = vpop.f32.mrf.mxu1 }
 0x288   :  { %v1838_v51 = vpop.f32.mrf.mxu0 }
 0x289   :  { %5384 = vst [vmem:[#allocation15_spill] sm:$0xff] %v4823_v32  ;;  %v4826_v43 = vadd.f32 %v2219_v48, %v2203_v15  ;;  %v4828_v25 = vadd.f32 %v1949_v5, %v1837_v4  ;;  %v1839_v13 = vadd.f32 %v1838_v51, %v4697_v27  ;;  %v1951_v49 = vpop.f32.mrf.mxu1  ;;  %v2204_v36 = vmul.f32 %v4823_v32, %v4823_v32 }
 0x28a   :  { %v1840_v40 = vpop.f32.mrf.mxu0  ;;  %v1090_v15 = vsub.s32 2, %v4674_v55  ;;  %v1775_v48 = vadd.f32 %v4676_v44, %v4697_v27  ;;  %v1094_v5 = vsub.s32 3, %v4674_v55  ;;  %v1781_v44 = vadd.f32 %v4694_v11, %v4710_v53 }
 0x28b   :  { %5385 = vst [vmem:[#allocation16_spill] sm:$0xff] %v4828_v25  ;;  %v2220_v31 = vmul.f32 %v4828_v25, %v4828_v25  ;;  %v4835_v42 = vadd.f32 %v1951_v49, %v1839_v13  ;;  %v1841_v33 = vadd.f32 %v1840_v40, %v4710_v53  ;;  %v1953_v59 = vpop.f32.mrf.mxu1 }
 0x28c   :  { %v1844_v30 = vpop.f32.mrf.mxu0  ;;  %v4875_v11 = vrot.slane %v4688_v16, %v1094_v5 }
 0x28d   :  { %5386 = vst [vmem:[#allocation17_spill] sm:$0xff] %v4835_v42  ;;  %v4840_v41 = vadd.f32 %v2220_v31, %v2204_v36  ;;  %v4842_v34 = vadd.f32 %v1953_v59, %v1841_v33  ;;  %v1845_v57 = vadd.f32 %v1844_v30, %v4697_v27  ;;  %v1957_v1 = vpop.f32.mrf.mxu1  ;;  %v2205_v51 = vmul.f32 %v4835_v42, %v4835_v42 }
 0x28e   :  { %v1846_v4 = vpop.f32.mrf.mxu0  ;;  %v4857_v36 = vadd.f32 %v4683_v39, %v1777_v56  ;;  %v1779_v39 = vadd.f32 %v4690_v6, %v4697_v27  ;;  %v4887_v6 = vadd.f32 %v4699_v20, %v1781_v44 }
 0x28f   :  { %5387 = vst [vmem:[#allocation18_spill] sm:$0xff] %v4842_v34  ;;  %v2221_v17 = vmul.f32 %v4842_v34, %v4842_v34  ;;  %v4853_v13 = vadd.f32 %v1957_v1, %v1845_v57  ;;  %v1847_v49 = vadd.f32 %v1846_v4, %v4710_v53  ;;  %v1959_v40 = vpop.f32.mrf.mxu1  ;;  %v4867_v57 = vrot.slane %v4688_v16, %v1090_v15 }
 0x290   :  { %v1848_v31 = vpop.f32.mrf.mxu0  ;;  %v4870_v1 = vadd.f32 %v4678_v19, %v1775_v48  ;;  %v2208_v19 = vmul.f32 %v4857_v36, %v4857_v36  ;;  %v1787_v16 = vadd.f32 %v4703_v60, %v4710_v53 }
 0x291   :  { %5388 = vst [vmem:[#allocation19_spill] sm:$0xff] %v4853_v13  ;;  %v4861_v33 = vadd.f32 %v2221_v17, %v2205_v51  ;;  %v4863_v55 = vadd.f32 %v1959_v40, %v1847_v49  ;;  %v1849_v59 = vadd.f32 %v1848_v31, %v4697_v27  ;;  %v1961_v30 = vpop.f32.mrf.mxu1  ;;  %v2206_v4 = vmul.f32 %v4853_v13, %v4853_v13 }
 0x292   :  { %v1850_v56 = vpop.f32.mrf.mxu0 }
 0x293   :  { %5389 = vst [vmem:[#allocation20_spill] sm:$0xff] %v4863_v55  ;;  %v2222_v51 = vmul.f32 %v4863_v55, %v4863_v55  ;;  %v4881_v17 = vadd.f32 %v1961_v30, %v1849_v59  ;;  %v1851_v15 = vadd.f32 %v1850_v56, %v4710_v53  ;;  %v1963_v49 = vpop.f32.mrf.mxu1  ;;  %v2192_v59 = vmul.f32 %v4870_v1, %v4870_v1 }
 0x294   :  { %v2000_v27 = vpop.f32.mrf.mxu0  ;;  %v4899_v30 = vadd.f32 %v4692_v3, %v1779_v39 }
 0x295   :  { %5390 = vst [vmem:[#allocation21_spill] sm:$0xff] %v4881_v17  ;;  %v4891_v48 = vadd.f32 %v2222_v51, %v2206_v4  ;;  %v4893_v5 = vadd.f32 %v1963_v49, %v1851_v15  ;;  %v2001_v40 = vadd.f32 %v2000_v27, %v4867_v57  ;;  %v2113_v31 = vpop.f32.mrf.mxu1  ;;  %v2207_v20 = vmul.f32 %v4881_v17, %v4881_v17 }
 0x296   :  { %v2002_v56 = vpop.f32.mrf.mxu0  ;;  %v2224_v51 = vadd.f32 %v2208_v19, %v2192_v59  ;;  %v2209_v15 = vmul.f32 %v4887_v6, %v4887_v6  ;;  %v4911_v49 = vadd.f32 %v4707_v50, %v1787_v16  ;;  %v2193_v19 = vmul.f32 %v4899_v30, %v4899_v30 }
 0x297   :  { %5391 = vst [vmem:[#allocation22_spill] sm:$0xff] %v4893_v5  ;;  %v2223_v60 = vmul.f32 %v4893_v5, %v4893_v5  ;;  %v4905_v53 = vadd.f32 %v2113_v31, %v2001_v40  ;;  %v2003_v44 = vadd.f32 %v2002_v56, %v4875_v11  ;;  %v2115_v4 = vpop.f32.mrf.mxu1 }
 0x298   :  { %v2004_v3 = vpop.f32.mrf.mxu0  ;;  %v2225_v5 = vadd.f32 %v2209_v15, %v2193_v19 }
 0x299   :  { %v4913_v39 = vadd.f32 %v2223_v60, %v2207_v20  ;;  %v2240_v27 = vmul.f32 %v4905_v53, %v4905_v53  ;;  %v4917_v17 = vadd.f32 %v2115_v4, %v2003_v44  ;;  %v2005_v40 = vadd.f32 %v2004_v3, %v4867_v57  ;;  %v2117_v31 = vpop.f32.mrf.mxu1 }
 0x29a   :  { %v2006_v59 = vpop.f32.mrf.mxu0  ;;  %v2210_v44 = vmul.f32 %v4911_v49, %v4911_v49 }
 0x29b   :  { %5392 = vst [vmem:[#allocation23_spill] sm:$0xff] %v4913_v39  ;;  %v2256_v56 = vadd.f32 %v2240_v27, %v2224_v51  ;;  %v2272_v50 = vmul.f32 %v4917_v17, %v4917_v17  ;;  %v4924_v16 = vadd.f32 %v2117_v31, %v2005_v40  ;;  %v2007_v20 = vadd.f32 %v2006_v59, %v4875_v11  ;;  %v2119_v60 = vpop.f32.mrf.mxu1 }
 0x29c   :  { %v2010_v4 = vpop.f32.mrf.mxu0  ;;  %v2194_v40 = vmul.f32 %v4705_v23, %v4705_v23 }
 0x29d   :  { %v2288_v3 = vadd.f32 %v2272_v50, %v2256_v56  ;;  %v2241_v13 = vmul.f32 %v4924_v16, %v4924_v16  ;;  %v4931_v55 = vadd.f32 %v2119_v60, %v2007_v20  ;;  %v2011_v51 = vadd.f32 %v2010_v4, %v4867_v57  ;;  %v2123_v27 = vpop.f32.mrf.mxu1 }
 0x29e   :  { %v2012_v31 = vpop.f32.mrf.mxu0  ;;  %v2226_v50 = vadd.f32 %v2210_v44, %v2194_v40 }
 0x29f   :  { %v2304_v59 = vadd.f32 0.0001, %v2288_v3  ;;  %v2257_v42 = vadd.f32 %v2241_v13, %v2225_v5  ;;  %v2273_v15 = vmul.f32 %v4931_v55, %v4931_v55  ;;  %v4938_v19 = vadd.f32 %v2123_v27, %v2011_v51  ;;  %v2125_v56 = vpop.f32.mrf.mxu1 }
 0x2a0   :  { %v2013_v34 = vadd.f32 %v2012_v31, %v4875_v11  ;;  %v2014_v20 = vpop.f32.mrf.mxu0 }
 0x2a1   :  { %3788 = vrsqrt.f32 %v2304_v59  ;;  %v2289_v60 = vadd.f32 %v2273_v15, %v2257_v42  ;;  %v2242_v4 = vmul.f32 %v4938_v19, %v4938_v19  ;;  %v2015_v32 = vadd.f32 %v2014_v20, %v4867_v57  ;;  %v2127_v25 = vpop.f32.mrf.mxu1 }
 0x2a2   :  { %v4944_v3 = vadd.f32 %v2125_v56, %v2013_v34  ;;  %v2016_v13 = vpop.f32.mrf.mxu0 }
 0x2a3   :  { %v2305_v5 = vadd.f32 0.0001, %v2289_v60  ;;  %v2258_v62 = vadd.f32 %v2242_v4, %v2226_v50  ;;  %v4946_v51 = vadd.f32 %v2127_v25, %v2015_v32  ;;  %v2017_v44 = vadd.f32 %v2016_v13, %v4875_v11  ;;  %v2129_v27 = vpop.f32.mrf.mxu1 }
 0x2a4   :  { %v2274_v40 = vmul.f32 %v4944_v3, %v4944_v3  ;;  %v2020_v42 = vpop.f32.mrf.mxu0 }
 0x2a5   :  { %3790 = vrsqrt.f32 %v2305_v5  ;;  %v2243_v31 = vmul.f32 %v4946_v51, %v4946_v51  ;;  %v4953_v59 = vadd.f32 %v2129_v27, %v2017_v44  ;;  %v2021_v34 = vadd.f32 %v2020_v42, %v4867_v57  ;;  %v2133_v15 = vpop.f32.mrf.mxu1 }
 0x2a6   :  { %v2290_v56 = vadd.f32 %v2274_v40, %v2258_v62  ;;  %v2022_v50 = vpop.f32.mrf.mxu0 }
 0x2a7   :  { %v2259_v32 = vadd.f32 %v2243_v31, %v4726_v26  ;;  %v2275_v25 = vmul.f32 %v4953_v59, %v4953_v59  ;;  %v4959_v20 = vadd.f32 %v2133_v15, %v2021_v34  ;;  %v2023_v60 = vadd.f32 %v2022_v50, %v4875_v11  ;;  %v2135_v4 = vpop.f32.mrf.mxu1 }
 0x2a8   :  { %v2306_v13 = vadd.f32 0.0001, %v2290_v56  ;;  %v2024_v5 = vpop.f32.mrf.mxu0 }
 0x2a9   :  { %v2291_v21 = vadd.f32 %v2275_v25, %v2259_v32  ;;  %v2244_v44 = vmul.f32 %v4959_v20, %v4959_v20  ;;  %v4964_v27 = vadd.f32 %v2135_v4, %v2023_v60  ;;  %v2025_v62 = vadd.f32 %v2024_v5, %v4867_v57  ;;  %v2137_v40 = vpop.f32.mrf.mxu1 }
 0x2aa   :  { %3792 = vrsqrt.f32 %v2306_v13  ;;  %v2026_v26 = vpop.f32.mrf.mxu0 }
 0x2ab   :  { %v2307_v42 = vadd.f32 0.0001, %v2291_v21  ;;  %v2260_v31 = vadd.f32 %v2244_v44, %v4738_v18  ;;  %v2276_v34 = vmul.f32 %v4964_v27, %v4964_v27  ;;  %v4970_v15 = vadd.f32 %v2137_v40, %v2025_v62  ;;  %v2139_v56 = vpop.f32.mrf.mxu1 }
 0x2ac   :  { %v2027_v50 = vadd.f32 %v2026_v26, %v4875_v11  ;;  %v2030_v32 = vpop.f32.mrf.mxu0 }
 0x2ad   :  { %3794 = vrsqrt.f32 %v2307_v42  ;;  %v2292_v25 = vadd.f32 %v2276_v34, %v2260_v31  ;;  %v2245_v60 = vmul.f32 %v4970_v15, %v4970_v15  ;;  %v2031_v4 = vadd.f32 %v2030_v32, %v4867_v57  ;;  %v2143_v13 = vpop.f32.mrf.mxu1 }
 0x2ae   :  { %v3789_v21 = vpop.eup %3788  ;;  %v4976_v5 = vadd.f32 %v2139_v56, %v2027_v50  ;;  %v2032_v18 = vpop.f32.mrf.mxu0 }
 0x2af   :  { %v2384_v44 = vmul.f32 %v3789_v21, %v4917_v17  ;;  %v2308_v62 = vadd.f32 0.0001, %v2292_v25  ;;  %v2261_v40 = vadd.f32 %v2245_v60, %v4750_v2  ;;  %v4980_v12 = vadd.f32 %v2143_v13, %v2031_v4  ;;  %v2145_v26 = vpop.f32.mrf.mxu1 }
 0x2b0   :  { %v2277_v42 = vmul.f32 %v4976_v5, %v4976_v5  ;;  %v2033_v31 = vadd.f32 %v2032_v18, %v4875_v11  ;;  %v2034_v34 = vpop.f32.mrf.mxu0  ;;  %v2352_v32 = vmul.f32 %v3789_v21, %v4857_v36  ;;  %v2336_v56 = vmul.f32 %v3789_v21, %v4870_v1 }
 0x2b1   :  { %v2403_v50 = vmax.f32 %v2384_v44, 0.0  ;;  %3796 = vrsqrt.f32 %v2308_v62  ;;  %v2246_v17 = vmul.f32 %v4980_v12, %v4980_v12  ;;  %v2035_v2 = vadd.f32 %v2034_v34, %v4867_v57  ;;  %v2147_v25 = vpop.f32.mrf.mxu1 }
 0x2b2   :  { %v3791_v60 = vpop.eup %3790  ;;  %v2293_v4 = vadd.f32 %v2277_v42, %v2261_v40  ;;  %v4990_v13 = vadd.f32 %v2145_v26, %v2033_v31  ;;  %v2036_v24 = vpop.f32.mrf.mxu0  ;;  %v2401_v29 = vmax.f32 %v2352_v32, 0.0  ;;  %v2400_v18 = vmax.f32 %v2336_v56, 0.0  ;;  %v5001_v31 = vld [vmem:[#allocation6 + $0x70] sm:$0xff] }
 0x2b3   :  { %v2385_v39 = vmul.f32 %v3791_v60, %v4931_v55  ;;  %v2262_v36 = vadd.f32 %v2246_v17, %v4762_v10  ;;  %v4994_v1 = vadd.f32 %v2147_v25, %v2035_v2  ;;  %v2037_v44 = vadd.f32 %v2036_v24, %v4875_v11  ;;  %v2149_v62 = vpop.f32.mrf.mxu1  ;;  %2744 = vmatprep.mubr.f32.mxu1 %v2403_v50 }
 0x2b4   :  { %v2309_v52 = vadd.f32 0.0001, %v2293_v4  ;;  %v2278_v34 = vmul.f32 %v4990_v13, %v4990_v13  ;;  %2599 = vmatprep.mubr.f32.mxu0 %v2401_v29  ;;  %v2040_v40 = vpop.f32.mrf.mxu0  ;;  %v2368_v26 = vmul.f32 %v3789_v21, %v4905_v53  ;;  %v2353_v42 = vmul.f32 %v3791_v60, %v4887_v6 }
 0x2b5   :  { %v2407_v55 = vmax.f32 %v2385_v39, 0.0  ;;  %v2247_v10 = vmul.f32 %v4994_v1, %v4994_v1  ;;  %v5005_v32 = vadd.f32 %v2149_v62, %v2037_v44  ;;  %v2041_v24 = vadd.f32 %v2040_v40, %v4867_v57  ;;  %v2153_v56 = vpop.f32.mrf.mxu1  ;;  %2600 = vmatmul.mubr.f32.vlgmr.msra.gmra.mxu0 %v2400_v18  ;;  %v5019_v62 = vld [vmem:[#allocation6 + $0x68] sm:$0xff] }
 0x2b6   :  { %3798 = vrsqrt.f32 %v2309_v52  ;;  %v2294_v50 = vadd.f32 %v2278_v34, %v2262_v36  ;;  %v2402_v29 = vmax.f32 %v2368_v26, 0.0  ;;  %v2042_v17 = vpop.f32.mrf.mxu0  ;;  %v2405_v2 = vmax.f32 %v2353_v42, 0.0  ;;  %3418 = vmatpush3.msra.mxu0 %v4781_v46 }
 0x2b7   :  { %v3793_v6 = vpop.eup %3792  ;;  %v2263_v53 = vadd.f32 %v2247_v10, %v4774_v58  ;;  %v2279_v39 = vmul.f32 %v5005_v32, %v5005_v32  ;;  %v5012_v21 = vadd.f32 %v2153_v56, %v2041_v24  ;;  %v2043_v25 = vadd.f32 %v2042_v17, %v4875_v11  ;;  %v2155_v4 = vpop.f32.mrf.mxu1  ;;  %3419 = vmatprep.subr.mxu0 %v5001_v31 }
 0x2b8   :  { %v2386_v52 = vmul.f32 %v3793_v6, %v4944_v3  ;;  %v2310_v18 = vadd.f32 0.0001, %v2294_v50  ;;  %2745 = vmatmul.mubr.f32.vlgmr.msra.gmra.mxu1 %v2402_v29  ;;  %2604 = vmatprep.mubr.f32.mxu0 %v2405_v2  ;;  %v2044_v36 = vpop.f32.mrf.mxu0  ;;  %v2337_v44 = vmul.f32 %v3791_v60, %v4899_v30  ;;  %v2369_v58 = vmul.f32 %v3791_v60, %v4924_v16  ;;  %v5038_v2 = vld [vmem:[#allocation6 + $0x60] sm:$0xff] }
 0x2b9   :  { %v2295_v34 = vadd.f32 %v2279_v39, %v2263_v53  ;;  %v2248_v40 = vmul.f32 %v5012_v21, %v5012_v21  ;;  %v5023_v26 = vadd.f32 %v2155_v4, %v2043_v25  ;;  %2749 = vmatprep.mubr.f32.mxu1 %v2407_v55  ;;  %v2045_v42 = vadd.f32 %v2044_v36, %v4867_v57  ;;  %v2157_v3 = vpop.f32.mrf.mxu1 }
 0x2ba   :  { %v5026_v10 = vpop.eup %3794  ;;  %v2411_v24 = vmax.f32 %v2386_v52, 0.0  ;;  %3800 = vrsqrt.f32 %v2310_v18  ;;  %v2404_v56 = vmax.f32 %v2337_v44, 0.0  ;;  %v2406_v30 = vmax.f32 %v2369_v58, 0.0  ;;  %v2046_v50 = vpop.f32.mrf.mxu0  ;;  %3420 = vmatpush3.msra.mxu0 %v5001_v31  ;;  %3489 = vmatpush3.msra.mxu1 %v4781_v46  ;;  %v5048_v18 = vld [vmem:[#allocation6 + $0x58] sm:$0xff] }
 0x2bb   :  { %v5032_v16 = vmul.f32 %v5026_v10, %v4953_v59  ;;  %v2311_v60 = vadd.f32 0.0001, %v2295_v34  ;;  %v2264_v55 = vadd.f32 %v2248_v40, %v4790_v61  ;;  %v2280_v29 = vmul.f32 %v5023_v26, %v5023_v26  ;;  %v2159_v17 = vpop.f32.mrf.mxu1  ;;  %3421 = vmatprep.subr.mxu0 %v5019_v62  ;;  %3474 = vmatprep.subr.mxu1 %v5001_v31 }
 0x2bc   :  { %v5041_v53 = vadd.f32 %v2157_v3, %v2045_v42  ;;  %2605 = vmatmul.mubr.f32.gmra.mxu0 %v2404_v56  ;;  %2750 = vmatmul.mubr.f32.gmra.mxu1 %v2406_v30  ;;  %v2047_v46 = vadd.f32 %v2046_v50, %v4875_v11  ;;  %v2354_v59 = vmul.f32 %v3793_v6, %v4911_v49  ;;  %v2050_v39 = vpop.f32.mrf.mxu0 }
 0x2bd   :  { %v2415_v61 = vmax.f32 %v5032_v16, 0.0  ;;  %3802 = vrsqrt.f32 %v2311_v60  ;;  %v2296_v25 = vadd.f32 %v2280_v29, %v2264_v55  ;;  %2754 = vmatprep.mubr.f32.mxu1 %v2411_v24  ;;  %v2051_v4 = vadd.f32 %v2050_v39, %v4867_v57  ;;  %v2163_v52 = vpop.f32.mrf.mxu1  ;;  %3422 = vmatpush3.msra.mxu0 %v5019_v62  ;;  %v5076_v55 = vld [vmem:[#allocation6 + $0x50] sm:$0xff] }
 0x2be   :  { %v5050_v36 = vpop.eup %3796  ;;  %v2249_v44 = vmul.f32 %v5041_v53, %v5041_v53  ;;  %v5054_v58 = vadd.f32 %v2159_v17, %v2047_v46  ;;  %v2409_v49 = vmax.f32 %v2354_v59, 0.0  ;;  %v2338_v34 = vmul.f32 %v3793_v6, %v4705_v23  ;;  %v2052_v40 = vpop.f32.mrf.mxu0  ;;  %3423 = vmatprep.subr.mxu0 %v5038_v2  ;;  %3490 = vmatpush3.msra.mxu1 %v5001_v31 }
 0x2bf   :  { %v5061_v42 = vmul.f32 %v5050_v36, %v4964_v27  ;;  %v2312_v3 = vadd.f32 0.0001, %v2296_v25  ;;  %v5063_v24 = vadd.f32 %v2163_v52, %v2051_v4  ;;  %v2370_v56 = vmul.f32 %v3793_v6, %v4938_v19  ;;  %v2165_v30 = vpop.f32.mrf.mxu1  ;;  %3424 = vmatpush3.msra.mxu0 %v5038_v2  ;;  %3475 = vmatprep.subr.mxu1 %v5019_v62 }
 0x2c0   :  { %v2265_v23 = vadd.f32 %v2249_v44, %v4802_v37  ;;  %v2281_v50 = vmul.f32 %v5054_v58, %v5054_v58  ;;  %2609 = vmatprep.mubr.f32.mxu0 %v2409_v49  ;;  %v2408_v31 = vmax.f32 %v2338_v34, 0.0  ;;  %v2053_v27 = vadd.f32 %v2052_v40, %v4875_v11  ;;  %v2054_v16 = vpop.f32.mrf.mxu0  ;;  %3425 = vmatprep.subr.mxu0 %v5048_v18  ;;  %v5092_v49 = vld [vmem:[#allocation6 + $0x48] sm:$0xff] }
 0x2c1   :  { %3804 = vrsqrt.f32 %v2312_v3  ;;  %v2250_v19 = vmul.f32 %v5063_v24, %v5063_v24  ;;  %v2410_v6 = vmax.f32 %v2370_v56, 0.0  ;;  %v2167_v60 = vpop.f32.mrf.mxu1  ;;  %3426 = vmatpush3.msra.mxu0 %v5048_v18  ;;  %3491 = vmatpush3.msra.mxu1 %v5019_v62  ;;  %v2355_v17 = vmul.f32 %v5026_v10, %v4716_v54 }
 0x2c2   :  { %v2297_v37 = vadd.f32 %v2281_v50, %v2265_v23  ;;  %2610 = vmatmul.mubr.f32.gmra.mxu0 %v2408_v31  ;;  %v5079_v29 = vadd.f32 %v2165_v30, %v2053_v27  ;;  %v2055_v46 = vadd.f32 %v2054_v16, %v4867_v57  ;;  %v2056_v59 = vpop.f32.mrf.mxu0  ;;  %v2339_v4 = vmul.f32 %v5026_v10, %v4713_v22  ;;  %v5109_v31 = vld [vmem:[#allocation6 + $0x40] sm:$0xff] }
 0x2c3   :  { %v5084_v39 = vpop.eup %3798  ;;  %v2266_v25 = vadd.f32 %v2250_v19, %v4814_v7  ;;  %2755 = vmatmul.mubr.f32.gmra.mxu1 %v2410_v6  ;;  %v2371_v62 = vmul.f32 %v5026_v10, %v4946_v51  ;;  %v2057_v52 = vadd.f32 %v2056_v59, %v4875_v11  ;;  %v2169_v44 = vpop.f32.mrf.mxu1  ;;  %v2419_v54 = vmax.f32 %v5061_v42, 0.0  ;;  %3427 = vmatprep.subr.mxu0 %v5076_v55  ;;  %v5125_v59 = vld [vmem:[#allocation6 + $0x38] sm:$0xff] }
 0x2c4   :  { %v2313_v34 = vadd.f32 0.0001, %v2297_v37  ;;  %v2282_v40 = vmul.f32 %v5079_v29, %v5079_v29  ;;  %v2413_v3 = vmax.f32 %v2355_v17, 0.0  ;;  %2759 = vmatprep.mubr.f32.mxu1 %v2415_v61  ;;  %v2060_v7 = vpop.f32.mrf.mxu0  ;;  %v5098_v22 = vadd.f32 %v2167_v60, %v2055_v46  ;;  %3428 = vmatpush3.msra.mxu0 %v5076_v55 }
 0x2c5   :  { %v2412_v56 = vmax.f32 %v2339_v4, 0.0  ;;  %v2414_v51 = vmax.f32 %v2371_v62, 0.0  ;;  %v5100_v10 = vadd.f32 %v2169_v44, %v2057_v52  ;;  %v2173_v30 = vpop.f32.mrf.mxu1  ;;  %3476 = vmatprep.subr.mxu1 %v5038_v2  ;;  %v2389_v42 = vmul.f32 %v5084_v39, %v4976_v5  ;;  %3429 = vmatprep.subr.mxu0 %v5092_v49 }
 0x2c6   :  { %3806 = vrsqrt.f32 %v2313_v34  ;;  %v2298_v23 = vadd.f32 %v2282_v40, %v2266_v25  ;;  %2614 = vmatprep.mubr.f32.mxu0 %v2413_v3  ;;  %v2356_v61 = vmul.f32 %v5050_v36, %v4728_v9  ;;  %v2062_v50 = vpop.f32.mrf.mxu0  ;;  %v2251_v16 = vmul.f32 %v5098_v22, %v5098_v22  ;;  %3430 = vmatpush3.msra.mxu0 %v5092_v49 }
 0x2c7   :  { %v5111_v27 = vpop.eup %3800  ;;  %2615 = vmatmul.mubr.f32.gmra.mxu0 %v2412_v56  ;;  %2760 = vmatmul.mubr.f32.gmra.mxu1 %v2414_v51  ;;  %v2283_v5 = vmul.f32 %v5100_v10, %v5100_v10  ;;  %v2061_v19 = vadd.f32 %v2060_v7, %v4867_v57  ;;  %v2175_v6 = vpop.f32.mrf.mxu1  ;;  %v2340_v17 = vmul.f32 %v5050_v36, %v4723_v63  ;;  %v2423_v63 = vmax.f32 %v2389_v42, 0.0 }
 0x2c8   :  { %v5120_v9 = vmul.f32 %v5111_v27, %v4990_v13  ;;  %v2314_v60 = vadd.f32 0.0001, %v2298_v23  ;;  %v2417_v37 = vmax.f32 %v2356_v61, 0.0  ;;  %2764 = vmatprep.mubr.f32.mxu1 %v2419_v54  ;;  %v2064_v46 = vpop.f32.mrf.mxu0  ;;  %v2267_v25 = vadd.f32 %v2251_v16, %v4826_v43  ;;  %3431 = vmatprep.subr.mxu0 %v5109_v31 }
 0x2c9   :  { %v5128_v4 = vadd.f32 %v2173_v30, %v2061_v19  ;;  %v2372_v62 = vmul.f32 %v5050_v36, %v4959_v20  ;;  %v2063_v13 = vadd.f32 %v2062_v50, %v4875_v11  ;;  %v2177_v52 = vpop.f32.mrf.mxu1  ;;  %v2416_v54 = vmax.f32 %v2340_v17, 0.0  ;;  %3432 = vmatpush3.msra.mxu0 %v5109_v31  ;;  %3492 = vmatpush3.msra.mxu1 %v5038_v2 }
 0x2ca   :  { %v5134_v44 = vpop.eup %3802  ;;  %3808 = vrsqrt.f32 %v2314_v60  ;;  %2619 = vmatprep.mubr.f32.mxu0 %v2417_v37  ;;  %v2357_v34 = vmul.f32 %v5084_v39, %v4740_v14  ;;  %v2066_v43 = vpop.f32.mrf.mxu0  ;;  %v2427_v40 = vmax.f32 %v5120_v9, 0.0  ;;  %v2299_v20 = vadd.f32 %v2283_v5, %v2267_v25  ;;  %3433 = vmatprep.subr.mxu0 %v5125_v59 }
 0x2cb   :  { %v2252_v36 = vmul.f32 %v5128_v4, %v5128_v4  ;;  %v2418_v3 = vmax.f32 %v2372_v62, 0.0  ;;  %v2179_v7 = vpop.f32.mrf.mxu1  ;;  %2620 = vmatmul.mubr.f32.gmra.mxu0 %v2416_v54  ;;  %v5144_v56 = vadd.f32 %v2175_v6, %v2063_v13  ;;  %v2065_v14 = vadd.f32 %v2064_v46, %v4867_v57  ;;  %3477 = vmatprep.subr.mxu1 %v5048_v18 }
 0x2cc   :  { %v2421_v51 = vmax.f32 %v2357_v34, 0.0  ;;  %v2341_v30 = vmul.f32 %v5084_v39, %v4735_v8  ;;  %v2070_v42 = vpop.f32.mrf.mxu0  ;;  %v2391_v23 = vmul.f32 %v5134_v44, %v5005_v32  ;;  %v2315_v61 = vadd.f32 0.0001, %v2299_v20  ;;  %3434 = vmatpush3.msra.mxu0 %v5125_v59  ;;  %3493 = vmatpush3.msra.mxu1 %v5048_v18 }
 0x2cd   :  { %v2268_v50 = vadd.f32 %v2252_v36, %v4840_v41  ;;  %2765 = vmatmul.mubr.f32.gmra.mxu1 %v2418_v3  ;;  %v2373_v2 = vmul.f32 %v5084_v39, %v4970_v15  ;;  %v2183_v16 = vpop.f32.mrf.mxu1  ;;  %v2284_v8 = vmul.f32 %v5144_v56, %v5144_v56  ;;  %v5160_v19 = vadd.f32 %v2177_v52, %v2065_v14 }
 0x2ce   :  { %v5156_v5 = vpop.eup %3804  ;;  %2624 = vmatprep.mubr.f32.mxu0 %v2421_v51  ;;  %2769 = vmatprep.mubr.f32.mxu1 %v2423_v63  ;;  %v2420_v32 = vmax.f32 %v2341_v30, 0.0  ;;  %v2067_v6 = vadd.f32 %v2066_v43, %v4875_v11  ;;  %v2072_v41 = vpop.f32.mrf.mxu0  ;;  %3810 = vrsqrt.f32 %v2315_v61  ;;  %v2358_v39 = vmul.f32 %v5111_v27, %v4752_v28 }
 0x2cf   :  { %v5165_v9 = vmul.f32 %v5156_v5, %v5023_v26  ;;  %v2422_v15 = vmax.f32 %v2373_v2, 0.0  ;;  %v2300_v60 = vadd.f32 %v2284_v8, %v2268_v50  ;;  %v2253_v37 = vmul.f32 %v5160_v19, %v5160_v19  ;;  %v2185_v25 = vpop.f32.mrf.mxu1  ;;  %3478 = vmatprep.subr.mxu1 %v5076_v55 }
 0x2d0   :  { %2625 = vmatmul.mubr.f32.gmra.mxu0 %v2420_v32  ;;  %v5172_v17 = vadd.f32 %v2179_v7, %v2067_v6  ;;  %v2071_v46 = vadd.f32 %v2070_v42, %v4867_v57  ;;  %v2074_v62 = vpop.f32.mrf.mxu0  ;;  %v2431_v26 = vmax.f32 %v2391_v23, 0.0  ;;  %v2425_v13 = vmax.f32 %v2358_v39, 0.0  ;;  %3494 = vmatpush3.msra.mxu1 %v5076_v55 }
 0x2d1   :  { %2770 = vmatmul.mubr.f32.gmra.mxu1 %v2422_v15  ;;  %v2342_v52 = vmul.f32 %v5111_v27, %v4747_v38  ;;  %v2374_v28 = vmul.f32 %v5111_v27, %v4980_v12  ;;  %v2316_v18 = vadd.f32 0.0001, %v2300_v60  ;;  %v2269_v63 = vadd.f32 %v2253_v37, %v4861_v33  ;;  %3479 = vmatprep.subr.mxu1 %v5092_v49  ;;  %v2187_v3 = vpop.f32.mrf.mxu1  ;;  %v5394_v15 = vld [vmem:[#allocation23_spill] sm:$0xff] }
 0x2d2   :  { %v2285_v54 = vmul.f32 %v5172_v17, %v5172_v17  ;;  %2774 = vmatprep.mubr.f32.mxu1 %v2427_v40  ;;  %v5183_v34 = vadd.f32 %v2183_v16, %v2071_v46  ;;  %2629 = vmatprep.mubr.f32.mxu0 %v2425_v13  ;;  %v2073_v36 = vadd.f32 %v2072_v41, %v4875_v11  ;;  %v2435_v33 = vmax.f32 %v5165_v9, 0.0  ;;  %v2076_v55 = vpop.f32.mrf.mxu0  ;;  %v5393_v41 = vld [vmem:[#allocation10_spill] sm:$0xff] }
 0x2d3   :  { %v3807_v43 = vpop.eup %3806  ;;  %v2424_v20 = vmax.f32 %v2342_v52, 0.0  ;;  %v2426_v38 = vmax.f32 %v2374_v28, 0.0  ;;  %v2359_v12 = vmul.f32 %v5134_v44, %v4764_v45  ;;  %3812 = vrsqrt.f32 %v2316_v18  ;;  %3495 = vmatpush3.msra.mxu1 %v5092_v49  ;;  %v2189_v16 = vpop.f32.mrf.mxu1  ;;  %v5396_v52 = vld [vmem:[#allocation12_spill] sm:$0xff] }
 0x2d4   :  { %v2301_v27 = vadd.f32 %v2285_v54, %v2269_v63  ;;  %v2254_v40 = vmul.f32 %v5183_v34, %v5183_v34  ;;  %v5194_v7 = vadd.f32 %v2185_v25, %v2073_v36  ;;  %v2075_v45 = vadd.f32 %v2074_v62, %v4867_v57  ;;  %3480 = vmatprep.subr.mxu1 %v5109_v31  ;;  %v5395_v62 = vld [vmem:[#allocation9_spill] sm:$0xff]  ;;  %v5397_v54 = vld [vmem:[#allocation11_spill] sm:$0xff] }
 0x2d5   :  { %2630 = vmatmul.mubr.f32.gmra.mxu0 %v2424_v20  ;;  %2775 = vmatmul.mubr.f32.gmra.mxu1 %v2426_v38  ;;  %v2429_v51 = vmax.f32 %v2359_v12, 0.0  ;;  %v2343_v14 = vmul.f32 %v5134_v44, %v4759_v35  ;;  %v2393_v30 = vmul.f32 %v3807_v43, %v5054_v58  ;;  %v2375_v61 = vmul.f32 %v5134_v44, %v4994_v1 }
 0x2d6   :  { %v2317_v42 = vadd.f32 0.0001, %v2301_v27  ;;  %v2270_v23 = vadd.f32 %v2254_v40, %v4891_v48  ;;  %2779 = vmatprep.mubr.f32.mxu1 %v2431_v26  ;;  %v2286_v50 = vmul.f32 %v5194_v7, %v5194_v7  ;;  %v5206_v57 = vadd.f32 %v2187_v3, %v2075_v45  ;;  %3496 = vmatpush3.msra.mxu1 %v5109_v31 }
 0x2d7   :  { %v3809_v49 = vpop.eup %3808  ;;  %2634 = vmatprep.mubr.f32.mxu0 %v2429_v51  ;;  %v2428_v2 = vmax.f32 %v2343_v14, 0.0  ;;  %v2077_v35 = vadd.f32 %v2076_v55, %v4875_v11  ;;  %v2430_v58 = vmax.f32 %v2375_v61, 0.0  ;;  %v2360_v1 = vmul.f32 %v5156_v5, %v4776_v47  ;;  %3481 = vmatprep.subr.mxu1 %v5125_v59 }
 0x2d8   :  { %v2394_v48 = vmul.f32 %v3809_v49, %v5079_v29  ;;  %3814 = vrsqrt.f32 %v2317_v42  ;;  %v2302_v44 = vadd.f32 %v2286_v50, %v2270_v23  ;;  %v2255_v8 = vmul.f32 %v5206_v57, %v5206_v57  ;;  %3497 = vmatpush3.msra.mxu1 %v5125_v59  ;;  %v5401_v42 = vld [vmem:[#allocation15_spill] sm:$0xff] }
 0x2d9   :  { %2635 = vmatmul.mubr.f32.gmra.mxu0 %v2428_v2  ;;  %v5216_v32 = vadd.f32 %v2189_v16, %v2077_v35  ;;  %v2344_v11 = vmul.f32 %v5156_v5, %v4771_v0  ;;  %v2439_v31 = vmax.f32 %v2393_v30, 0.0  ;;  %2780 = vmatmul.mubr.f32.gmra.mxu1 %v2430_v58  ;;  %v2433_v29 = vmax.f32 %v2360_v1, 0.0  ;;  %v5403_v16 = vld [vmem:[#allocation17_spill] sm:$0xff] }
 0x2da   :  { %v2376_v6 = vmul.f32 %v5156_v5, %v5012_v21  ;;  %v2361_v47 = vmul.f32 %v3807_v43, %v5393_v41  ;;  %v2318_v9 = vadd.f32 0.0001, %v2302_v44  ;;  %v2271_v39 = vadd.f32 %v2255_v8, %v5394_v15  ;;  %2784 = vmatprep.mubr.f32.mxu1 %v2435_v33  ;;  %v5399_v33 = vld [vmem:[#allocation13_spill] sm:$0xff] }
 0x2db   :  { %v2287_v60 = vmul.f32 %v5216_v32, %v5216_v32  ;;  %v2432_v37 = vmax.f32 %v2344_v11, 0.0  ;;  %v3811_v46 = vpop.eup %3810  ;;  %2639 = vmatprep.mubr.f32.mxu0 %v2433_v29  ;;  %v2345_v26 = vmul.f32 %v3807_v43, %v5395_v62  ;;  %v2377_v21 = vmul.f32 %v3807_v43, %v5041_v53  ;;  %v5398_v53 = vld [vmem:[#allocation14_spill] sm:$0xff]  ;;  %v5407_v62 = vld [vmem:[#allocation21_spill] sm:$0xff] }
 0x2dc   :  { %v2434_v0 = vmax.f32 %v2376_v6, 0.0  ;;  %v2437_v25 = vmax.f32 %v2361_v47, 0.0  ;;  %v2443_v5 = vmax.f32 %v2394_v48, 0.0  ;;  %3816 = vrsqrt.f32 %v2318_v9  ;;  %v5402_v48 = vld [vmem:[#allocation18_spill] sm:$0xff]  ;;  %v5404_v6 = vld [vmem:[#allocation20_spill] sm:$0xff]  ;;  %v5405_v47 = vld [vmem:[#allocation19_spill] sm:$0xff] }
 0x2dd   :  { %v2303_v13 = vadd.f32 %v2287_v60, %v2271_v39  ;;  %2640 = vmatmul.mubr.f32.gmra.mxu0 %v2432_v37  ;;  %v2362_v28 = vmul.f32 %v3809_v49, %v5396_v52  ;;  %v2436_v18 = vmax.f32 %v2345_v26, 0.0  ;;  %v2438_v63 = vmax.f32 %v2377_v21, 0.0 }
 0x2de   :  { %2785 = vmatmul.mubr.f32.gmra.mxu1 %v2434_v0  ;;  %2644 = vmatprep.mubr.f32.mxu0 %v2437_v25  ;;  %v2346_v59 = vmul.f32 %v3809_v49, %v5397_v54  ;;  %v2378_v20 = vmul.f32 %v3809_v49, %v5063_v24  ;;  %v2395_v38 = vmul.f32 %v3811_v46, %v5100_v10  ;;  %v5400_v24 = vld [vmem:[#allocation16_spill] sm:$0xff] }
 0x2df   :  { %v2319_v36 = vadd.f32 0.0001, %v2303_v13  ;;  %2789 = vmatprep.mubr.f32.mxu1 %v2439_v31  ;;  %v2441_v12 = vmax.f32 %v2362_v28, 0.0  ;;  %v2363_v43 = vmul.f32 %v3811_v46, %v5398_v53  ;;  %v2347_v27 = vmul.f32 %v3811_v46, %v5399_v33  ;;  %v2844_v54 = vld [vmem:[#allocation6 + $0x18] sm:$0xff] }
 0x2e0   :  { %v3813_v40 = vpop.eup %3812  ;;  %v2440_v3 = vmax.f32 %v2346_v59, 0.0  ;;  %v2379_v55 = vmul.f32 %v3811_v46, %v5098_v22  ;;  %v2442_v51 = vmax.f32 %v2378_v20, 0.0  ;;  %v2447_v10 = vmax.f32 %v2395_v38, 0.0  ;;  %v2843_v59 = vld [vmem:[#allocation6 + $0x10] sm:$0xff]  ;;  %v2842_v20 = vld [vmem:[#allocation6 + $0x8] sm:$0xff]  ;;  %v2841_v38 = vld [vmem:[#allocation6] sm:$0xff] }
 0x2e1   :  { %3818 = vrsqrt.f32 %v2319_v36  ;;  %2645 = vmatmul.mubr.f32.gmra.mxu0 %v2436_v18  ;;  %v2445_v45 = vmax.f32 %v2363_v43, 0.0  ;;  %v2364_v14 = vmul.f32 %v3813_v40, %v5400_v24  ;;  %v2396_v30 = vmul.f32 %v3813_v40, %v5144_v56  ;;  %v2847_v18 = vld [vmem:[#allocation6 + $0x30] sm:$0xff] }
 0x2e2   :  { %2790 = vmatmul.mubr.f32.gmra.mxu1 %v2438_v63  ;;  %2649 = vmatprep.mubr.f32.mxu0 %v2441_v12  ;;  %v2348_v23 = vmul.f32 %v3813_v40, %v5401_v42  ;;  %v2444_v49 = vmax.f32 %v2347_v27, 0.0  ;;  %v2446_v50 = vmax.f32 %v2379_v55, 0.0  ;;  %v2380_v2 = vmul.f32 %v3813_v40, %v5128_v4  ;;  %v2845_v63 = vld [vmem:[#allocation6 + $0x20] sm:$0xff] }
 0x2e3   :  { %2794 = vmatprep.mubr.f32.mxu1 %v2443_v5  ;;  %v2449_v35 = vmax.f32 %v2364_v14, 0.0  ;;  %v2451_v44 = vmax.f32 %v2396_v30, 0.0  ;;  %3435 = vmatprep.subr.mxu0 %v2847_v18  ;;  %v5255_v12 = vld [vmem:[%s5330_s6] ss:$0 sm:$0xff] }
 0x2e4   :  { %v2448_v56 = vmax.f32 %v2348_v23, 0.0  ;;  %v2450_v31 = vmax.f32 %v2380_v2, 0.0  ;;  %3436 = vmatpush3.msra.mxu0 %v2847_v18  ;;  %3482 = vmatprep.subr.mxu1 %v2847_v18 }
 0x2e5   :  { %v3815_v61 = vpop.eup %3814  ;;  %2650 = vmatmul.mubr.f32.gmra.mxu0 %v2440_v3  ;;  %3498 = vmatpush3.msra.mxu1 %v2847_v18 }
 0x2e6   :  { %v2397_v22 = vmul.f32 %v3815_v61, %v5172_v17  ;;  %2795 = vmatmul.mubr.f32.gmra.mxu1 %v2442_v51  ;;  %2654 = vmatprep.mubr.f32.mxu0 %v2445_v45  ;;  %v2365_v58 = vmul.f32 %v3815_v61, %v5402_v48  ;;  %v2349_v1 = vmul.f32 %v3815_v61, %v5403_v16 }
 0x2e7   :  { %2799 = vmatprep.mubr.f32.mxu1 %v2447_v10  ;;  %v2381_v4 = vmul.f32 %v3815_v61, %v5160_v19  ;;  %v5406_v19 = vld [vmem:[#allocation22_spill] sm:$0xff] }
 0x2e8   :  { %v2455_v11 = vmax.f32 %v2397_v22, 0.0  ;;  %v2453_v29 = vmax.f32 %v2365_v58, 0.0  ;;  %v2452_v39 = vmax.f32 %v2349_v1, 0.0 }
 0x2e9   :  { %2655 = vmatmul.mubr.f32.gmra.mxu0 %v2444_v49  ;;  %v3817_v8 = vpop.eup %3816  ;;  %v2454_v46 = vmax.f32 %v2381_v4, 0.0 }
 0x2ea   :  { %2800 = vmatmul.mubr.f32.gmra.mxu1 %v2446_v50  ;;  %2659 = vmatprep.mubr.f32.mxu0 %v2449_v35  ;;  %v2398_v17 = vmul.f32 %v3817_v8, %v5194_v7  ;;  %v2366_v41 = vmul.f32 %v3817_v8, %v5404_v6  ;;  %v2350_v9 = vmul.f32 %v3817_v8, %v5405_v47 }
 0x2eb   :  { %2804 = vmatprep.mubr.f32.mxu1 %v2451_v44  ;;  %v2382_v15 = vmul.f32 %v3817_v8, %v5183_v34 }
 0x2ec   :  { %v2459_v37 = vmax.f32 %v2398_v17, 0.0  ;;  %v2457_v0 = vmax.f32 %v2366_v41, 0.0  ;;  %v2456_v5 = vmax.f32 %v2350_v9, 0.0 }
 0x2ed   :  { %2660 = vmatmul.mubr.f32.gmra.mxu0 %v2448_v56  ;;  %v2458_v34 = vmax.f32 %v2382_v15, 0.0 }
 0x2ee   :  { %v3819_v60 = vpop.eup %3818  ;;  %2805 = vmatmul.mubr.f32.gmra.mxu1 %v2450_v31  ;;  %2664 = vmatprep.mubr.f32.mxu0 %v2453_v29 }
 0x2ef   :  { %v2399_v25 = vmul.f32 %v3819_v60, %v5216_v32  ;;  %2809 = vmatprep.mubr.f32.mxu1 %v2455_v11  ;;  %v2367_v7 = vmul.f32 %v3819_v60, %v5406_v19  ;;  %v2351_v26 = vmul.f32 %v3819_v60, %v5407_v62  ;;  %v2383_v21 = vmul.f32 %v3819_v60, %v5206_v57  ;;  %v2846_v57 = vld [vmem:[#allocation6 + $0x28] sm:$0xff] }
 0x2f0   :  { %3437 = vmatprep.subr.mxu0 %v2846_v57  ;;  %3483 = vmatprep.subr.mxu1 %v2846_v57 }
 0x2f1   :  { %2665 = vmatmul.mubr.f32.gmra.mxu0 %v2452_v39  ;;  %v2461_v13 = vmax.f32 %v2367_v7, 0.0  ;;  %v2463_v52 = vmax.f32 %v2399_v25, 0.0  ;;  %v2460_v28 = vmax.f32 %v2351_v26, 0.0  ;;  %v2462_v32 = vmax.f32 %v2383_v21, 0.0  ;;  %3499 = vmatpush3.msra.mxu1 %v2846_v57 }
 0x2f2   :  { %2810 = vmatmul.mubr.f32.gmra.mxu1 %v2454_v46  ;;  %2669 = vmatprep.mubr.f32.mxu0 %v2457_v0 }
 0x2f3   :  { %2814 = vmatprep.mubr.f32.mxu1 %v2459_v37  ;;  %3438 = vmatpush3.msra.mxu0 %v2846_v57 }
 0x2f4   :  { %3439 = vmatprep.subr.mxu0 %v2845_v63  ;;  %3484 = vmatprep.subr.mxu1 %v2845_v63 }
 0x2f5   :  { %2670 = vmatmul.mubr.f32.gmra.mxu0 %v2456_v5  ;;  %3500 = vmatpush3.msra.mxu1 %v2845_v63 }
 0x2f6   :  { %2815 = vmatmul.mubr.f32.gmra.mxu1 %v2458_v34  ;;  %2674 = vmatprep.mubr.f32.mxu0 %v2461_v13 }
 0x2f7   :  { %2819 = vmatprep.mubr.f32.mxu1 %v2463_v52  ;;  %3440 = vmatpush3.msra.mxu0 %v2845_v63 }
 0x2f8   :  { %3441 = vmatprep.subr.mxu0 %v2844_v54  ;;  %3485 = vmatprep.subr.mxu1 %v2844_v54 }
 0x2f9   :  { %2675 = vmatmul.mubr.f32.gmra.mxu0 %v2460_v28  ;;  %3501 = vmatpush3.msra.mxu1 %v2844_v54 }
 0x2fa   :  { %2820 = vmatmul.mubr.f32.gmra.mxu1 %v2462_v32  ;;  %3442 = vmatpush3.msra.mxu0 %v2844_v54 }
 0x2fb   :  { %3443 = vmatprep.subr.mxu0 %v2843_v59  ;;  %3486 = vmatprep.subr.mxu1 %v2843_v59 }
 0x2fc   :  { %3444 = vmatpush3.msra.mxu0 %v2843_v59  ;;  %3502 = vmatpush3.msra.mxu1 %v2843_v59 }
 0x2fd   :  { %3445 = vmatprep.subr.mxu0 %v2842_v20  ;;  %3487 = vmatprep.subr.mxu1 %v2842_v20 }
 0x2fe   :  { %3446 = vmatpush3.msra.mxu0 %v2842_v20  ;;  %3503 = vmatpush3.msra.mxu1 %v2842_v20 }
 0x2ff   :  { %3447 = vmatprep.subr.mxu0 %v2841_v38  ;;  %3488 = vmatprep.subr.mxu1 %v2841_v38 }
 0x300   :  { %3448 = vmatpush3.msra.mxu0 %v2841_v38  ;;  %3504 = vmatpush3.msra.mxu1 %v2841_v38 }
 0x375   :  { %v3257_v36 = vpop.f32.mrf.mxu0 }
 0x377   :  { %v3258_v53 = vpop.f32.mrf.mxu0 }
 0x378   :  { %v3337_v43 = vpop.f32.mrf.mxu1  ;;  %v3259_v33 = vadd.f32 %v3258_v53, %v3257_v36 }
 0x37a   :  { %v2602_v27 = vadd.f32 %v3259_v33, %v5255_v12  ;;  %v3338_v40 = vpop.f32.mrf.mxu1 }
 0x37b   :  { %v3339_v3 = vadd.f32 %v3338_v40, %v3337_v43 }
 0x37c   :  { %v3260_v55 = vpop.f32.mrf.mxu0  ;;  %v3340_v51 = vpop.f32.mrf.mxu1 }
 0x37d   :  { %v2747_v45 = vadd.f32 %v3339_v3, %v2602_v27 }
 0x37e   :  { %v3261_v24 = vpop.f32.mrf.mxu0  ;;  %v3341_v14 = vpop.f32.mrf.mxu1 }
 0x37f   :  { %v2825_v10 = vmax.f32 %v2747_v45, 0.0  ;;  %v3262_v30 = vadd.f32 %v3261_v24, %v3260_v55  ;;  %v3342_v23 = vadd.f32 %v3341_v14, %v3340_v51 }
 0x381   :  { %v2607_v42 = vadd.f32 %v3262_v30, %v5255_v12  ;;  %3449 = vmatprep.mubr.f32.mxu0 %v2825_v10 }
 0x382   :  { %v3263_v61 = vpop.f32.mrf.mxu0 }
 0x383   :  { %v2752_v49 = vadd.f32 %v3342_v23, %v2607_v42  ;;  %v3343_v50 = vpop.f32.mrf.mxu1 }
 0x384   :  { %v3264_v2 = vpop.f32.mrf.mxu0 }
 0x385   :  { %v2826_v22 = vmax.f32 %v2752_v49, 0.0  ;;  %v3265_v35 = vadd.f32 %v3264_v2, %v3263_v61  ;;  %v3344_v48 = vpop.f32.mrf.mxu1 }
 0x386   :  { %v3345_v16 = vadd.f32 %v3344_v48, %v3343_v50 }
 0x387   :  { %v2612_v58 = vadd.f32 %v3265_v35, %v5255_v12  ;;  %v3266_v1 = vpop.f32.mrf.mxu0  ;;  %v3346_v44 = vpop.f32.mrf.mxu1  ;;  %3450 = vmatmul.mubr.f32.vlgmr.msra.gmra.mxu0 %v2826_v22 }
 0x389   :  { %v2757_v56 = vadd.f32 %v3345_v16, %v2612_v58  ;;  %v3267_v8 = vpop.f32.mrf.mxu0  ;;  %v3347_v11 = vpop.f32.mrf.mxu1 }
 0x38a   :  { %v3268_v31 = vadd.f32 %v3267_v8, %v3266_v1  ;;  %v3348_v17 = vadd.f32 %v3347_v11, %v3346_v44 }
 0x38b   :  { %v2827_v29 = vmax.f32 %v2757_v56, 0.0  ;;  %v3269_v6 = vpop.f32.mrf.mxu0 }
 0x38c   :  { %v2617_v4 = vadd.f32 %v3268_v31, %v5255_v12 }
 0x38d   :  { %v3349_v41 = vpop.f32.mrf.mxu1  ;;  %3452 = vmatprep.mubr.f32.mxu0 %v2827_v29  ;;  %v3270_v9 = vpop.f32.mrf.mxu0 }
 0x38e   :  { %v2762_v47 = vadd.f32 %v3348_v17, %v2617_v4  ;;  %v3271_v15 = vadd.f32 %v3270_v9, %v3269_v6 }
 0x38f   :  { %v3350_v39 = vpop.f32.mrf.mxu1 }
 0x390   :  { %v2828_v60 = vmax.f32 %v2762_v47, 0.0  ;;  %v3272_v37 = vpop.f32.mrf.mxu0  ;;  %v2622_v46 = vadd.f32 %v3271_v15, %v5255_v12  ;;  %v3351_v0 = vadd.f32 %v3350_v39, %v3349_v41 }
 0x391   :  { %v3352_v25 = vpop.f32.mrf.mxu1 }
 0x392   :  { %v3273_v19 = vpop.f32.mrf.mxu0  ;;  %3453 = vmatmul.mubr.f32.gmra.mxu0 %v2828_v60  ;;  %v2767_v7 = vadd.f32 %v3351_v0, %v2622_v46 }
 0x393   :  { %v3274_v62 = vadd.f32 %v3273_v19, %v3272_v37  ;;  %v3353_v26 = vpop.f32.mrf.mxu1 }
 0x394   :  { %v2829_v21 = vmax.f32 %v2767_v7, 0.0  ;;  %v3354_v34 = vadd.f32 %v3353_v26, %v3352_v25 }
 0x395   :  { %v2627_v5 = vadd.f32 %v3274_v62, %v5255_v12  ;;  %v3275_v13 = vpop.f32.mrf.mxu0  ;;  %v3355_v52 = vpop.f32.mrf.mxu1 }
 0x396   :  { %3455 = vmatprep.mubr.f32.mxu0 %v2829_v21 }
 0x397   :  { %v2772_v28 = vadd.f32 %v3354_v34, %v2627_v5  ;;  %v3276_v32 = vpop.f32.mrf.mxu0  ;;  %v3356_v18 = vpop.f32.mrf.mxu1 }
 0x398   :  { %v3277_v57 = vadd.f32 %v3276_v32, %v3275_v13  ;;  %v3357_v20 = vadd.f32 %v3356_v18, %v3355_v52 }
 0x399   :  { %v2830_v63 = vmax.f32 %v2772_v28, 0.0  ;;  %v3278_v54 = vpop.f32.mrf.mxu0  ;;  %v3358_v38 = vpop.f32.mrf.mxu1 }
 0x39a   :  { %v2632_v59 = vadd.f32 %v3277_v57, %v5255_v12 }
 0x39b   :  { %v3279_v36 = vpop.f32.mrf.mxu0  ;;  %3456 = vmatmul.mubr.f32.gmra.mxu0 %v2830_v63  ;;  %v3359_v33 = vpop.f32.mrf.mxu1 }
 0x39c   :  { %v2777_v53 = vadd.f32 %v3357_v20, %v2632_v59  ;;  %v3280_v43 = vadd.f32 %v3279_v36, %v3278_v54  ;;  %v3360_v55 = vadd.f32 %v3359_v33, %v3358_v38 }
 0x39d   :  { %v3281_v27 = vpop.f32.mrf.mxu0 }
 0x39e   :  { %v2831_v40 = vmax.f32 %v2777_v53, 0.0  ;;  %v2637_v3 = vadd.f32 %v3280_v43, %v5255_v12  ;;  %v3361_v51 = vpop.f32.mrf.mxu1 }
 0x39f   :  { %v3282_v45 = vpop.f32.mrf.mxu0 }
 0x3a0   :  { %v2782_v24 = vadd.f32 %v3360_v55, %v2637_v3  ;;  %v3283_v14 = vadd.f32 %v3282_v45, %v3281_v27  ;;  %v3362_v10 = vpop.f32.mrf.mxu1  ;;  %3458 = vmatprep.mubr.f32.mxu0 %v2831_v40 }
 0x3a1   :  { %v3284_v30 = vpop.f32.mrf.mxu0  ;;  %v3363_v61 = vadd.f32 %v3362_v10, %v3361_v51 }
 0x3a2   :  { %v2832_v42 = vmax.f32 %v2782_v24, 0.0  ;;  %v2642_v23 = vadd.f32 %v3283_v14, %v5255_v12  ;;  %v3364_v49 = vpop.f32.mrf.mxu1 }
 0x3a3   :  { %v3285_v50 = vpop.f32.mrf.mxu0 }
 0x3a4   :  { %v2787_v2 = vadd.f32 %v3363_v61, %v2642_v23  ;;  %v3286_v22 = vadd.f32 %v3285_v50, %v3284_v30  ;;  %v3365_v35 = vpop.f32.mrf.mxu1  ;;  %3459 = vmatmul.mubr.f32.gmra.mxu0 %v2832_v42  ;;  %v3224_v50 = vld [vmem:[%s5332_s8] ss:$0 sm:$0xff] }
 0x3a5   :  { %v3287_v48 = vpop.f32.mrf.mxu0  ;;  %v3366_v1 = vadd.f32 %v3365_v35, %v3364_v49 }
 0x3a6   :  { %v2833_v58 = vmax.f32 %v2787_v2, 0.0  ;;  %v2647_v16 = vadd.f32 %v3286_v22, %v5255_v12  ;;  %v3367_v44 = vpop.f32.mrf.mxu1 }
 0x3a7   :  { %v3288_v56 = vpop.f32.mrf.mxu0 }
 0x3a8   :  { %v2792_v8 = vadd.f32 %v3366_v1, %v2647_v16  ;;  %v3289_v11 = vadd.f32 %v3288_v56, %v3287_v48  ;;  %v3368_v31 = vpop.f32.mrf.mxu1  ;;  %3461 = vmatprep.mubr.f32.mxu1 %v2833_v58 }
 0x3a9   :  { %v3290_v29 = vpop.f32.mrf.mxu0  ;;  %v3369_v6 = vadd.f32 %v3368_v31, %v3367_v44 }
 0x3aa   :  { %v2834_v4 = vmax.f32 %v2792_v8, 0.0  ;;  %v2652_v17 = vadd.f32 %v3289_v11, %v5255_v12  ;;  %v3370_v41 = vpop.f32.mrf.mxu1 }
 0x3ab   :  { %v3291_v47 = vpop.f32.mrf.mxu0 }
 0x3ac   :  { %v2797_v9 = vadd.f32 %v3369_v6, %v2652_v17  ;;  %v3292_v15 = vadd.f32 %v3291_v47, %v3290_v29  ;;  %v3371_v39 = vpop.f32.mrf.mxu1  ;;  %3462 = vmatmul.mubr.f32.vlgmr.msra.gmra.mxu1 %v2834_v4 }
 0x3ad   :  { %v3293_v60 = vpop.f32.mrf.mxu0  ;;  %v3372_v0 = vadd.f32 %v3371_v39, %v3370_v41 }
 0x3ae   :  { %v2835_v37 = vmax.f32 %v2797_v9, 0.0  ;;  %v2657_v46 = vadd.f32 %v3292_v15, %v5255_v12  ;;  %v3373_v25 = vpop.f32.mrf.mxu1 }
 0x3af   :  { %v3294_v19 = vpop.f32.mrf.mxu0 }
 0x3b0   :  { %v2802_v7 = vadd.f32 %v3372_v0, %v2657_v46  ;;  %v3295_v62 = vadd.f32 %v3294_v19, %v3293_v60  ;;  %v3374_v26 = vpop.f32.mrf.mxu1  ;;  %3464 = vmatprep.mubr.f32.mxu1 %v2835_v37 }
 0x3b1   :  { %v3296_v21 = vpop.f32.mrf.mxu0  ;;  %v3375_v13 = vadd.f32 %v3374_v26, %v3373_v25 }
 0x3b2   :  { %v2836_v5 = vmax.f32 %v2802_v7, 0.0  ;;  %v2662_v34 = vadd.f32 %v3295_v62, %v5255_v12  ;;  %v3376_v52 = vpop.f32.mrf.mxu1 }
 0x3b3   :  { %v3297_v28 = vpop.f32.mrf.mxu0 }
 0x3b4   :  { %v2807_v32 = vadd.f32 %v3375_v13, %v2662_v34  ;;  %v3298_v18 = vadd.f32 %v3297_v28, %v3296_v21  ;;  %v3377_v57 = vpop.f32.mrf.mxu1  ;;  %3465 = vmatmul.mubr.f32.gmra.mxu1 %v2836_v5 }
 0x3b5   :  { %v3299_v63 = vpop.f32.mrf.mxu0  ;;  %v3378_v20 = vadd.f32 %v3377_v57, %v3376_v52 }
 0x3b6   :  { %v2837_v54 = vmax.f32 %v2807_v32, 0.0  ;;  %v2667_v59 = vadd.f32 %v3298_v18, %v5255_v12  ;;  %v3379_v38 = vpop.f32.mrf.mxu1 }
 0x3b7   :  { %v3300_v36 = vpop.f32.mrf.mxu0 }
 0x3b8   :  { %v2812_v53 = vadd.f32 %v3378_v20, %v2667_v59  ;;  %v3301_v43 = vadd.f32 %v3300_v36, %v3299_v63  ;;  %v3380_v33 = vpop.f32.mrf.mxu1  ;;  %3467 = vmatprep.mubr.f32.mxu1 %v2837_v54 }
 0x3b9   :  { %v3302_v27 = vpop.f32.mrf.mxu0  ;;  %v3381_v55 = vadd.f32 %v3380_v33, %v3379_v38 }
 0x3ba   :  { %v2838_v40 = vmax.f32 %v2812_v53, 0.0  ;;  %v2672_v3 = vadd.f32 %v3301_v43, %v5255_v12  ;;  %v3382_v51 = vpop.f32.mrf.mxu1 }
 0x3bb   :  { %v3303_v45 = vpop.f32.mrf.mxu0 }
 0x3bc   :  { %v2817_v24 = vadd.f32 %v3381_v55, %v2672_v3  ;;  %v3304_v14 = vadd.f32 %v3303_v45, %v3302_v27  ;;  %v3383_v10 = vpop.f32.mrf.mxu1  ;;  %3468 = vmatmul.mubr.f32.gmra.mxu1 %v2838_v40 }
 0x3bd   :  { %v3384_v23 = vadd.f32 %v3383_v10, %v3382_v51 }
 0x3be   :  { %v2839_v30 = vmax.f32 %v2817_v24, 0.0  ;;  %v2677_v42 = vadd.f32 %v3304_v14, %v5255_v12 }
 0x3c0   :  { %v2822_v61 = vadd.f32 %v3384_v23, %v2677_v42  ;;  %3470 = vmatprep.mubr.f32.mxu1 %v2839_v30 }
 0x3c2   :  { %v2840_v49 = vmax.f32 %v2822_v61, 0.0 }
 0x3c4   :  { %3471 = vmatmul.mubr.f32.gmra.mxu1 %v2840_v49 }
 0x447   :  { %v3451_v2 = vpop.f32.mrf.mxu0 }
 0x448   :  { %v2936_v22 = vadd.f32 %v3451_v2, %v3224_v50 }
 0x449   :  { %v2930_v35 = vpop.f32.mrf.mxu0 }
 0x44a   :  { %3010 = vst [vmem:[%s5333_s9 + $0x8] sm:$0xff] %v2936_v22  ;;  %v2931_v48 = vadd.f32 %v3224_v50, %v2930_v35 }
 0x44c   :  { %3009 = vst [vmem:[%s5333_s9] sm:$0xff] %v2931_v48 }
 0x452   :  { %v3454_v12 = vpop.f32.mrf.mxu0 }
 0x453   :  { %v2946_v58 = vadd.f32 %v3454_v12, %v3224_v50 }
 0x454   :  { %v2940_v16 = vpop.f32.mrf.mxu0 }
 0x455   :  { %3012 = vst [vmem:[%s5333_s9 + $0x18] sm:$0xff] %v2946_v58  ;;  %v2941_v1 = vadd.f32 %v3224_v50, %v2940_v16 }
 0x457   :  { %3011 = vst [vmem:[%s5333_s9 + $0x10] sm:$0xff] %v2941_v1 }
 0x45b   :  { %v3457_v44 = vpop.f32.mrf.mxu0 }
 0x45c   :  { %v2956_v56 = vadd.f32 %v3457_v44, %v3224_v50 }
 0x45d   :  { %v2950_v8 = vpop.f32.mrf.mxu0 }
 0x45e   :  { %3014 = vst [vmem:[%s5333_s9 + $0x28] sm:$0xff] %v2956_v56  ;;  %v2951_v11 = vadd.f32 %v3224_v50, %v2950_v8 }
 0x460   :  { %3013 = vst [vmem:[%s5333_s9 + $0x20] sm:$0xff] %v2951_v11 }
 0x464   :  { %v3460_v31 = vpop.f32.mrf.mxu0 }
 0x465   :  { %v2966_v29 = vadd.f32 %v3460_v31, %v3224_v50 }
 0x466   :  { %v2960_v4 = vpop.f32.mrf.mxu0 }
 0x467   :  { %3016 = vst [vmem:[%s5333_s9 + $0x38] sm:$0xff] %v2966_v29  ;;  %v2961_v17 = vadd.f32 %v3224_v50, %v2960_v4 }
 0x469   :  { %3015 = vst [vmem:[%s5333_s9 + $0x30] sm:$0xff] %v2961_v17 }
 0x46c   :  { %v3463_v6 = vpop.f32.mrf.mxu1 }
 0x46d   :  { %v2976_v41 = vadd.f32 %v3463_v6, %v3224_v50 }
 0x46e   :  { %v2970_v47 = vpop.f32.mrf.mxu1 }
 0x46f   :  { %3018 = vst [vmem:[%s5333_s9 + $0x48] sm:$0xff] %v2976_v41  ;;  %v2971_v9 = vadd.f32 %v3224_v50, %v2970_v47 }
 0x471   :  { %3017 = vst [vmem:[%s5333_s9 + $0x40] sm:$0xff] %v2971_v9 }
 0x474   :  { %v3466_v15 = vpop.f32.mrf.mxu1 }
 0x475   :  { %v2986_v39 = vadd.f32 %v3466_v15, %v3224_v50 }
 0x476   :  { %v2980_v60 = vpop.f32.mrf.mxu1 }
 0x477   :  { %3020 = vst [vmem:[%s5333_s9 + $0x58] sm:$0xff] %v2986_v39  ;;  %v2981_v37 = vadd.f32 %v3224_v50, %v2980_v60 }
 0x479   :  { %3019 = vst [vmem:[%s5333_s9 + $0x50] sm:$0xff] %v2981_v37 }
 0x47c   :  { %v3469_v46 = vpop.f32.mrf.mxu1 }
 0x47d   :  { %v2996_v0 = vadd.f32 %v3469_v46, %v3224_v50 }
 0x47e   :  { %v2990_v25 = vpop.f32.mrf.mxu1 }
 0x47f   :  { %3022 = vst [vmem:[%s5333_s9 + $0x68] sm:$0xff] %v2996_v0  ;;  %v2991_v19 = vadd.f32 %v3224_v50, %v2990_v25 }
 0x481   :  { %3021 = vst [vmem:[%s5333_s9 + $0x60] sm:$0xff] %v2991_v19 }
 0x484   :  { %v3472_v7 = vpop.f32.mrf.mxu1 }
 0x485   :  { %v3006_v62 = vadd.f32 %v3472_v7, %v3224_v50 }
 0x486   :  { %v3000_v26 = vpop.f32.mrf.mxu1 }
 0x487   :  { %3024 = vst [vmem:[%s5333_s9 + $0x78] sm:$0xff] %v3006_v62  ;;  %v3001_v21 = vadd.f32 %v3224_v50, %v3000_v26 }
 0x489   :  { %3023 = vst [vmem:[%s5333_s9 + $0x70] sm:$0xff] %v3001_v21 }
 0x48a   :  { %3029 = vsyncpa [#allocation3], 1 }
 0x48b   :  { %3030 = vsyncpa [#allocation5], 1 }

</bundles_post_ra>
